<compile_context>
chip_gen: v7x
topology: tpu7x:2x2x1
jax: 0.10.0
libtpu: 0.0.40
codegen_flags: <defaults>
</compile_context>

<pallas_src>
import jax
import jax.numpy as jnp
from jax import lax
from jax.experimental import pallas as pl
from jax.experimental.pallas import tpu as pltpu


def encoder_kernel(lens_ref, x_ref,
                   wih_ref, bih_ref,
                   whh_f_ref, bhh_f_ref,
                   whh_b_ref, bhh_b_ref,
                   fcw_ref, fcb_ref,
                   out_f_ref, out_b_ref, hid_ref,
                   gx_scr):
    TB, _ = x_ref.shape
    B = lens_ref.shape[0]
    Hp = whh_f_ref.shape[0]          # lane-padded hidden size (multiple of 128)
    T = TB // B
    H3 = 3 * Hp

    # ---- hoisted input projection: ONE bf16 GEMM for both directions ----------
    # Layout of the 6*Hp lanes: [rf | zf | nf | rb | zb | nb], each Hp wide.
    gx_scr[...] = (jnp.dot(x_ref[...], wih_ref[...],
                           preferred_element_type=jnp.float32) + bih_ref[...])

    lens = lens_ref[...]                                      # (B, 1) int32
    whh_f = whh_f_ref[...]
    bhh_f = bhh_f_ref[...]
    whh_b = whh_b_ref[...]
    bhh_b = bhh_b_ref[...]

    def gru_step(gx, h, whh, bhh):
        # gx holds x @ W_ih + b_ih for the fused gates [r | z | n] (lane-aligned).
        hh = jnp.dot(h, whh, preferred_element_type=jnp.float32) + bhh     # (B, 3Hp)
        r = jax.nn.sigmoid(gx[:, 0:Hp] + hh[:, 0:Hp])
        z = jax.nn.sigmoid(gx[:, Hp:2 * Hp] + hh[:, Hp:2 * Hp])
        n = jnp.tanh(gx[:, 2 * Hp:3 * Hp] + r * hh[:, 2 * Hp:3 * Hp])
        return (1.0 - z) * n + z * h

    def body(t, carry):
        hf, hb = carry
        tb = T - 1 - t
        row_f = pl.multiple_of(t * B, B)
        row_b = pl.multiple_of(tb * B, B)

        # forward direction: sequence position t
        gx_f = gx_scr[pl.ds(row_f, B), pl.ds(0, H3)]
        hf_new = gru_step(gx_f, hf, whh_f, bhh_f)
        valid_f = lens > t                                    # (B, 1) bool
        hf = jnp.where(valid_f, hf_new, hf)                   # freeze past length
        out_f_ref[pl.ds(row_f, B), :] = (
            jnp.where(valid_f, hf_new, 0.0).astype(out_f_ref.dtype))

        # backward direction: sequence position T-1-t (interleaved for ILP)
        gx_b = gx_scr[pl.ds(row_b, B), pl.ds(H3, H3)]
        hb_new = gru_step(gx_b, hb, whh_b, bhh_b)
        valid_b = lens > tb
        hb = jnp.where(valid_b, hb_new, hb)
        out_b_ref[pl.ds(row_b, B), :] = (
            jnp.where(valid_b, hb_new, 0.0).astype(out_b_ref.dtype))
        return hf, hb

    hf0 = jnp.zeros((B, Hp), jnp.float32)
    hb0 = jnp.zeros((B, Hp), jnp.float32)
    unroll = T if T <= 8 else 8                               # bounded unroll
    hf, hb = lax.fori_loop(0, T, body, (hf0, hb0), unroll=unroll)

    # ---- final hidden: tanh([h_fwd ; h_bwd] @ W_fc + b) — one fused matmul -----
    hcat = jnp.concatenate([hf, hb], axis=-1)                 # (B, 2Hp) lane-aligned
    hid = (jnp.dot(hcat, fcw_ref[...], preferred_element_type=jnp.float32)
           + fcb_ref[...])
    hid_ref[...] = jnp.tanh(hid).astype(hid_ref.dtype)


def encoder_forward(params, x_ids, lengths_list):
    B_in = x_ids.shape[0]
    T = int(max(lengths_list))                 # total_length = max(lengths)
    E = params["embed"].shape[1]
    H = params["wih_f"].shape[2]
    D = params["fc_w"].shape[2]

    B = max(8, ((B_in + 7) // 8) * 8)          # pad batch to sublane width
    Hp = max(128, ((H + 127) // 128) * 128)    # pad hidden to lane width

    # Embedding lookup, time-major directly (transpose the tiny int ids, not the
    # (B,T,E) float tensor).  Cast to bf16 for the MXU projection GEMM.
    # TODO(synk): dropout treated as identity (inference mode); training dropout
    # would use pltpu.prng_seed / prng_random_bits on the embedded activations.
    ids = jnp.zeros((B, T), dtype=x_ids.dtype).at[:B_in].set(x_ids[:, :T])
    x_flat = jnp.take(params["embed"], ids.T.reshape(-1), axis=0).astype(jnp.bfloat16)

    lens = jnp.zeros((B, 1), jnp.int32).at[:B_in, 0].set(
        jnp.asarray(lengths_list, jnp.int32))                 # padded rows: len 0

    def pad_w(w):   # (A, H) -> (A, Hp)
        return jnp.pad(w, ((0, 0), (0, Hp - H)))

    def pad_b(b):   # (1, H) -> (1, Hp)
        return jnp.pad(b, ((0, 0), (0, Hp - H)))

    def fuse3_w(w):  # (3, A, H) -> (A, 3Hp), gate order [r | z | n], lane-padded
        return jnp.concatenate([pad_w(w[0]), pad_w(w[1]), pad_w(w[2])], axis=-1)

    def fuse3_b(b):  # (3, 1, H) -> (1, 3Hp)
        return jnp.concatenate([pad_b(b[0]), pad_b(b[1]), pad_b(b[2])], axis=-1)

    def pad_whh(w):  # (3, H, H) -> (Hp, 3Hp): pad rows and each gate's cols
        w = jnp.pad(w, ((0, 0), (0, Hp - H), (0, 0)))
        return jnp.concatenate([pad_w(w[0]), pad_w(w[1]), pad_w(w[2])], axis=-1)

    # One fused input-projection weight for BOTH directions: (E, 6Hp) bf16.
    wih = jnp.concatenate([fuse3_w(params["wih_f"]), fuse3_w(params["wih_b"])],
                          axis=-1).astype(jnp.bfloat16)
    bih = jnp.concatenate([fuse3_b(params["bih_f"]), fuse3_b(params["bih_b"])],
                          axis=-1)                            # (1, 6Hp) f32

    whh_f, whh_b = pad_whh(params["whh_f"]), pad_whh(params["whh_b"])
    bhh_f, bhh_b = fuse3_b(params["bhh_f"]), fuse3_b(params["bhh_b"])

    fc_w = jnp.concatenate([jnp.pad(params["fc_w"][0], ((0, Hp - H), (0, 0))),
                            jnp.pad(params["fc_w"][1], ((0, Hp - H), (0, 0)))],
                           axis=0)                            # (2Hp, D)
    fc_b = params["fc_b"]                                     # (1, D)

    # TODO(synk): on v7x consider bf16 for the (T*B,6Hp) gate scratch to halve
    # its VMEM footprint (validate accuracy first).
    footprint = (T * B * E * 2            # x bf16
                 + T * B * 6 * Hp * 4     # gate pre-activation scratch (f32)
                 + 2 * T * B * Hp * 4     # out_f / out_b
                 + E * 6 * Hp * 2         # wih bf16
                 + 2 * Hp * 3 * Hp * 4    # whh_f / whh_b
                 + 2 * Hp * D * 4 + 6 * Hp * 4 * 3 + B * D * 4 + (1 << 16))
    vmem_limit = int(min(100 * 1024 * 1024, max(32 * 1024 * 1024, 2 * footprint)))

    vmem = pl.BlockSpec(memory_space=pltpu.MemorySpace.VMEM)

    out_f, out_b, hid = pl.pallas_call(
        encoder_kernel,
        out_shape=(jax.ShapeDtypeStruct((T * B, Hp), jnp.float32),
                   jax.ShapeDtypeStruct((T * B, Hp), jnp.float32),
                   jax.ShapeDtypeStruct((B, D), jnp.float32)),
        in_specs=[vmem] * 10,
        out_specs=(vmem, vmem, vmem),
        scratch_shapes=[pltpu.VMEM((T * B, 6 * Hp), jnp.float32)],
        compiler_params=pltpu.CompilerParams(vmem_limit_bytes=vmem_limit),
    )(lens, x_flat, wih, bih, whh_f, bhh_f, whh_b, bhh_b, fc_w, fc_b)

    out_f = out_f.reshape(T, B, Hp)[:, :B_in, :H]
    out_b = out_b.reshape(T, B, Hp)[:, :B_in, :H]
    out = jnp.concatenate([out_f, out_b], axis=-1).transpose(1, 0, 2)   # (B, T, 2H)
    hid = hid[:B_in][None]                                              # (1, B, D)
    return out, hid


# ----------------------- pure-JAX reference (for checking) -----------------------
def _gru_step_ref(x, h, wih, whh, bih, bhh):
    r = jax.nn.sigmoid(x @ wih[0] + bih[0] + h @ whh[0] + bhh[0])
    z = jax.nn.sigmoid(x @ wih[1] + bih[1] + h @ whh[1] + bhh[1])
    n = jnp.tanh(x @ wih[2] + bih[2] + r * (h @ whh[2] + bhh[2]))
    return (1.0 - z) * n + z * h


def encoder_reference(params, x_ids, lengths_list):
    B = x_ids.shape[0]
    T = int(max(lengths_list))
    H = params["wih_f"].shape[2]
    lens = jnp.asarray(lengths_list, jnp.int32).reshape(B, 1)
    emb = jnp.take(params["embed"], x_ids[:, :T], axis=0).astype(jnp.float32)
    hf = jnp.zeros((B, H), jnp.float32)
    hb = jnp.zeros((B, H), jnp.float32)
    outf = [None] * T
    outb = [None] * T
    for t in range(T):
        hn = _gru_step_ref(emb[:, t], hf, params["wih_f"], params["whh_f"],
                           params["bih_f"], params["bhh_f"])
        valid = lens > t
        hf = jnp.where(valid, hn, hf)
        outf[t] = jnp.where(valid, hn, 0.0)
    for t in range(T - 1, -1, -1):
        hn = _gru_step_ref(emb[:, t], hb, params["wih_b"], params["whh_b"],
                           params["bih_b"], params["bhh_b"])
        valid = lens > t
        hb = jnp.where(valid, hn, hb)
        outb[t] = jnp.where(valid, hn, 0.0)
    out = jnp.concatenate([jnp.stack(outf, 1), jnp.stack(outb, 1)], axis=-1)
    hid = jnp.tanh(hf @ params["fc_w"][0] + hb @ params["fc_w"][1] + params["fc_b"])[None]
    return out, hid


if __name__ == "__main__":
    # Small, deterministic configuration.
    V, E, H, D = 50, 32, 32, 32        # vocab, embed, enc_hidden, dec_hidden
    B, T = 4, 8
    key = jax.random.PRNGKey(0)
    ks = jax.random.split(key, 16)
    s = 0.1
    params = {
        # synthetic "pretrained_embed"
        "embed": jax.random.normal(ks[0], (V, E), jnp.float32),
        "wih_f": s * jax.random.normal(ks[1], (3, E, H), jnp.float32),
        "whh_f": s * jax.random.normal(ks[2], (3, H, H), jnp.float32),
        "bih_f": s * jax.random.normal(ks[3], (3, 1, H), jnp.float32),
        "bhh_f": s * jax.random.normal(ks[4], (3, 1, H), jnp.float32),
        "wih_b": s * jax.random.normal(ks[5], (3, E, H), jnp.float32),
        "whh_b": s * jax.random.normal(ks[6], (3, H, H), jnp.float32),
        "bih_b": s * jax.random.normal(ks[7], (3, 1, H), jnp.float32),
        "bhh_b": s * jax.random.normal(ks[8], (3, 1, H), jnp.float32),
        "fc_w":  s * jax.random.normal(ks[9], (2, H, D), jnp.float32),
        "fc_b":  s * jax.random.normal(ks[10], (1, D), jnp.float32),
    }
    x_ids = jax.random.randint(ks[11], (B, T), 0, V, dtype=jnp.int32)
    lengths = [8, 6, 5, 3]             # sorted descending, max == T

    out, hid = encoder_forward(params, x_ids, lengths)
    jax.block_until_ready((out, hid))

    ref_out, ref_hid = encoder_reference(params, x_ids, lengths)
    assert out.shape == (B, T, 2 * H) and hid.shape == (1, B, D)
    # bf16 operands on the hoisted projection GEMM -> slightly looser tolerance.
    assert jnp.allclose(out, ref_out, atol=3e-2, rtol=3e-2)
    assert jnp.allclose(hid, ref_hid, atol=3e-2, rtol=3e-2)
    print("KERNEL_OK")
</pallas_src>

<mosaic_0001>
module attributes {stable_mosaic.version = 11 : i64} {
  func.func @encoder_kernel(%arg0: memref<8x1xi32, #tpu.memory_space<vmem>>, %arg1: memref<64x32xbf16, #tpu.memory_space<vmem>>, %arg2: memref<32x768xbf16, #tpu.memory_space<vmem>>, %arg3: memref<1x768xf32, #tpu.memory_space<vmem>>, %arg4: memref<128x384xf32, #tpu.memory_space<vmem>>, %arg5: memref<1x384xf32, #tpu.memory_space<vmem>>, %arg6: memref<128x384xf32, #tpu.memory_space<vmem>>, %arg7: memref<1x384xf32, #tpu.memory_space<vmem>>, %arg8: memref<256x32xf32, #tpu.memory_space<vmem>>, %arg9: memref<1x32xf32, #tpu.memory_space<vmem>>, %arg10: memref<64x128xf32, #tpu.memory_space<vmem>>, %arg11: memref<64x128xf32, #tpu.memory_space<vmem>>, %arg12: memref<8x32xf32, #tpu.memory_space<vmem>>, %arg13: memref<64x768xf32, #tpu.memory_space<vmem>>) attributes {dimension_semantics = [], scalar_prefetch = 0 : i64, scratch_operands = 1 : i64, tpu.core_type = #tpu.core_type<tc>} {
    %c0 = arith.constant 0 : index
    %c0_0 = arith.constant 0 : index
    %0 = vector.load %arg1[%c0, %c0_0] : memref<64x32xbf16, #tpu.memory_space<vmem>>, vector<64x32xbf16>
    %c0_1 = arith.constant 0 : index
    %c0_2 = arith.constant 0 : index
    %1 = vector.load %arg2[%c0_1, %c0_2] : memref<32x768xbf16, #tpu.memory_space<vmem>>, vector<32x768xbf16>
    %cst = arith.constant dense<0.000000e+00> : vector<64x768xf32>
    %2 = tpu.matmul %0, %1, %cst {dimension_numbers = #tpu.dot_dimension_numbers<[1], [0], [0], [1], [0, 0, 1, 1], [], []>} : vector<64x32xbf16>, vector<32x768xbf16>, vector<64x768xf32> -> vector<64x768xf32>
    %c0_3 = arith.constant 0 : index
    %c0_4 = arith.constant 0 : index
    %3 = vector.load %arg3[%c0_3, %c0_4] : memref<1x768xf32, #tpu.memory_space<vmem>>, vector<1x768xf32>
    %4 = vector.broadcast %3 : vector<1x768xf32> to vector<64x768xf32>
    %5 = arith.addf %2, %4 : vector<64x768xf32>
    %c0_5 = arith.constant 0 : index
    %c0_6 = arith.constant 0 : index
    %6 = vector.load %arg13[%c0_5, %c0_6] : memref<64x768xf32, #tpu.memory_space<vmem>>, vector<64x768xf32>
    tpu.vector_store %arg13[%c0_5, %c0_6], %5 {strides = array<i32>} : memref<64x768xf32, #tpu.memory_space<vmem>>, vector<64x768xf32>,
    %c0_7 = arith.constant 0 : index
    %c0_8 = arith.constant 0 : index
    %7 = vector.load %arg0[%c0_7, %c0_8] : memref<8x1xi32, #tpu.memory_space<vmem>>, vector<8x1xi32>
    %c0_9 = arith.constant 0 : index
    %c0_10 = arith.constant 0 : index
    %8 = vector.load %arg4[%c0_9, %c0_10] : memref<128x384xf32, #tpu.memory_space<vmem>>, vector<128x384xf32>
    %c0_11 = arith.constant 0 : index
    %c0_12 = arith.constant 0 : index
    %9 = vector.load %arg5[%c0_11, %c0_12] : memref<1x384xf32, #tpu.memory_space<vmem>>, vector<1x384xf32>
    %c0_13 = arith.constant 0 : index
    %c0_14 = arith.constant 0 : index
    %10 = vector.load %arg6[%c0_13, %c0_14] : memref<128x384xf32, #tpu.memory_space<vmem>>, vector<128x384xf32>
    %c0_15 = arith.constant 0 : index
    %c0_16 = arith.constant 0 : index
    %11 = vector.load %arg7[%c0_15, %c0_16] : memref<1x384xf32, #tpu.memory_space<vmem>>, vector<1x384xf32>
    %cst_17 = arith.constant 0.000000e+00 : f32
    %12 = vector.broadcast %cst_17 : f32 to vector<8x128xf32>
    %cst_18 = arith.constant 0.000000e+00 : f32
    %13 = vector.broadcast %cst_18 : f32 to vector<8x128xf32>
    %c0_i32 = arith.constant 0 : i32
    %c7_i32 = arith.constant 7 : i32
    %14 = arith.subi %c7_i32, %c0_i32 : i32
    %c8_i32 = arith.constant 8 : i32
    %15 = arith.muli %c0_i32, %c8_i32 : i32
    %16 = tpu.assume_multiple %15, 8 : i32
    %c8_i32_19 = arith.constant 8 : i32
    %17 = arith.muli %14, %c8_i32_19 : i32
    %18 = tpu.assume_multiple %17, 8 : i32
    %19 = arith.index_cast %16 : i32 to index
    %c0_20 = arith.constant 0 : index
    %20 = vector.load %arg13[%19, %c0_20] : memref<64x768xf32, #tpu.memory_space<vmem>>, vector<8x384xf32>
    %cst_21 = arith.constant dense<0.000000e+00> : vector<8x384xf32>
    %21 = tpu.matmul %12, %8, %cst_21 {dimension_numbers = #tpu.dot_dimension_numbers<[1], [0], [0], [1], [0, 0, 1, 1], [], []>} : vector<8x128xf32>, vector<128x384xf32>, vector<8x384xf32> -> vector<8x384xf32>
    %22 = vector.broadcast %9 : vector<1x384xf32> to vector<8x384xf32>
    %23 = arith.addf %21, %22 : vector<8x384xf32>
    %24 = vector.extract_strided_slice %20 {offsets = [0, 0], sizes = [8, 128], strides = [1, 1]} : vector<8x384xf32> to vector<8x128xf32>
    %25 = vector.extract_strided_slice %23 {offsets = [0, 0], sizes = [8, 128], strides = [1, 1]} : vector<8x384xf32> to vector<8x128xf32>
    %26 = arith.addf %24, %25 : vector<8x128xf32>
    %27 = arith.negf %26 : vector<8x128xf32>
    %28 = math.exp %27 : vector<8x128xf32>
    %cst_22 = arith.constant 1.000000e+00 : f32
    %29 = vector.broadcast %cst_22 : f32 to vector<8x128xf32>
    %30 = arith.addf %29, %28 : vector<8x128xf32>
    %31 = arith.divf %29, %30 : vector<8x128xf32>
    %32 = vector.extract_strided_slice %20 {offsets = [0, 128], sizes = [8, 128], strides = [1, 1]} : vector<8x384xf32> to vector<8x128xf32>
    %33 = vector.extract_strided_slice %23 {offsets = [0, 128], sizes = [8, 128], strides = [1, 1]} : vector<8x384xf32> to vector<8x128xf32>
    %34 = arith.addf %32, %33 : vector<8x128xf32>
    %35 = arith.negf %34 : vector<8x128xf32>
    %36 = math.exp %35 : vector<8x128xf32>
    %cst_23 = arith.constant 1.000000e+00 : f32
    %37 = vector.broadcast %cst_23 : f32 to vector<8x128xf32>
    %38 = arith.addf %37, %36 : vector<8x128xf32>
    %39 = arith.divf %37, %38 : vector<8x128xf32>
    %40 = vector.extract_strided_slice %20 {offsets = [0, 256], sizes = [8, 128], strides = [1, 1]} : vector<8x384xf32> to vector<8x128xf32>
    %41 = vector.extract_strided_slice %23 {offsets = [0, 256], sizes = [8, 128], strides = [1, 1]} : vector<8x384xf32> to vector<8x128xf32>
    %42 = arith.mulf %31, %41 : vector<8x128xf32>
    %43 = arith.addf %40, %42 : vector<8x128xf32>
    %44 = math.tanh %43 : vector<8x128xf32>
    %cst_24 = arith.constant 1.000000e+00 : f32
    %45 = vector.broadcast %cst_24 : f32 to vector<8x128xf32>
    %46 = arith.subf %45, %39 : vector<8x128xf32>
    %47 = arith.mulf %46, %44 : vector<8x128xf32>
    %48 = arith.mulf %39, %12 : vector<8x128xf32>
    %49 = arith.addf %47, %48 : vector<8x128xf32>
    %50 = vector.broadcast %c0_i32 : i32 to vector<8x1xi32>
    %51 = arith.cmpi sgt, %7, %50 : vector<8x1xi32>
    %52 = vector.shape_cast %51 : vector<8x1xi1> to vector<8x1xi1>
    %53 = vector.broadcast %52 : vector<8x1xi1> to vector<8x128xi1>
    %54 = arith.select %53, %49, %12 : vector<8x128xi1>, vector<8x128xf32>
    %cst_25 = arith.constant 0.000000e+00 : f32
    %55 = vector.shape_cast %51 : vector<8x1xi1> to vector<8x1xi1>
    %56 = vector.broadcast %55 : vector<8x1xi1> to vector<8x128xi1>
    %57 = vector.broadcast %cst_25 : f32 to vector<8x128xf32>
    %58 = arith.select %56, %49, %57 : vector<8x128xi1>, vector<8x128xf32>
    %59 = arith.index_cast %16 : i32 to index
    %c0_26 = arith.constant 0 : index
    %60 = vector.load %arg10[%59, %c0_26] : memref<64x128xf32, #tpu.memory_space<vmem>>, vector<8x128xf32>
    tpu.vector_store %arg10[%59, %c0_26], %58 {strides = array<i32>} : memref<64x128xf32, #tpu.memory_space<vmem>>, vector<8x128xf32>,
    %61 = arith.index_cast %18 : i32 to index
    %c384 = arith.constant 384 : index
    %62 = vector.load %arg13[%61, %c384] : memref<64x768xf32, #tpu.memory_space<vmem>>, vector<8x384xf32>
    %cst_27 = arith.constant dense<0.000000e+00> : vector<8x384xf32>
    %63 = tpu.matmul %13, %10, %cst_27 {dimension_numbers = #tpu.dot_dimension_numbers<[1], [0], [0], [1], [0, 0, 1, 1], [], []>} : vector<8x128xf32>, vector<128x384xf32>, vector<8x384xf32> -> vector<8x384xf32>
    %64 = vector.broadcast %11 : vector<1x384xf32> to vector<8x384xf32>
    %65 = arith.addf %63, %64 : vector<8x384xf32>
    %66 = vector.extract_strided_slice %62 {offsets = [0, 0], sizes = [8, 128], strides = [1, 1]} : vector<8x384xf32> to vector<8x128xf32>
    %67 = vector.extract_strided_slice %65 {offsets = [0, 0], sizes = [8, 128], strides = [1, 1]} : vector<8x384xf32> to vector<8x128xf32>
    %68 = arith.addf %66, %67 : vector<8x128xf32>
    %69 = arith.negf %68 : vector<8x128xf32>
    %70 = math.exp %69 : vector<8x128xf32>
    %cst_28 = arith.constant 1.000000e+00 : f32
    %71 = vector.broadcast %cst_28 : f32 to vector<8x128xf32>
    %72 = arith.addf %71, %70 : vector<8x128xf32>
    %73 = arith.divf %71, %72 : vector<8x128xf32>
    %74 = vector.extract_strided_slice %62 {offsets = [0, 128], sizes = [8, 128], strides = [1, 1]} : vector<8x384xf32> to vector<8x128xf32>
    %75 = vector.extract_strided_slice %65 {offsets = [0, 128], sizes = [8, 128], strides = [1, 1]} : vector<8x384xf32> to vector<8x128xf32>
    %76 = arith.addf %74, %75 : vector<8x128xf32>
    %77 = arith.negf %76 : vector<8x128xf32>
    %78 = math.exp %77 : vector<8x128xf32>
    %cst_29 = arith.constant 1.000000e+00 : f32
    %79 = vector.broadcast %cst_29 : f32 to vector<8x128xf32>
    %80 = arith.addf %79, %78 : vector<8x128xf32>
    %81 = arith.divf %79, %80 : vector<8x128xf32>
    %82 = vector.extract_strided_slice %62 {offsets = [0, 256], sizes = [8, 128], strides = [1, 1]} : vector<8x384xf32> to vector<8x128xf32>
    %83 = vector.extract_strided_slice %65 {offsets = [0, 256], sizes = [8, 128], strides = [1, 1]} : vector<8x384xf32> to vector<8x128xf32>
    %84 = arith.mulf %73, %83 : vector<8x128xf32>
    %85 = arith.addf %82, %84 : vector<8x128xf32>
    %86 = math.tanh %85 : vector<8x128xf32>
    %cst_30 = arith.constant 1.000000e+00 : f32
    %87 = vector.broadcast %cst_30 : f32 to vector<8x128xf32>
    %88 = arith.subf %87, %81 : vector<8x128xf32>
    %89 = arith.mulf %88, %86 : vector<8x128xf32>
    %90 = arith.mulf %81, %13 : vector<8x128xf32>
    %91 = arith.addf %89, %90 : vector<8x128xf32>
    %92 = vector.broadcast %14 : i32 to vector<8x1xi32>
    %93 = arith.cmpi sgt, %7, %92 : vector<8x1xi32>
    %94 = vector.shape_cast %93 : vector<8x1xi1> to vector<8x1xi1>
    %95 = vector.broadcast %94 : vector<8x1xi1> to vector<8x128xi1>
    %96 = arith.select %95, %91, %13 : vector<8x128xi1>, vector<8x128xf32>
    %cst_31 = arith.constant 0.000000e+00 : f32
    %97 = vector.shape_cast %93 : vector<8x1xi1> to vector<8x1xi1>
    %98 = vector.broadcast %97 : vector<8x1xi1> to vector<8x128xi1>
    %99 = vector.broadcast %cst_31 : f32 to vector<8x128xf32>
    %100 = arith.select %98, %91, %99 : vector<8x128xi1>, vector<8x128xf32>
    %101 = arith.index_cast %18 : i32 to index
    %c0_32 = arith.constant 0 : index
    %102 = vector.load %arg11[%101, %c0_32] : memref<64x128xf32, #tpu.memory_space<vmem>>, vector<8x128xf32>
    tpu.vector_store %arg11[%101, %c0_32], %100 {strides = array<i32>} : memref<64x128xf32, #tpu.memory_space<vmem>>, vector<8x128xf32>,
    %c1_i32 = arith.constant 1 : i32
    %c7_i32_33 = arith.constant 7 : i32
    %103 = arith.subi %c7_i32_33, %c1_i32 : i32
    %c8_i32_34 = arith.constant 8 : i32
    %104 = arith.muli %c1_i32, %c8_i32_34 : i32
    %105 = tpu.assume_multiple %104, 8 : i32
    %c8_i32_35 = arith.constant 8 : i32
    %106 = arith.muli %103, %c8_i32_35 : i32
    %107 = tpu.assume_multiple %106, 8 : i32
    %108 = arith.index_cast %105 : i32 to index
    %c0_36 = arith.constant 0 : index
    %109 = vector.load %arg13[%108, %c0_36] : memref<64x768xf32, #tpu.memory_space<vmem>>, vector<8x384xf32>
    %cst_37 = arith.constant dense<0.000000e+00> : vector<8x384xf32>
    %110 = tpu.matmul %54, %8, %cst_37 {dimension_numbers = #tpu.dot_dimension_numbers<[1], [0], [0], [1], [0, 0, 1, 1], [], []>} : vector<8x128xf32>, vector<128x384xf32>, vector<8x384xf32> -> vector<8x384xf32>
    %111 = vector.broadcast %9 : vector<1x384xf32> to vector<8x384xf32>
    %112 = arith.addf %110, %111 : vector<8x384xf32>
    %113 = vector.extract_strided_slice %109 {offsets = [0, 0], sizes = [8, 128], strides = [1, 1]} : vector<8x384xf32> to vector<8x128xf32>
    %114 = vector.extract_strided_slice %112 {offsets = [0, 0], sizes = [8, 128], strides = [1, 1]} : vector<8x384xf32> to vector<8x128xf32>
    %115 = arith.addf %113, %114 : vector<8x128xf32>
    %116 = arith.negf %115 : vector<8x128xf32>
    %117 = math.exp %116 : vector<8x128xf32>
    %cst_38 = arith.constant 1.000000e+00 : f32
    %118 = vector.broadcast %cst_38 : f32 to vector<8x128xf32>
    %119 = arith.addf %118, %117 : vector<8x128xf32>
    %120 = arith.divf %118, %119 : vector<8x128xf32>
    %121 = vector.extract_strided_slice %109 {offsets = [0, 128], sizes = [8, 128], strides = [1, 1]} : vector<8x384xf32> to vector<8x128xf32>
    %122 = vector.extract_strided_slice %112 {offsets = [0, 128], sizes = [8, 128], strides = [1, 1]} : vector<8x384xf32> to vector<8x128xf32>
    %123 = arith.addf %121, %122 : vector<8x128xf32>
    %124 = arith.negf %123 : vector<8x128xf32>
    %125 = math.exp %124 : vector<8x128xf32>
    %cst_39 = arith.constant 1.000000e+00 : f32
    %126 = vector.broadcast %cst_39 : f32 to vector<8x128xf32>
    %127 = arith.addf %126, %125 : vector<8x128xf32>
    %128 = arith.divf %126, %127 : vector<8x128xf32>
    %129 = vector.extract_strided_slice %109 {offsets = [0, 256], sizes = [8, 128], strides = [1, 1]} : vector<8x384xf32> to vector<8x128xf32>
    %130 = vector.extract_strided_slice %112 {offsets = [0, 256], sizes = [8, 128], strides = [1, 1]} : vector<8x384xf32> to vector<8x128xf32>
    %131 = arith.mulf %120, %130 : vector<8x128xf32>
    %132 = arith.addf %129, %131 : vector<8x128xf32>
    %133 = math.tanh %132 : vector<8x128xf32>
    %cst_40 = arith.constant 1.000000e+00 : f32
    %134 = vector.broadcast %cst_40 : f32 to vector<8x128xf32>
    %135 = arith.subf %134, %128 : vector<8x128xf32>
    %136 = arith.mulf %135, %133 : vector<8x128xf32>
    %137 = arith.mulf %128, %54 : vector<8x128xf32>
    %138 = arith.addf %136, %137 : vector<8x128xf32>
    %139 = vector.broadcast %c1_i32 : i32 to vector<8x1xi32>
    %140 = arith.cmpi sgt, %7, %139 : vector<8x1xi32>
    %141 = vector.shape_cast %140 : vector<8x1xi1> to vector<8x1xi1>
    %142 = vector.broadcast %141 : vector<8x1xi1> to vector<8x128xi1>
    %143 = arith.select %142, %138, %54 : vector<8x128xi1>, vector<8x128xf32>
    %cst_41 = arith.constant 0.000000e+00 : f32
    %144 = vector.shape_cast %140 : vector<8x1xi1> to vector<8x1xi1>
    %145 = vector.broadcast %144 : vector<8x1xi1> to vector<8x128xi1>
    %146 = vector.broadcast %cst_41 : f32 to vector<8x128xf32>
    %147 = arith.select %145, %138, %146 : vector<8x128xi1>, vector<8x128xf32>
    %148 = arith.index_cast %105 : i32 to index
    %c0_42 = arith.constant 0 : index
    %149 = vector.load %arg10[%148, %c0_42] : memref<64x128xf32, #tpu.memory_space<vmem>>, vector<8x128xf32>
    tpu.vector_store %arg10[%148, %c0_42], %147 {strides = array<i32>} : memref<64x128xf32, #tpu.memory_space<vmem>>, vector<8x128xf32>,
    %150 = arith.index_cast %107 : i32 to index
    %c384_43 = arith.constant 384 : index
    %151 = vector.load %arg13[%150, %c384_43] : memref<64x768xf32, #tpu.memory_space<vmem>>, vector<8x384xf32>
    %cst_44 = arith.constant dense<0.000000e+00> : vector<8x384xf32>
    %152 = tpu.matmul %96, %10, %cst_44 {dimension_numbers = #tpu.dot_dimension_numbers<[1], [0], [0], [1], [0, 0, 1, 1], [], []>} : vector<8x128xf32>, vector<128x384xf32>, vector<8x384xf32> -> vector<8x384xf32>
    %153 = vector.broadcast %11 : vector<1x384xf32> to vector<8x384xf32>
    %154 = arith.addf %152, %153 : vector<8x384xf32>
    %155 = vector.extract_strided_slice %151 {offsets = [0, 0], sizes = [8, 128], strides = [1, 1]} : vector<8x384xf32> to vector<8x128xf32>
    %156 = vector.extract_strided_slice %154 {offsets = [0, 0], sizes = [8, 128], strides = [1, 1]} : vector<8x384xf32> to vector<8x128xf32>
    %157 = arith.addf %155, %156 : vector<8x128xf32>
    %158 = arith.negf %157 : vector<8x128xf32>
    %159 = math.exp %158 : vector<8x128xf32>
    %cst_45 = arith.constant 1.000000e+00 : f32
    %160 = vector.broadcast %cst_45 : f32 to vector<8x128xf32>
    %161 = arith.addf %160, %159 : vector<8x128xf32>
    %162 = arith.divf %160, %161 : vector<8x128xf32>
    %163 = vector.extract_strided_slice %151 {offsets = [0, 128], sizes = [8, 128], strides = [1, 1]} : vector<8x384xf32> to vector<8x128xf32>
    %164 = vector.extract_strided_slice %154 {offsets = [0, 128], sizes = [8, 128], strides = [1, 1]} : vector<8x384xf32> to vector<8x128xf32>
    %165 = arith.addf %163, %164 : vector<8x128xf32>
    %166 = arith.negf %165 : vector<8x128xf32>
    %167 = math.exp %166 : vector<8x128xf32>
    %cst_46 = arith.constant 1.000000e+00 : f32
    %168 = vector.broadcast %cst_46 : f32 to vector<8x128xf32>
    %169 = arith.addf %168, %167 : vector<8x128xf32>
    %170 = arith.divf %168, %169 : vector<8x128xf32>
    %171 = vector.extract_strided_slice %151 {offsets = [0, 256], sizes = [8, 128], strides = [1, 1]} : vector<8x384xf32> to vector<8x128xf32>
    %172 = vector.extract_strided_slice %154 {offsets = [0, 256], sizes = [8, 128], strides = [1, 1]} : vector<8x384xf32> to vector<8x128xf32>
    %173 = arith.mulf %162, %172 : vector<8x128xf32>
    %174 = arith.addf %171, %173 : vector<8x128xf32>
    %175 = math.tanh %174 : vector<8x128xf32>
    %cst_47 = arith.constant 1.000000e+00 : f32
    %176 = vector.broadcast %cst_47 : f32 to vector<8x128xf32>
    %177 = arith.subf %176, %170 : vector<8x128xf32>
    %178 = arith.mulf %177, %175 : vector<8x128xf32>
    %179 = arith.mulf %170, %96 : vector<8x128xf32>
    %180 = arith.addf %178, %179 : vector<8x128xf32>
    %181 = vector.broadcast %103 : i32 to vector<8x1xi32>
    %182 = arith.cmpi sgt, %7, %181 : vector<8x1xi32>
    %183 = vector.shape_cast %182 : vector<8x1xi1> to vector<8x1xi1>
    %184 = vector.broadcast %183 : vector<8x1xi1> to vector<8x128xi1>
    %185 = arith.select %184, %180, %96 : vector<8x128xi1>, vector<8x128xf32>
    %cst_48 = arith.constant 0.000000e+00 : f32
    %186 = vector.shape_cast %182 : vector<8x1xi1> to vector<8x1xi1>
    %187 = vector.broadcast %186 : vector<8x1xi1> to vector<8x128xi1>
    %188 = vector.broadcast %cst_48 : f32 to vector<8x128xf32>
    %189 = arith.select %187, %180, %188 : vector<8x128xi1>, vector<8x128xf32>
    %190 = arith.index_cast %107 : i32 to index
    %c0_49 = arith.constant 0 : index
    %191 = vector.load %arg11[%190, %c0_49] : memref<64x128xf32, #tpu.memory_space<vmem>>, vector<8x128xf32>
    tpu.vector_store %arg11[%190, %c0_49], %189 {strides = array<i32>} : memref<64x128xf32, #tpu.memory_space<vmem>>, vector<8x128xf32>,
    %c2_i32 = arith.constant 2 : i32
    %c7_i32_50 = arith.constant 7 : i32
    %192 = arith.subi %c7_i32_50, %c2_i32 : i32
    %c8_i32_51 = arith.constant 8 : i32
    %193 = arith.muli %c2_i32, %c8_i32_51 : i32
    %194 = tpu.assume_multiple %193, 8 : i32
    %c8_i32_52 = arith.constant 8 : i32
    %195 = arith.muli %192, %c8_i32_52 : i32
    %196 = tpu.assume_multiple %195, 8 : i32
    %197 = arith.index_cast %194 : i32 to index
    %c0_53 = arith.constant 0 : index
    %198 = vector.load %arg13[%197, %c0_53] : memref<64x768xf32, #tpu.memory_space<vmem>>, vector<8x384xf32>
    %cst_54 = arith.constant dense<0.000000e+00> : vector<8x384xf32>
    %199 = tpu.matmul %143, %8, %cst_54 {dimension_numbers = #tpu.dot_dimension_numbers<[1], [0], [0], [1], [0, 0, 1, 1], [], []>} : vector<8x128xf32>, vector<128x384xf32>, vector<8x384xf32> -> vector<8x384xf32>
    %200 = vector.broadcast %9 : vector<1x384xf32> to vector<8x384xf32>
    %201 = arith.addf %199, %200 : vector<8x384xf32>
    %202 = vector.extract_strided_slice %198 {offsets = [0, 0], sizes = [8, 128], strides = [1, 1]} : vector<8x384xf32> to vector<8x128xf32>
    %203 = vector.extract_strided_slice %201 {offsets = [0, 0], sizes = [8, 128], strides = [1, 1]} : vector<8x384xf32> to vector<8x128xf32>
    %204 = arith.addf %202, %203 : vector<8x128xf32>
    %205 = arith.negf %204 : vector<8x128xf32>
    %206 = math.exp %205 : vector<8x128xf32>
    %cst_55 = arith.constant 1.000000e+00 : f32
    %207 = vector.broadcast %cst_55 : f32 to vector<8x128xf32>
    %208 = arith.addf %207, %206 : vector<8x128xf32>
    %209 = arith.divf %207, %208 : vector<8x128xf32>
    %210 = vector.extract_strided_slice %198 {offsets = [0, 128], sizes = [8, 128], strides = [1, 1]} : vector<8x384xf32> to vector<8x128xf32>
    %211 = vector.extract_strided_slice %201 {offsets = [0, 128], sizes = [8, 128], strides = [1, 1]} : vector<8x384xf32> to vector<8x128xf32>
    %212 = arith.addf %210, %211 : vector<8x128xf32>
    %213 = arith.negf %212 : vector<8x128xf32>
    %214 = math.exp %213 : vector<8x128xf32>
    %cst_56 = arith.constant 1.000000e+00 : f32
    %215 = vector.broadcast %cst_56 : f32 to vector<8x128xf32>
    %216 = arith.addf %215, %214 : vector<8x128xf32>
    %217 = arith.divf %215, %216 : vector<8x128xf32>
    %218 = vector.extract_strided_slice %198 {offsets = [0, 256], sizes = [8, 128], strides = [1, 1]} : vector<8x384xf32> to vector<8x128xf32>
    %219 = vector.extract_strided_slice %201 {offsets = [0, 256], sizes = [8, 128], strides = [1, 1]} : vector<8x384xf32> to vector<8x128xf32>
    %220 = arith.mulf %209, %219 : vector<8x128xf32>
    %221 = arith.addf %218, %220 : vector<8x128xf32>
    %222 = math.tanh %221 : vector<8x128xf32>
    %cst_57 = arith.constant 1.000000e+00 : f32
    %223 = vector.broadcast %cst_57 : f32 to vector<8x128xf32>
    %224 = arith.subf %223, %217 : vector<8x128xf32>
    %225 = arith.mulf %224, %222 : vector<8x128xf32>
    %226 = arith.mulf %217, %143 : vector<8x128xf32>
    %227 = arith.addf %225, %226 : vector<8x128xf32>
    %228 = vector.broadcast %c2_i32 : i32 to vector<8x1xi32>
    %229 = arith.cmpi sgt, %7, %228 : vector<8x1xi32>
    %230 = vector.shape_cast %229 : vector<8x1xi1> to vector<8x1xi1>
    %231 = vector.broadcast %230 : vector<8x1xi1> to vector<8x128xi1>
    %232 = arith.select %231, %227, %143 : vector<8x128xi1>, vector<8x128xf32>
    %cst_58 = arith.constant 0.000000e+00 : f32
    %233 = vector.shape_cast %229 : vector<8x1xi1> to vector<8x1xi1>
    %234 = vector.broadcast %233 : vector<8x1xi1> to vector<8x128xi1>
    %235 = vector.broadcast %cst_58 : f32 to vector<8x128xf32>
    %236 = arith.select %234, %227, %235 : vector<8x128xi1>, vector<8x128xf32>
    %237 = arith.index_cast %194 : i32 to index
    %c0_59 = arith.constant 0 : index
    %238 = vector.load %arg10[%237, %c0_59] : memref<64x128xf32, #tpu.memory_space<vmem>>, vector<8x128xf32>
    tpu.vector_store %arg10[%237, %c0_59], %236 {strides = array<i32>} : memref<64x128xf32, #tpu.memory_space<vmem>>, vector<8x128xf32>,
    %239 = arith.index_cast %196 : i32 to index
    %c384_60 = arith.constant 384 : index
    %240 = vector.load %arg13[%239, %c384_60] : memref<64x768xf32, #tpu.memory_space<vmem>>, vector<8x384xf32>
    %cst_61 = arith.constant dense<0.000000e+00> : vector<8x384xf32>
    %241 = tpu.matmul %185, %10, %cst_61 {dimension_numbers = #tpu.dot_dimension_numbers<[1], [0], [0], [1], [0, 0, 1, 1], [], []>} : vector<8x128xf32>, vector<128x384xf32>, vector<8x384xf32> -> vector<8x384xf32>
    %242 = vector.broadcast %11 : vector<1x384xf32> to vector<8x384xf32>
    %243 = arith.addf %241, %242 : vector<8x384xf32>
    %244 = vector.extract_strided_slice %240 {offsets = [0, 0], sizes = [8, 128], strides = [1, 1]} : vector<8x384xf32> to vector<8x128xf32>
    %245 = vector.extract_strided_slice %243 {offsets = [0, 0], sizes = [8, 128], strides = [1, 1]} : vector<8x384xf32> to vector<8x128xf32>
    %246 = arith.addf %244, %245 : vector<8x128xf32>
    %247 = arith.negf %246 : vector<8x128xf32>
    %248 = math.exp %247 : vector<8x128xf32>
    %cst_62 = arith.constant 1.000000e+00 : f32
    %249 = vector.broadcast %cst_62 : f32 to vector<8x128xf32>
    %250 = arith.addf %249, %248 : vector<8x128xf32>
    %251 = arith.divf %249, %250 : vector<8x128xf32>
    %252 = vector.extract_strided_slice %240 {offsets = [0, 128], sizes = [8, 128], strides = [1, 1]} : vector<8x384xf32> to vector<8x128xf32>
    %253 = vector.extract_strided_slice %243 {offsets = [0, 128], sizes = [8, 128], strides = [1, 1]} : vector<8x384xf32> to vector<8x128xf32>
    %254 = arith.addf %252, %253 : vector<8x128xf32>
    %255 = arith.negf %254 : vector<8x128xf32>
    %256 = math.exp %255 : vector<8x128xf32>
    %cst_63 = arith.constant 1.000000e+00 : f32
    %257 = vector.broadcast %cst_63 : f32 to vector<8x128xf32>
    %258 = arith.addf %257, %256 : vector<8x128xf32>
    %259 = arith.divf %257, %258 : vector<8x128xf32>
    %260 = vector.extract_strided_slice %240 {offsets = [0, 256], sizes = [8, 128], strides = [1, 1]} : vector<8x384xf32> to vector<8x128xf32>
    %261 = vector.extract_strided_slice %243 {offsets = [0, 256], sizes = [8, 128], strides = [1, 1]} : vector<8x384xf32> to vector<8x128xf32>
    %262 = arith.mulf %251, %261 : vector<8x128xf32>
    %263 = arith.addf %260, %262 : vector<8x128xf32>
    %264 = math.tanh %263 : vector<8x128xf32>
    %cst_64 = arith.constant 1.000000e+00 : f32
    %265 = vector.broadcast %cst_64 : f32 to vector<8x128xf32>
    %266 = arith.subf %265, %259 : vector<8x128xf32>
    %267 = arith.mulf %266, %264 : vector<8x128xf32>
    %268 = arith.mulf %259, %185 : vector<8x128xf32>
    %269 = arith.addf %267, %268 : vector<8x128xf32>
    %270 = vector.broadcast %192 : i32 to vector<8x1xi32>
    %271 = arith.cmpi sgt, %7, %270 : vector<8x1xi32>
    %272 = vector.shape_cast %271 : vector<8x1xi1> to vector<8x1xi1>
    %273 = vector.broadcast %272 : vector<8x1xi1> to vector<8x128xi1>
    %274 = arith.select %273, %269, %185 : vector<8x128xi1>, vector<8x128xf32>
    %cst_65 = arith.constant 0.000000e+00 : f32
    %275 = vector.shape_cast %271 : vector<8x1xi1> to vector<8x1xi1>
    %276 = vector.broadcast %275 : vector<8x1xi1> to vector<8x128xi1>
    %277 = vector.broadcast %cst_65 : f32 to vector<8x128xf32>
    %278 = arith.select %276, %269, %277 : vector<8x128xi1>, vector<8x128xf32>
    %279 = arith.index_cast %196 : i32 to index
    %c0_66 = arith.constant 0 : index
    %280 = vector.load %arg11[%279, %c0_66] : memref<64x128xf32, #tpu.memory_space<vmem>>, vector<8x128xf32>
    tpu.vector_store %arg11[%279, %c0_66], %278 {strides = array<i32>} : memref<64x128xf32, #tpu.memory_space<vmem>>, vector<8x128xf32>,
    %c3_i32 = arith.constant 3 : i32
    %c7_i32_67 = arith.constant 7 : i32
    %281 = arith.subi %c7_i32_67, %c3_i32 : i32
    %c8_i32_68 = arith.constant 8 : i32
    %282 = arith.muli %c3_i32, %c8_i32_68 : i32
    %283 = tpu.assume_multiple %282, 8 : i32
    %c8_i32_69 = arith.constant 8 : i32
    %284 = arith.muli %281, %c8_i32_69 : i32
    %285 = tpu.assume_multiple %284, 8 : i32
    %286 = arith.index_cast %283 : i32 to index
    %c0_70 = arith.constant 0 : index
    %287 = vector.load %arg13[%286, %c0_70] : memref<64x768xf32, #tpu.memory_space<vmem>>, vector<8x384xf32>
    %cst_71 = arith.constant dense<0.000000e+00> : vector<8x384xf32>
    %288 = tpu.matmul %232, %8, %cst_71 {dimension_numbers = #tpu.dot_dimension_numbers<[1], [0], [0], [1], [0, 0, 1, 1], [], []>} : vector<8x128xf32>, vector<128x384xf32>, vector<8x384xf32> -> vector<8x384xf32>
    %289 = vector.broadcast %9 : vector<1x384xf32> to vector<8x384xf32>
    %290 = arith.addf %288, %289 : vector<8x384xf32>
    %291 = vector.extract_strided_slice %287 {offsets = [0, 0], sizes = [8, 128], strides = [1, 1]} : vector<8x384xf32> to vector<8x128xf32>
    %292 = vector.extract_strided_slice %290 {offsets = [0, 0], sizes = [8, 128], strides = [1, 1]} : vector<8x384xf32> to vector<8x128xf32>
    %293 = arith.addf %291, %292 : vector<8x128xf32>
    %294 = arith.negf %293 : vector<8x128xf32>
    %295 = math.exp %294 : vector<8x128xf32>
    %cst_72 = arith.constant 1.000000e+00 : f32
    %296 = vector.broadcast %cst_72 : f32 to vector<8x128xf32>
    %297 = arith.addf %296, %295 : vector<8x128xf32>
    %298 = arith.divf %296, %297 : vector<8x128xf32>
    %299 = vector.extract_strided_slice %287 {offsets = [0, 128], sizes = [8, 128], strides = [1, 1]} : vector<8x384xf32> to vector<8x128xf32>
    %300 = vector.extract_strided_slice %290 {offsets = [0, 128], sizes = [8, 128], strides = [1, 1]} : vector<8x384xf32> to vector<8x128xf32>
    %301 = arith.addf %299, %300 : vector<8x128xf32>
    %302 = arith.negf %301 : vector<8x128xf32>
    %303 = math.exp %302 : vector<8x128xf32>
    %cst_73 = arith.constant 1.000000e+00 : f32
    %304 = vector.broadcast %cst_73 : f32 to vector<8x128xf32>
    %305 = arith.addf %304, %303 : vector<8x128xf32>
    %306 = arith.divf %304, %305 : vector<8x128xf32>
    %307 = vector.extract_strided_slice %287 {offsets = [0, 256], sizes = [8, 128], strides = [1, 1]} : vector<8x384xf32> to vector<8x128xf32>
    %308 = vector.extract_strided_slice %290 {offsets = [0, 256], sizes = [8, 128], strides = [1, 1]} : vector<8x384xf32> to vector<8x128xf32>
    %309 = arith.mulf %298, %308 : vector<8x128xf32>
    %310 = arith.addf %307, %309 : vector<8x128xf32>
    %311 = math.tanh %310 : vector<8x128xf32>
    %cst_74 = arith.constant 1.000000e+00 : f32
    %312 = vector.broadcast %cst_74 : f32 to vector<8x128xf32>
    %313 = arith.subf %312, %306 : vector<8x128xf32>
    %314 = arith.mulf %313, %311 : vector<8x128xf32>
    %315 = arith.mulf %306, %232 : vector<8x128xf32>
    %316 = arith.addf %314, %315 : vector<8x128xf32>
    %317 = vector.broadcast %c3_i32 : i32 to vector<8x1xi32>
    %318 = arith.cmpi sgt, %7, %317 : vector<8x1xi32>
    %319 = vector.shape_cast %318 : vector<8x1xi1> to vector<8x1xi1>
    %320 = vector.broadcast %319 : vector<8x1xi1> to vector<8x128xi1>
    %321 = arith.select %320, %316, %232 : vector<8x128xi1>, vector<8x128xf32>
    %cst_75 = arith.constant 0.000000e+00 : f32
    %322 = vector.shape_cast %318 : vector<8x1xi1> to vector<8x1xi1>
    %323 = vector.broadcast %322 : vector<8x1xi1> to vector<8x128xi1>
    %324 = vector.broadcast %cst_75 : f32 to vector<8x128xf32>
    %325 = arith.select %323, %316, %324 : vector<8x128xi1>, vector<8x128xf32>
    %326 = arith.index_cast %283 : i32 to index
    %c0_76 = arith.constant 0 : index
    %327 = vector.load %arg10[%326, %c0_76] : memref<64x128xf32, #tpu.memory_space<vmem>>, vector<8x128xf32>
    tpu.vector_store %arg10[%326, %c0_76], %325 {strides = array<i32>} : memref<64x128xf32, #tpu.memory_space<vmem>>, vector<8x128xf32>,
    %328 = arith.index_cast %285 : i32 to index
    %c384_77 = arith.constant 384 : index
    %329 = vector.load %arg13[%328, %c384_77] : memref<64x768xf32, #tpu.memory_space<vmem>>, vector<8x384xf32>
    %cst_78 = arith.constant dense<0.000000e+00> : vector<8x384xf32>
    %330 = tpu.matmul %274, %10, %cst_78 {dimension_numbers = #tpu.dot_dimension_numbers<[1], [0], [0], [1], [0, 0, 1, 1], [], []>} : vector<8x128xf32>, vector<128x384xf32>, vector<8x384xf32> -> vector<8x384xf32>
    %331 = vector.broadcast %11 : vector<1x384xf32> to vector<8x384xf32>
    %332 = arith.addf %330, %331 : vector<8x384xf32>
    %333 = vector.extract_strided_slice %329 {offsets = [0, 0], sizes = [8, 128], strides = [1, 1]} : vector<8x384xf32> to vector<8x128xf32>
    %334 = vector.extract_strided_slice %332 {offsets = [0, 0], sizes = [8, 128], strides = [1, 1]} : vector<8x384xf32> to vector<8x128xf32>
    %335 = arith.addf %333, %334 : vector<8x128xf32>
    %336 = arith.negf %335 : vector<8x128xf32>
    %337 = math.exp %336 : vector<8x128xf32>
    %cst_79 = arith.constant 1.000000e+00 : f32
    %338 = vector.broadcast %cst_79 : f32 to vector<8x128xf32>
    %339 = arith.addf %338, %337 : vector<8x128xf32>
    %340 = arith.divf %338, %339 : vector<8x128xf32>
    %341 = vector.extract_strided_slice %329 {offsets = [0, 128], sizes = [8, 128], strides = [1, 1]} : vector<8x384xf32> to vector<8x128xf32>
    %342 = vector.extract_strided_slice %332 {offsets = [0, 128], sizes = [8, 128], strides = [1, 1]} : vector<8x384xf32> to vector<8x128xf32>
    %343 = arith.addf %341, %342 : vector<8x128xf32>
    %344 = arith.negf %343 : vector<8x128xf32>
    %345 = math.exp %344 : vector<8x128xf32>
    %cst_80 = arith.constant 1.000000e+00 : f32
    %346 = vector.broadcast %cst_80 : f32 to vector<8x128xf32>
    %347 = arith.addf %346, %345 : vector<8x128xf32>
    %348 = arith.divf %346, %347 : vector<8x128xf32>
    %349 = vector.extract_strided_slice %329 {offsets = [0, 256], sizes = [8, 128], strides = [1, 1]} : vector<8x384xf32> to vector<8x128xf32>
    %350 = vector.extract_strided_slice %332 {offsets = [0, 256], sizes = [8, 128], strides = [1, 1]} : vector<8x384xf32> to vector<8x128xf32>
    %351 = arith.mulf %340, %350 : vector<8x128xf32>
    %352 = arith.addf %349, %351 : vector<8x128xf32>
    %353 = math.tanh %352 : vector<8x128xf32>
    %cst_81 = arith.constant 1.000000e+00 : f32
    %354 = vector.broadcast %cst_81 : f32 to vector<8x128xf32>
    %355 = arith.subf %354, %348 : vector<8x128xf32>
    %356 = arith.mulf %355, %353 : vector<8x128xf32>
    %357 = arith.mulf %348, %274 : vector<8x128xf32>
    %358 = arith.addf %356, %357 : vector<8x128xf32>
    %359 = vector.broadcast %281 : i32 to vector<8x1xi32>
    %360 = arith.cmpi sgt, %7, %359 : vector<8x1xi32>
    %361 = vector.shape_cast %360 : vector<8x1xi1> to vector<8x1xi1>
    %362 = vector.broadcast %361 : vector<8x1xi1> to vector<8x128xi1>
    %363 = arith.select %362, %358, %274 : vector<8x128xi1>, vector<8x128xf32>
    %cst_82 = arith.constant 0.000000e+00 : f32
    %364 = vector.shape_cast %360 : vector<8x1xi1> to vector<8x1xi1>
    %365 = vector.broadcast %364 : vector<8x1xi1> to vector<8x128xi1>
    %366 = vector.broadcast %cst_82 : f32 to vector<8x128xf32>
    %367 = arith.select %365, %358, %366 : vector<8x128xi1>, vector<8x128xf32>
    %368 = arith.index_cast %285 : i32 to index
    %c0_83 = arith.constant 0 : index
    %369 = vector.load %arg11[%368, %c0_83] : memref<64x128xf32, #tpu.memory_space<vmem>>, vector<8x128xf32>
    tpu.vector_store %arg11[%368, %c0_83], %367 {strides = array<i32>} : memref<64x128xf32, #tpu.memory_space<vmem>>, vector<8x128xf32>,
    %c4_i32 = arith.constant 4 : i32
    %c7_i32_84 = arith.constant 7 : i32
    %370 = arith.subi %c7_i32_84, %c4_i32 : i32
    %c8_i32_85 = arith.constant 8 : i32
    %371 = arith.muli %c4_i32, %c8_i32_85 : i32
    %372 = tpu.assume_multiple %371, 8 : i32
    %c8_i32_86 = arith.constant 8 : i32
    %373 = arith.muli %370, %c8_i32_86 : i32
    %374 = tpu.assume_multiple %373, 8 : i32
    %375 = arith.index_cast %372 : i32 to index
    %c0_87 = arith.constant 0 : index
    %376 = vector.load %arg13[%375, %c0_87] : memref<64x768xf32, #tpu.memory_space<vmem>>, vector<8x384xf32>
    %cst_88 = arith.constant dense<0.000000e+00> : vector<8x384xf32>
    %377 = tpu.matmul %321, %8, %cst_88 {dimension_numbers = #tpu.dot_dimension_numbers<[1], [0], [0], [1], [0, 0, 1, 1], [], []>} : vector<8x128xf32>, vector<128x384xf32>, vector<8x384xf32> -> vector<8x384xf32>
    %378 = vector.broadcast %9 : vector<1x384xf32> to vector<8x384xf32>
    %379 = arith.addf %377, %378 : vector<8x384xf32>
    %380 = vector.extract_strided_slice %376 {offsets = [0, 0], sizes = [8, 128], strides = [1, 1]} : vector<8x384xf32> to vector<8x128xf32>
    %381 = vector.extract_strided_slice %379 {offsets = [0, 0], sizes = [8, 128], strides = [1, 1]} : vector<8x384xf32> to vector<8x128xf32>
    %382 = arith.addf %380, %381 : vector<8x128xf32>
    %383 = arith.negf %382 : vector<8x128xf32>
    %384 = math.exp %383 : vector<8x128xf32>
    %cst_89 = arith.constant 1.000000e+00 : f32
    %385 = vector.broadcast %cst_89 : f32 to vector<8x128xf32>
    %386 = arith.addf %385, %384 : vector<8x128xf32>
    %387 = arith.divf %385, %386 : vector<8x128xf32>
    %388 = vector.extract_strided_slice %376 {offsets = [0, 128], sizes = [8, 128], strides = [1, 1]} : vector<8x384xf32> to vector<8x128xf32>
    %389 = vector.extract_strided_slice %379 {offsets = [0, 128], sizes = [8, 128], strides = [1, 1]} : vector<8x384xf32> to vector<8x128xf32>
    %390 = arith.addf %388, %389 : vector<8x128xf32>
    %391 = arith.negf %390 : vector<8x128xf32>
    %392 = math.exp %391 : vector<8x128xf32>
    %cst_90 = arith.constant 1.000000e+00 : f32
    %393 = vector.broadcast %cst_90 : f32 to vector<8x128xf32>
    %394 = arith.addf %393, %392 : vector<8x128xf32>
    %395 = arith.divf %393, %394 : vector<8x128xf32>
    %396 = vector.extract_strided_slice %376 {offsets = [0, 256], sizes = [8, 128], strides = [1, 1]} : vector<8x384xf32> to vector<8x128xf32>
    %397 = vector.extract_strided_slice %379 {offsets = [0, 256], sizes = [8, 128], strides = [1, 1]} : vector<8x384xf32> to vector<8x128xf32>
    %398 = arith.mulf %387, %397 : vector<8x128xf32>
    %399 = arith.addf %396, %398 : vector<8x128xf32>
    %400 = math.tanh %399 : vector<8x128xf32>
    %cst_91 = arith.constant 1.000000e+00 : f32
    %401 = vector.broadcast %cst_91 : f32 to vector<8x128xf32>
    %402 = arith.subf %401, %395 : vector<8x128xf32>
    %403 = arith.mulf %402, %400 : vector<8x128xf32>
    %404 = arith.mulf %395, %321 : vector<8x128xf32>
    %405 = arith.addf %403, %404 : vector<8x128xf32>
    %406 = vector.broadcast %c4_i32 : i32 to vector<8x1xi32>
    %407 = arith.cmpi sgt, %7, %406 : vector<8x1xi32>
    %408 = vector.shape_cast %407 : vector<8x1xi1> to vector<8x1xi1>
    %409 = vector.broadcast %408 : vector<8x1xi1> to vector<8x128xi1>
    %410 = arith.select %409, %405, %321 : vector<8x128xi1>, vector<8x128xf32>
    %cst_92 = arith.constant 0.000000e+00 : f32
    %411 = vector.shape_cast %407 : vector<8x1xi1> to vector<8x1xi1>
    %412 = vector.broadcast %411 : vector<8x1xi1> to vector<8x128xi1>
    %413 = vector.broadcast %cst_92 : f32 to vector<8x128xf32>
    %414 = arith.select %412, %405, %413 : vector<8x128xi1>, vector<8x128xf32>
    %415 = arith.index_cast %372 : i32 to index
    %c0_93 = arith.constant 0 : index
    %416 = vector.load %arg10[%415, %c0_93] : memref<64x128xf32, #tpu.memory_space<vmem>>, vector<8x128xf32>
    tpu.vector_store %arg10[%415, %c0_93], %414 {strides = array<i32>} : memref<64x128xf32, #tpu.memory_space<vmem>>, vector<8x128xf32>,
    %417 = arith.index_cast %374 : i32 to index
    %c384_94 = arith.constant 384 : index
    %418 = vector.load %arg13[%417, %c384_94] : memref<64x768xf32, #tpu.memory_space<vmem>>, vector<8x384xf32>
    %cst_95 = arith.constant dense<0.000000e+00> : vector<8x384xf32>
    %419 = tpu.matmul %363, %10, %cst_95 {dimension_numbers = #tpu.dot_dimension_numbers<[1], [0], [0], [1], [0, 0, 1, 1], [], []>} : vector<8x128xf32>, vector<128x384xf32>, vector<8x384xf32> -> vector<8x384xf32>
    %420 = vector.broadcast %11 : vector<1x384xf32> to vector<8x384xf32>
    %421 = arith.addf %419, %420 : vector<8x384xf32>
    %422 = vector.extract_strided_slice %418 {offsets = [0, 0], sizes = [8, 128], strides = [1, 1]} : vector<8x384xf32> to vector<8x128xf32>
    %423 = vector.extract_strided_slice %421 {offsets = [0, 0], sizes = [8, 128], strides = [1, 1]} : vector<8x384xf32> to vector<8x128xf32>
    %424 = arith.addf %422, %423 : vector<8x128xf32>
    %425 = arith.negf %424 : vector<8x128xf32>
    %426 = math.exp %425 : vector<8x128xf32>
    %cst_96 = arith.constant 1.000000e+00 : f32
    %427 = vector.broadcast %cst_96 : f32 to vector<8x128xf32>
    %428 = arith.addf %427, %426 : vector<8x128xf32>
    %429 = arith.divf %427, %428 : vector<8x128xf32>
    %430 = vector.extract_strided_slice %418 {offsets = [0, 128], sizes = [8, 128], strides = [1, 1]} : vector<8x384xf32> to vector<8x128xf32>
    %431 = vector.extract_strided_slice %421 {offsets = [0, 128], sizes = [8, 128], strides = [1, 1]} : vector<8x384xf32> to vector<8x128xf32>
    %432 = arith.addf %430, %431 : vector<8x128xf32>
    %433 = arith.negf %432 : vector<8x128xf32>
    %434 = math.exp %433 : vector<8x128xf32>
    %cst_97 = arith.constant 1.000000e+00 : f32
    %435 = vector.broadcast %cst_97 : f32 to vector<8x128xf32>
    %436 = arith.addf %435, %434 : vector<8x128xf32>
    %437 = arith.divf %435, %436 : vector<8x128xf32>
    %438 = vector.extract_strided_slice %418 {offsets = [0, 256], sizes = [8, 128], strides = [1, 1]} : vector<8x384xf32> to vector<8x128xf32>
    %439 = vector.extract_strided_slice %421 {offsets = [0, 256], sizes = [8, 128], strides = [1, 1]} : vector<8x384xf32> to vector<8x128xf32>
    %440 = arith.mulf %429, %439 : vector<8x128xf32>
    %441 = arith.addf %438, %440 : vector<8x128xf32>
    %442 = math.tanh %441 : vector<8x128xf32>
    %cst_98 = arith.constant 1.000000e+00 : f32
    %443 = vector.broadcast %cst_98 : f32 to vector<8x128xf32>
    %444 = arith.subf %443, %437 : vector<8x128xf32>
    %445 = arith.mulf %444, %442 : vector<8x128xf32>
    %446 = arith.mulf %437, %363 : vector<8x128xf32>
    %447 = arith.addf %445, %446 : vector<8x128xf32>
    %448 = vector.broadcast %370 : i32 to vector<8x1xi32>
    %449 = arith.cmpi sgt, %7, %448 : vector<8x1xi32>
    %450 = vector.shape_cast %449 : vector<8x1xi1> to vector<8x1xi1>
    %451 = vector.broadcast %450 : vector<8x1xi1> to vector<8x128xi1>
    %452 = arith.select %451, %447, %363 : vector<8x128xi1>, vector<8x128xf32>
    %cst_99 = arith.constant 0.000000e+00 : f32
    %453 = vector.shape_cast %449 : vector<8x1xi1> to vector<8x1xi1>
    %454 = vector.broadcast %453 : vector<8x1xi1> to vector<8x128xi1>
    %455 = vector.broadcast %cst_99 : f32 to vector<8x128xf32>
    %456 = arith.select %454, %447, %455 : vector<8x128xi1>, vector<8x128xf32>
    %457 = arith.index_cast %374 : i32 to index
    %c0_100 = arith.constant 0 : index
    %458 = vector.load %arg11[%457, %c0_100] : memref<64x128xf32, #tpu.memory_space<vmem>>, vector<8x128xf32>
    tpu.vector_store %arg11[%457, %c0_100], %456 {strides = array<i32>} : memref<64x128xf32, #tpu.memory_space<vmem>>, vector<8x128xf32>,
    %c5_i32 = arith.constant 5 : i32
    %c7_i32_101 = arith.constant 7 : i32
    %459 = arith.subi %c7_i32_101, %c5_i32 : i32
    %c8_i32_102 = arith.constant 8 : i32
    %460 = arith.muli %c5_i32, %c8_i32_102 : i32
    %461 = tpu.assume_multiple %460, 8 : i32
    %c8_i32_103 = arith.constant 8 : i32
    %462 = arith.muli %459, %c8_i32_103 : i32
    %463 = tpu.assume_multiple %462, 8 : i32
    %464 = arith.index_cast %461 : i32 to index
    %c0_104 = arith.constant 0 : index
    %465 = vector.load %arg13[%464, %c0_104] : memref<64x768xf32, #tpu.memory_space<vmem>>, vector<8x384xf32>
    %cst_105 = arith.constant dense<0.000000e+00> : vector<8x384xf32>
    %466 = tpu.matmul %410, %8, %cst_105 {dimension_numbers = #tpu.dot_dimension_numbers<[1], [0], [0], [1], [0, 0, 1, 1], [], []>} : vector<8x128xf32>, vector<128x384xf32>, vector<8x384xf32> -> vector<8x384xf32>
    %467 = vector.broadcast %9 : vector<1x384xf32> to vector<8x384xf32>
    %468 = arith.addf %466, %467 : vector<8x384xf32>
    %469 = vector.extract_strided_slice %465 {offsets = [0, 0], sizes = [8, 128], strides = [1, 1]} : vector<8x384xf32> to vector<8x128xf32>
    %470 = vector.extract_strided_slice %468 {offsets = [0, 0], sizes = [8, 128], strides = [1, 1]} : vector<8x384xf32> to vector<8x128xf32>
    %471 = arith.addf %469, %470 : vector<8x128xf32>
    %472 = arith.negf %471 : vector<8x128xf32>
    %473 = math.exp %472 : vector<8x128xf32>
    %cst_106 = arith.constant 1.000000e+00 : f32
    %474 = vector.broadcast %cst_106 : f32 to vector<8x128xf32>
    %475 = arith.addf %474, %473 : vector<8x128xf32>
    %476 = arith.divf %474, %475 : vector<8x128xf32>
    %477 = vector.extract_strided_slice %465 {offsets = [0, 128], sizes = [8, 128], strides = [1, 1]} : vector<8x384xf32> to vector<8x128xf32>
    %478 = vector.extract_strided_slice %468 {offsets = [0, 128], sizes = [8, 128], strides = [1, 1]} : vector<8x384xf32> to vector<8x128xf32>
    %479 = arith.addf %477, %478 : vector<8x128xf32>
    %480 = arith.negf %479 : vector<8x128xf32>
    %481 = math.exp %480 : vector<8x128xf32>
    %cst_107 = arith.constant 1.000000e+00 : f32
    %482 = vector.broadcast %cst_107 : f32 to vector<8x128xf32>
    %483 = arith.addf %482, %481 : vector<8x128xf32>
    %484 = arith.divf %482, %483 : vector<8x128xf32>
    %485 = vector.extract_strided_slice %465 {offsets = [0, 256], sizes = [8, 128], strides = [1, 1]} : vector<8x384xf32> to vector<8x128xf32>
    %486 = vector.extract_strided_slice %468 {offsets = [0, 256], sizes = [8, 128], strides = [1, 1]} : vector<8x384xf32> to vector<8x128xf32>
    %487 = arith.mulf %476, %486 : vector<8x128xf32>
    %488 = arith.addf %485, %487 : vector<8x128xf32>
    %489 = math.tanh %488 : vector<8x128xf32>
    %cst_108 = arith.constant 1.000000e+00 : f32
    %490 = vector.broadcast %cst_108 : f32 to vector<8x128xf32>
    %491 = arith.subf %490, %484 : vector<8x128xf32>
    %492 = arith.mulf %491, %489 : vector<8x128xf32>
    %493 = arith.mulf %484, %410 : vector<8x128xf32>
    %494 = arith.addf %492, %493 : vector<8x128xf32>
    %495 = vector.broadcast %c5_i32 : i32 to vector<8x1xi32>
    %496 = arith.cmpi sgt, %7, %495 : vector<8x1xi32>
    %497 = vector.shape_cast %496 : vector<8x1xi1> to vector<8x1xi1>
    %498 = vector.broadcast %497 : vector<8x1xi1> to vector<8x128xi1>
    %499 = arith.select %498, %494, %410 : vector<8x128xi1>, vector<8x128xf32>
    %cst_109 = arith.constant 0.000000e+00 : f32
    %500 = vector.shape_cast %496 : vector<8x1xi1> to vector<8x1xi1>
    %501 = vector.broadcast %500 : vector<8x1xi1> to vector<8x128xi1>
    %502 = vector.broadcast %cst_109 : f32 to vector<8x128xf32>
    %503 = arith.select %501, %494, %502 : vector<8x128xi1>, vector<8x128xf32>
    %504 = arith.index_cast %461 : i32 to index
    %c0_110 = arith.constant 0 : index
    %505 = vector.load %arg10[%504, %c0_110] : memref<64x128xf32, #tpu.memory_space<vmem>>, vector<8x128xf32>
    tpu.vector_store %arg10[%504, %c0_110], %503 {strides = array<i32>} : memref<64x128xf32, #tpu.memory_space<vmem>>, vector<8x128xf32>,
    %506 = arith.index_cast %463 : i32 to index
    %c384_111 = arith.constant 384 : index
    %507 = vector.load %arg13[%506, %c384_111] : memref<64x768xf32, #tpu.memory_space<vmem>>, vector<8x384xf32>
    %cst_112 = arith.constant dense<0.000000e+00> : vector<8x384xf32>
    %508 = tpu.matmul %452, %10, %cst_112 {dimension_numbers = #tpu.dot_dimension_numbers<[1], [0], [0], [1], [0, 0, 1, 1], [], []>} : vector<8x128xf32>, vector<128x384xf32>, vector<8x384xf32> -> vector<8x384xf32>
    %509 = vector.broadcast %11 : vector<1x384xf32> to vector<8x384xf32>
    %510 = arith.addf %508, %509 : vector<8x384xf32>
    %511 = vector.extract_strided_slice %507 {offsets = [0, 0], sizes = [8, 128], strides = [1, 1]} : vector<8x384xf32> to vector<8x128xf32>
    %512 = vector.extract_strided_slice %510 {offsets = [0, 0], sizes = [8, 128], strides = [1, 1]} : vector<8x384xf32> to vector<8x128xf32>
    %513 = arith.addf %511, %512 : vector<8x128xf32>
    %514 = arith.negf %513 : vector<8x128xf32>
    %515 = math.exp %514 : vector<8x128xf32>
    %cst_113 = arith.constant 1.000000e+00 : f32
    %516 = vector.broadcast %cst_113 : f32 to vector<8x128xf32>
    %517 = arith.addf %516, %515 : vector<8x128xf32>
    %518 = arith.divf %516, %517 : vector<8x128xf32>
    %519 = vector.extract_strided_slice %507 {offsets = [0, 128], sizes = [8, 128], strides = [1, 1]} : vector<8x384xf32> to vector<8x128xf32>
    %520 = vector.extract_strided_slice %510 {offsets = [0, 128], sizes = [8, 128], strides = [1, 1]} : vector<8x384xf32> to vector<8x128xf32>
    %521 = arith.addf %519, %520 : vector<8x128xf32>
    %522 = arith.negf %521 : vector<8x128xf32>
    %523 = math.exp %522 : vector<8x128xf32>
    %cst_114 = arith.constant 1.000000e+00 : f32
    %524 = vector.broadcast %cst_114 : f32 to vector<8x128xf32>
    %525 = arith.addf %524, %523 : vector<8x128xf32>
    %526 = arith.divf %524, %525 : vector<8x128xf32>
    %527 = vector.extract_strided_slice %507 {offsets = [0, 256], sizes = [8, 128], strides = [1, 1]} : vector<8x384xf32> to vector<8x128xf32>
    %528 = vector.extract_strided_slice %510 {offsets = [0, 256], sizes = [8, 128], strides = [1, 1]} : vector<8x384xf32> to vector<8x128xf32>
    %529 = arith.mulf %518, %528 : vector<8x128xf32>
    %530 = arith.addf %527, %529 : vector<8x128xf32>
    %531 = math.tanh %530 : vector<8x128xf32>
    %cst_115 = arith.constant 1.000000e+00 : f32
    %532 = vector.broadcast %cst_115 : f32 to vector<8x128xf32>
    %533 = arith.subf %532, %526 : vector<8x128xf32>
    %534 = arith.mulf %533, %531 : vector<8x128xf32>
    %535 = arith.mulf %526, %452 : vector<8x128xf32>
    %536 = arith.addf %534, %535 : vector<8x128xf32>
    %537 = vector.broadcast %459 : i32 to vector<8x1xi32>
    %538 = arith.cmpi sgt, %7, %537 : vector<8x1xi32>
    %539 = vector.shape_cast %538 : vector<8x1xi1> to vector<8x1xi1>
    %540 = vector.broadcast %539 : vector<8x1xi1> to vector<8x128xi1>
    %541 = arith.select %540, %536, %452 : vector<8x128xi1>, vector<8x128xf32>
    %cst_116 = arith.constant 0.000000e+00 : f32
    %542 = vector.shape_cast %538 : vector<8x1xi1> to vector<8x1xi1>
    %543 = vector.broadcast %542 : vector<8x1xi1> to vector<8x128xi1>
    %544 = vector.broadcast %cst_116 : f32 to vector<8x128xf32>
    %545 = arith.select %543, %536, %544 : vector<8x128xi1>, vector<8x128xf32>
    %546 = arith.index_cast %463 : i32 to index
    %c0_117 = arith.constant 0 : index
    %547 = vector.load %arg11[%546, %c0_117] : memref<64x128xf32, #tpu.memory_space<vmem>>, vector<8x128xf32>
    tpu.vector_store %arg11[%546, %c0_117], %545 {strides = array<i32>} : memref<64x128xf32, #tpu.memory_space<vmem>>, vector<8x128xf32>,
    %c6_i32 = arith.constant 6 : i32
    %c7_i32_118 = arith.constant 7 : i32
    %548 = arith.subi %c7_i32_118, %c6_i32 : i32
    %c8_i32_119 = arith.constant 8 : i32
    %549 = arith.muli %c6_i32, %c8_i32_119 : i32
    %550 = tpu.assume_multiple %549, 8 : i32
    %c8_i32_120 = arith.constant 8 : i32
    %551 = arith.muli %548, %c8_i32_120 : i32
    %552 = tpu.assume_multiple %551, 8 : i32
    %553 = arith.index_cast %550 : i32 to index
    %c0_121 = arith.constant 0 : index
    %554 = vector.load %arg13[%553, %c0_121] : memref<64x768xf32, #tpu.memory_space<vmem>>, vector<8x384xf32>
    %cst_122 = arith.constant dense<0.000000e+00> : vector<8x384xf32>
    %555 = tpu.matmul %499, %8, %cst_122 {dimension_numbers = #tpu.dot_dimension_numbers<[1], [0], [0], [1], [0, 0, 1, 1], [], []>} : vector<8x128xf32>, vector<128x384xf32>, vector<8x384xf32> -> vector<8x384xf32>
    %556 = vector.broadcast %9 : vector<1x384xf32> to vector<8x384xf32>
    %557 = arith.addf %555, %556 : vector<8x384xf32>
    %558 = vector.extract_strided_slice %554 {offsets = [0, 0], sizes = [8, 128], strides = [1, 1]} : vector<8x384xf32> to vector<8x128xf32>
    %559 = vector.extract_strided_slice %557 {offsets = [0, 0], sizes = [8, 128], strides = [1, 1]} : vector<8x384xf32> to vector<8x128xf32>
    %560 = arith.addf %558, %559 : vector<8x128xf32>
    %561 = arith.negf %560 : vector<8x128xf32>
    %562 = math.exp %561 : vector<8x128xf32>
    %cst_123 = arith.constant 1.000000e+00 : f32
    %563 = vector.broadcast %cst_123 : f32 to vector<8x128xf32>
    %564 = arith.addf %563, %562 : vector<8x128xf32>
    %565 = arith.divf %563, %564 : vector<8x128xf32>
    %566 = vector.extract_strided_slice %554 {offsets = [0, 128], sizes = [8, 128], strides = [1, 1]} : vector<8x384xf32> to vector<8x128xf32>
    %567 = vector.extract_strided_slice %557 {offsets = [0, 128], sizes = [8, 128], strides = [1, 1]} : vector<8x384xf32> to vector<8x128xf32>
    %568 = arith.addf %566, %567 : vector<8x128xf32>
    %569 = arith.negf %568 : vector<8x128xf32>
    %570 = math.exp %569 : vector<8x128xf32>
    %cst_124 = arith.constant 1.000000e+00 : f32
    %571 = vector.broadcast %cst_124 : f32 to vector<8x128xf32>
    %572 = arith.addf %571, %570 : vector<8x128xf32>
    %573 = arith.divf %571, %572 : vector<8x128xf32>
    %574 = vector.extract_strided_slice %554 {offsets = [0, 256], sizes = [8, 128], strides = [1, 1]} : vector<8x384xf32> to vector<8x128xf32>
    %575 = vector.extract_strided_slice %557 {offsets = [0, 256], sizes = [8, 128], strides = [1, 1]} : vector<8x384xf32> to vector<8x128xf32>
    %576 = arith.mulf %565, %575 : vector<8x128xf32>
    %577 = arith.addf %574, %576 : vector<8x128xf32>
    %578 = math.tanh %577 : vector<8x128xf32>
    %cst_125 = arith.constant 1.000000e+00 : f32
    %579 = vector.broadcast %cst_125 : f32 to vector<8x128xf32>
    %580 = arith.subf %579, %573 : vector<8x128xf32>
    %581 = arith.mulf %580, %578 : vector<8x128xf32>
    %582 = arith.mulf %573, %499 : vector<8x128xf32>
    %583 = arith.addf %581, %582 : vector<8x128xf32>
    %584 = vector.broadcast %c6_i32 : i32 to vector<8x1xi32>
    %585 = arith.cmpi sgt, %7, %584 : vector<8x1xi32>
    %586 = vector.shape_cast %585 : vector<8x1xi1> to vector<8x1xi1>
    %587 = vector.broadcast %586 : vector<8x1xi1> to vector<8x128xi1>
    %588 = arith.select %587, %583, %499 : vector<8x128xi1>, vector<8x128xf32>
    %cst_126 = arith.constant 0.000000e+00 : f32
    %589 = vector.shape_cast %585 : vector<8x1xi1> to vector<8x1xi1>
    %590 = vector.broadcast %589 : vector<8x1xi1> to vector<8x128xi1>
    %591 = vector.broadcast %cst_126 : f32 to vector<8x128xf32>
    %592 = arith.select %590, %583, %591 : vector<8x128xi1>, vector<8x128xf32>
    %593 = arith.index_cast %550 : i32 to index
    %c0_127 = arith.constant 0 : index
    %594 = vector.load %arg10[%593, %c0_127] : memref<64x128xf32, #tpu.memory_space<vmem>>, vector<8x128xf32>
    tpu.vector_store %arg10[%593, %c0_127], %592 {strides = array<i32>} : memref<64x128xf32, #tpu.memory_space<vmem>>, vector<8x128xf32>,
    %595 = arith.index_cast %552 : i32 to index
    %c384_128 = arith.constant 384 : index
    %596 = vector.load %arg13[%595, %c384_128] : memref<64x768xf32, #tpu.memory_space<vmem>>, vector<8x384xf32>
    %cst_129 = arith.constant dense<0.000000e+00> : vector<8x384xf32>
    %597 = tpu.matmul %541, %10, %cst_129 {dimension_numbers = #tpu.dot_dimension_numbers<[1], [0], [0], [1], [0, 0, 1, 1], [], []>} : vector<8x128xf32>, vector<128x384xf32>, vector<8x384xf32> -> vector<8x384xf32>
    %598 = vector.broadcast %11 : vector<1x384xf32> to vector<8x384xf32>
    %599 = arith.addf %597, %598 : vector<8x384xf32>
    %600 = vector.extract_strided_slice %596 {offsets = [0, 0], sizes = [8, 128], strides = [1, 1]} : vector<8x384xf32> to vector<8x128xf32>
    %601 = vector.extract_strided_slice %599 {offsets = [0, 0], sizes = [8, 128], strides = [1, 1]} : vector<8x384xf32> to vector<8x128xf32>
    %602 = arith.addf %600, %601 : vector<8x128xf32>
    %603 = arith.negf %602 : vector<8x128xf32>
    %604 = math.exp %603 : vector<8x128xf32>
    %cst_130 = arith.constant 1.000000e+00 : f32
    %605 = vector.broadcast %cst_130 : f32 to vector<8x128xf32>
    %606 = arith.addf %605, %604 : vector<8x128xf32>
    %607 = arith.divf %605, %606 : vector<8x128xf32>
    %608 = vector.extract_strided_slice %596 {offsets = [0, 128], sizes = [8, 128], strides = [1, 1]} : vector<8x384xf32> to vector<8x128xf32>
    %609 = vector.extract_strided_slice %599 {offsets = [0, 128], sizes = [8, 128], strides = [1, 1]} : vector<8x384xf32> to vector<8x128xf32>
    %610 = arith.addf %608, %609 : vector<8x128xf32>
    %611 = arith.negf %610 : vector<8x128xf32>
    %612 = math.exp %611 : vector<8x128xf32>
    %cst_131 = arith.constant 1.000000e+00 : f32
    %613 = vector.broadcast %cst_131 : f32 to vector<8x128xf32>
    %614 = arith.addf %613, %612 : vector<8x128xf32>
    %615 = arith.divf %613, %614 : vector<8x128xf32>
    %616 = vector.extract_strided_slice %596 {offsets = [0, 256], sizes = [8, 128], strides = [1, 1]} : vector<8x384xf32> to vector<8x128xf32>
    %617 = vector.extract_strided_slice %599 {offsets = [0, 256], sizes = [8, 128], strides = [1, 1]} : vector<8x384xf32> to vector<8x128xf32>
    %618 = arith.mulf %607, %617 : vector<8x128xf32>
    %619 = arith.addf %616, %618 : vector<8x128xf32>
    %620 = math.tanh %619 : vector<8x128xf32>
    %cst_132 = arith.constant 1.000000e+00 : f32
    %621 = vector.broadcast %cst_132 : f32 to vector<8x128xf32>
    %622 = arith.subf %621, %615 : vector<8x128xf32>
    %623 = arith.mulf %622, %620 : vector<8x128xf32>
    %624 = arith.mulf %615, %541 : vector<8x128xf32>
    %625 = arith.addf %623, %624 : vector<8x128xf32>
    %626 = vector.broadcast %548 : i32 to vector<8x1xi32>
    %627 = arith.cmpi sgt, %7, %626 : vector<8x1xi32>
    %628 = vector.shape_cast %627 : vector<8x1xi1> to vector<8x1xi1>
    %629 = vector.broadcast %628 : vector<8x1xi1> to vector<8x128xi1>
    %630 = arith.select %629, %625, %541 : vector<8x128xi1>, vector<8x128xf32>
    %cst_133 = arith.constant 0.000000e+00 : f32
    %631 = vector.shape_cast %627 : vector<8x1xi1> to vector<8x1xi1>
    %632 = vector.broadcast %631 : vector<8x1xi1> to vector<8x128xi1>
    %633 = vector.broadcast %cst_133 : f32 to vector<8x128xf32>
    %634 = arith.select %632, %625, %633 : vector<8x128xi1>, vector<8x128xf32>
    %635 = arith.index_cast %552 : i32 to index
    %c0_134 = arith.constant 0 : index
    %636 = vector.load %arg11[%635, %c0_134] : memref<64x128xf32, #tpu.memory_space<vmem>>, vector<8x128xf32>
    tpu.vector_store %arg11[%635, %c0_134], %634 {strides = array<i32>} : memref<64x128xf32, #tpu.memory_space<vmem>>, vector<8x128xf32>,
    %c7_i32_135 = arith.constant 7 : i32
    %c7_i32_136 = arith.constant 7 : i32
    %637 = arith.subi %c7_i32_136, %c7_i32_135 : i32
    %c8_i32_137 = arith.constant 8 : i32
    %638 = arith.muli %c7_i32_135, %c8_i32_137 : i32
    %639 = tpu.assume_multiple %638, 8 : i32
    %c8_i32_138 = arith.constant 8 : i32
    %640 = arith.muli %637, %c8_i32_138 : i32
    %641 = tpu.assume_multiple %640, 8 : i32
    %642 = arith.index_cast %639 : i32 to index
    %c0_139 = arith.constant 0 : index
    %643 = vector.load %arg13[%642, %c0_139] : memref<64x768xf32, #tpu.memory_space<vmem>>, vector<8x384xf32>
    %cst_140 = arith.constant dense<0.000000e+00> : vector<8x384xf32>
    %644 = tpu.matmul %588, %8, %cst_140 {dimension_numbers = #tpu.dot_dimension_numbers<[1], [0], [0], [1], [0, 0, 1, 1], [], []>} : vector<8x128xf32>, vector<128x384xf32>, vector<8x384xf32> -> vector<8x384xf32>
    %645 = vector.broadcast %9 : vector<1x384xf32> to vector<8x384xf32>
    %646 = arith.addf %644, %645 : vector<8x384xf32>
    %647 = vector.extract_strided_slice %643 {offsets = [0, 0], sizes = [8, 128], strides = [1, 1]} : vector<8x384xf32> to vector<8x128xf32>
    %648 = vector.extract_strided_slice %646 {offsets = [0, 0], sizes = [8, 128], strides = [1, 1]} : vector<8x384xf32> to vector<8x128xf32>
    %649 = arith.addf %647, %648 : vector<8x128xf32>
    %650 = arith.negf %649 : vector<8x128xf32>
    %651 = math.exp %650 : vector<8x128xf32>
    %cst_141 = arith.constant 1.000000e+00 : f32
    %652 = vector.broadcast %cst_141 : f32 to vector<8x128xf32>
    %653 = arith.addf %652, %651 : vector<8x128xf32>
    %654 = arith.divf %652, %653 : vector<8x128xf32>
    %655 = vector.extract_strided_slice %643 {offsets = [0, 128], sizes = [8, 128], strides = [1, 1]} : vector<8x384xf32> to vector<8x128xf32>
    %656 = vector.extract_strided_slice %646 {offsets = [0, 128], sizes = [8, 128], strides = [1, 1]} : vector<8x384xf32> to vector<8x128xf32>
    %657 = arith.addf %655, %656 : vector<8x128xf32>
    %658 = arith.negf %657 : vector<8x128xf32>
    %659 = math.exp %658 : vector<8x128xf32>
    %cst_142 = arith.constant 1.000000e+00 : f32
    %660 = vector.broadcast %cst_142 : f32 to vector<8x128xf32>
    %661 = arith.addf %660, %659 : vector<8x128xf32>
    %662 = arith.divf %660, %661 : vector<8x128xf32>
    %663 = vector.extract_strided_slice %643 {offsets = [0, 256], sizes = [8, 128], strides = [1, 1]} : vector<8x384xf32> to vector<8x128xf32>
    %664 = vector.extract_strided_slice %646 {offsets = [0, 256], sizes = [8, 128], strides = [1, 1]} : vector<8x384xf32> to vector<8x128xf32>
    %665 = arith.mulf %654, %664 : vector<8x128xf32>
    %666 = arith.addf %663, %665 : vector<8x128xf32>
    %667 = math.tanh %666 : vector<8x128xf32>
    %cst_143 = arith.constant 1.000000e+00 : f32
    %668 = vector.broadcast %cst_143 : f32 to vector<8x128xf32>
    %669 = arith.subf %668, %662 : vector<8x128xf32>
    %670 = arith.mulf %669, %667 : vector<8x128xf32>
    %671 = arith.mulf %662, %588 : vector<8x128xf32>
    %672 = arith.addf %670, %671 : vector<8x128xf32>
    %673 = vector.broadcast %c7_i32_135 : i32 to vector<8x1xi32>
    %674 = arith.cmpi sgt, %7, %673 : vector<8x1xi32>
    %675 = vector.shape_cast %674 : vector<8x1xi1> to vector<8x1xi1>
    %676 = vector.broadcast %675 : vector<8x1xi1> to vector<8x128xi1>
    %677 = arith.select %676, %672, %588 : vector<8x128xi1>, vector<8x128xf32>
    %cst_144 = arith.constant 0.000000e+00 : f32
    %678 = vector.shape_cast %674 : vector<8x1xi1> to vector<8x1xi1>
    %679 = vector.broadcast %678 : vector<8x1xi1> to vector<8x128xi1>
    %680 = vector.broadcast %cst_144 : f32 to vector<8x128xf32>
    %681 = arith.select %679, %672, %680 : vector<8x128xi1>, vector<8x128xf32>
    %682 = arith.index_cast %639 : i32 to index
    %c0_145 = arith.constant 0 : index
    %683 = vector.load %arg10[%682, %c0_145] : memref<64x128xf32, #tpu.memory_space<vmem>>, vector<8x128xf32>
    tpu.vector_store %arg10[%682, %c0_145], %681 {strides = array<i32>} : memref<64x128xf32, #tpu.memory_space<vmem>>, vector<8x128xf32>,
    %684 = arith.index_cast %641 : i32 to index
    %c384_146 = arith.constant 384 : index
    %685 = vector.load %arg13[%684, %c384_146] : memref<64x768xf32, #tpu.memory_space<vmem>>, vector<8x384xf32>
    %cst_147 = arith.constant dense<0.000000e+00> : vector<8x384xf32>
    %686 = tpu.matmul %630, %10, %cst_147 {dimension_numbers = #tpu.dot_dimension_numbers<[1], [0], [0], [1], [0, 0, 1, 1], [], []>} : vector<8x128xf32>, vector<128x384xf32>, vector<8x384xf32> -> vector<8x384xf32>
    %687 = vector.broadcast %11 : vector<1x384xf32> to vector<8x384xf32>
    %688 = arith.addf %686, %687 : vector<8x384xf32>
    %689 = vector.extract_strided_slice %685 {offsets = [0, 0], sizes = [8, 128], strides = [1, 1]} : vector<8x384xf32> to vector<8x128xf32>
    %690 = vector.extract_strided_slice %688 {offsets = [0, 0], sizes = [8, 128], strides = [1, 1]} : vector<8x384xf32> to vector<8x128xf32>
    %691 = arith.addf %689, %690 : vector<8x128xf32>
    %692 = arith.negf %691 : vector<8x128xf32>
    %693 = math.exp %692 : vector<8x128xf32>
    %cst_148 = arith.constant 1.000000e+00 : f32
    %694 = vector.broadcast %cst_148 : f32 to vector<8x128xf32>
    %695 = arith.addf %694, %693 : vector<8x128xf32>
    %696 = arith.divf %694, %695 : vector<8x128xf32>
    %697 = vector.extract_strided_slice %685 {offsets = [0, 128], sizes = [8, 128], strides = [1, 1]} : vector<8x384xf32> to vector<8x128xf32>
    %698 = vector.extract_strided_slice %688 {offsets = [0, 128], sizes = [8, 128], strides = [1, 1]} : vector<8x384xf32> to vector<8x128xf32>
    %699 = arith.addf %697, %698 : vector<8x128xf32>
    %700 = arith.negf %699 : vector<8x128xf32>
    %701 = math.exp %700 : vector<8x128xf32>
    %cst_149 = arith.constant 1.000000e+00 : f32
    %702 = vector.broadcast %cst_149 : f32 to vector<8x128xf32>
    %703 = arith.addf %702, %701 : vector<8x128xf32>
    %704 = arith.divf %702, %703 : vector<8x128xf32>
    %705 = vector.extract_strided_slice %685 {offsets = [0, 256], sizes = [8, 128], strides = [1, 1]} : vector<8x384xf32> to vector<8x128xf32>
    %706 = vector.extract_strided_slice %688 {offsets = [0, 256], sizes = [8, 128], strides = [1, 1]} : vector<8x384xf32> to vector<8x128xf32>
    %707 = arith.mulf %696, %706 : vector<8x128xf32>
    %708 = arith.addf %705, %707 : vector<8x128xf32>
    %709 = math.tanh %708 : vector<8x128xf32>
    %cst_150 = arith.constant 1.000000e+00 : f32
    %710 = vector.broadcast %cst_150 : f32 to vector<8x128xf32>
    %711 = arith.subf %710, %704 : vector<8x128xf32>
    %712 = arith.mulf %711, %709 : vector<8x128xf32>
    %713 = arith.mulf %704, %630 : vector<8x128xf32>
    %714 = arith.addf %712, %713 : vector<8x128xf32>
    %715 = vector.broadcast %637 : i32 to vector<8x1xi32>
    %716 = arith.cmpi sgt, %7, %715 : vector<8x1xi32>
    %717 = vector.shape_cast %716 : vector<8x1xi1> to vector<8x1xi1>
    %718 = vector.broadcast %717 : vector<8x1xi1> to vector<8x128xi1>
    %719 = arith.select %718, %714, %630 : vector<8x128xi1>, vector<8x128xf32>
    %cst_151 = arith.constant 0.000000e+00 : f32
    %720 = vector.shape_cast %716 : vector<8x1xi1> to vector<8x1xi1>
    %721 = vector.broadcast %720 : vector<8x1xi1> to vector<8x128xi1>
    %722 = vector.broadcast %cst_151 : f32 to vector<8x128xf32>
    %723 = arith.select %721, %714, %722 : vector<8x128xi1>, vector<8x128xf32>
    %724 = arith.index_cast %641 : i32 to index
    %c0_152 = arith.constant 0 : index
    %725 = vector.load %arg11[%724, %c0_152] : memref<64x128xf32, #tpu.memory_space<vmem>>, vector<8x128xf32>
    tpu.vector_store %arg11[%724, %c0_152], %723 {strides = array<i32>} : memref<64x128xf32, #tpu.memory_space<vmem>>, vector<8x128xf32>,
    %c8_i32_153 = arith.constant 8 : i32
    %726 = tpu.concatenate %677, %719 in 1 : vector<8x128xf32>, vector<8x128xf32> -> vector<8x256xf32>
    %c0_154 = arith.constant 0 : index
    %c0_155 = arith.constant 0 : index
    %727 = vector.load %arg8[%c0_154, %c0_155] : memref<256x32xf32, #tpu.memory_space<vmem>>, vector<256x32xf32>
    %cst_156 = arith.constant dense<0.000000e+00> : vector<8x32xf32>
    %728 = tpu.matmul %726, %727, %cst_156 {dimension_numbers = #tpu.dot_dimension_numbers<[1], [0], [0], [1], [0, 0, 1, 1], [], []>} : vector<8x256xf32>, vector<256x32xf32>, vector<8x32xf32> -> vector<8x32xf32>
    %c0_157 = arith.constant 0 : index
    %c0_158 = arith.constant 0 : index
    %729 = vector.load %arg9[%c0_157, %c0_158] : memref<1x32xf32, #tpu.memory_space<vmem>>, vector<1x32xf32>
    %730 = vector.broadcast %729 : vector<1x32xf32> to vector<8x32xf32>
    %731 = arith.addf %728, %730 : vector<8x32xf32>
    %732 = math.tanh %731 : vector<8x32xf32>
    %c0_159 = arith.constant 0 : index
    %c0_160 = arith.constant 0 : index
    %733 = vector.load %arg12[%c0_159, %c0_160] : memref<8x32xf32, #tpu.memory_space<vmem>>, vector<8x32xf32>
    tpu.vector_store %arg12[%c0_159, %c0_160], %732 {strides = array<i32>} : memref<8x32xf32, #tpu.memory_space<vmem>>, vector<8x32xf32>,
    return
  }
}

</mosaic_0001>

<bundles_post_ra>
// kernel: tpu_custom_call.1
= control target key start
LH: loop header
LB: loop body
LE: loop exit
PB: predicated region body
PF: predicated region fallthrough
CT: control target
= control target key end

     0   :  { %18 = vsyncpa [#allocation4], 0  ;;  %s7373_s0 = inlined_call_operand.vmem [shape: s32[8,1], index: 0, kind: input, shape index: {}]   ;;  %s7374_s1 = inlined_call_operand.vmem [shape: bf16[64,32], index: 1, kind: input, shape index: {}]   ;;  %s7375_s2 = inlined_call_operand.hbm [shape: bf16[32,768], index: 2, kind: input, shape index: {}]   ;;  %s7376_s3 = inlined_call_operand.vmem [shape: f32[1,768], index: 3, kind: input, shape index: {}]   ;;  %s7377_s4 = inlined_call_operand.vmem [shape: f32[128,384], index: 4, kind: input, shape index: {}]   ;;  %s7378_s5 = inlined_call_operand.hbm [shape: f32[1,384], index: 5, kind: input, shape index: {}]   ;;  %s7379_s6 = inlined_call_operand.hbm [shape: f32[128,384], index: 6, kind: input, shape index: {}]   ;;  %s7380_s7 = inlined_call_operand.vmem [shape: f32[1,384], index: 7, kind: input, shape index: {}]   ;;  %s7381_s8 = inlined_call_operand.vmem [shape: f32[256,32], index: 8, kind: input, shape index: {}]   ;;  %s7382_s9 = inlined_call_operand.vmem [shape: f32[1,32], index: 9, kind: input, shape index: {}]   ;;  %s7383_s10 = inlined_call_operand.hbm [shape: f32[64,128], index: 10, kind: output, shape index: {0}]   ;;  %s7384_s11 = inlined_call_operand.hbm [shape: f32[64,128], index: 11, kind: output, shape index: {1}]   ;;  %s7385_s12 = inlined_call_operand.hbm [shape: f32[8,32], index: 12, kind: output, shape index: {2}]  }
   0x1   :  { %19 = vsyncpa [#allocation7], 0 }
   0x2   :  { %20 = vsyncpa [#allocation5], 0 }
   0x3   :  { %21 = vsyncpa [#allocation11], 0  ;;  %s5760_s21 = smov [#allocation6]   ;;  %s5761_s23 = smov [#allocation3]  }
   0x4   :  { %s48_s22 = sshll.u32 %s5760_s21, 4  ;;  %s31_s24 = sshll.u32 %s5761_s23, 4  ;;  %s49_s22 = int_to_ptr.vmem [resolvable:$true] %s48_s22  ;;  %s5839_s24 = int_to_ptr.vmem [resolvable:$true] %s31_s24 }
   0x5   :  { %s5620_s27 = scalar_lea.hbm %s7378_s5, 48 }
   0x6   :  { %p5621_p0 = scmp.ne.s32.totalorder %s7378_s5, %s5620_s27  ;;  %p5624_p1 = scmp.lt.u32.totalorder %s5620_s27, %s7378_s5 }
   0x8   :  { %p5626_p2 = pnand %p5624_p1, %p5621_p0 }
   0xa   :  { %5629 = shalt.err (!%p5626_p2)
}
   0xb   :  { %s5630_s14 = scalar_lea.vmem %s49_s22, 48  ;;  %s5634_s15 = scalar_lea.vmem %s49_s22, 64 }
   0xc   :  { %p5631_p3 = scmp.ne.s32.totalorder %s49_s22, %s5630_s14  ;;  %p5635_p4 = scmp.lt.s32.totalorder %s49_s22, %s49_s22 }
   0xd   :  { %p5636_p5 = scmp.lt.s32.totalorder %s5634_s15, %s5630_s14 }
   0xf   :  { %p5637_p6 = por %p5636_p5, %p5635_p4 }
  0x11   :  { %p5638_p7 = pnand %p5637_p6, %p5631_p3 }
  0x13   :  { %5641 = shalt.err (!%p5638_p7)
}
  0x14   :  { %51 = dma.hbm_to_vmem [thread:$0]  %s7378_s5, 48, %s49_s22, [#allocation7]  }
  0x15   :  { %s5642_s20 = scalar_lea.hbm %s7375_s2, 1536 }
  0x16   :  { %p5643_p8 = scmp.ne.s32.totalorder %s7375_s2, %s5642_s20  ;;  %p5646_p9 = scmp.lt.u32.totalorder %s5642_s20, %s7375_s2 }
  0x18   :  { %p5648_p10 = pnand %p5646_p9, %p5643_p8 }
  0x1a   :  { %5651 = shalt.err (!%p5648_p10)
}
  0x1b   :  { %s5652_s27 = scalar_lea.vmem %s5839_s24, 1536  ;;  %p5657_p12 = scmp.lt.s32.totalorder %s5839_s24, %s5839_s24 }
  0x1c   :  { %p5653_p11 = scmp.ne.s32.totalorder %s5839_s24, %s5652_s27  ;;  %p5658_p13 = scmp.lt.s32.totalorder %s5652_s27, %s5652_s27 }
  0x1e   :  { %p5659_p0 = por %p5658_p13, %p5657_p12 }
  0x20   :  { %p5660_p1 = pnand %p5659_p0, %p5653_p11 }
  0x22   :  { %5663 = shalt.err (!%p5660_p1)
}
  0x23   :  { %s5762_s5 = smov 384   ;;  %s5763_s22 = smov 24  }
  0x24   :  { %37 = dma.hbm_to_vmem [thread:$0]  %s7375_s2, 1536, %s5839_s24, [#allocation4], %s5762_s5, %s5762_s5, %s5763_s22  }
  0x25   :  { %s5764_s30 = smov [#allocation8]   ;;  %s5664_s16 = scalar_lea.hbm %s7379_s6, 6144 }
  0x26   :  { %s57_s13 = sshll.u32 %s5764_s30, 4  ;;  %p5665_p2 = scmp.ne.s32.totalorder %s7379_s6, %s5664_s16  ;;  %s58_s13 = int_to_ptr.vmem [resolvable:$true] %s57_s13 }
  0x27   :  { %p5668_p3 = scmp.lt.u32.totalorder %s5664_s16, %s7379_s6 }
  0x29   :  { %p5670_p4 = pnand %p5668_p3, %p5665_p2 }
  0x2b   :  { %5673 = shalt.err (!%p5670_p4)
}
  0x2c   :  { %s5674_s21 = scalar_lea.vmem %s58_s13, 6144  ;;  %p5679_p6 = scmp.lt.s32.totalorder %s58_s13, %s58_s13 }
  0x2d   :  { %p5675_p5 = scmp.ne.s32.totalorder %s58_s13, %s5674_s21  ;;  %p5680_p7 = scmp.lt.s32.totalorder %s5674_s21, %s5674_s21 }
  0x2f   :  { %p5681_p8 = por %p5680_p7, %p5679_p6 }
  0x31   :  { %p5682_p9 = pnand %p5681_p8, %p5675_p5 }
  0x33   :  { %5685 = shalt.err (!%p5682_p9)
}
  0x34   :  { %63 = dma.hbm_to_vmem [thread:$0]  %s7379_s6, 6144, %s58_s13, [#allocation7], %s5762_s5, %s5762_s5, %s5763_s22  }
  0x35   :  { %5752 = dma.done.wait [#allocation4], 1536  }
  0x36   :  { %5753 = vsyncadd [#allocation4], 4294965760 }
  0x37   :  { %5754 = dma.done.wait [#allocation7], 6192  }
  0x38   :  { %5755 = vsyncadd [#allocation7], 4294961104  ;;  %v5765_v0 = vmov 0   ;;  %v5436_v1 = vld [vmem:[#allocation3 + $0x4] ss:$24 sps:$4 sm:$0xff]   ;;  %v5889_v9 = vld [vmem:[%s7374_s1] sm:$0xff]  }
  0x39   :  { %257 = vmatprep.mubr.bf16.mxu0 %v5765_v0  ;;  %330 = vmatprep.mubr.bf16.mxu1 %v5765_v0  ;;  %v5438_v2 = vld [vmem:[#allocation3 + $0xc] ss:$24 sps:$4 sm:$0xff]   ;;  %v5440_v3 = vld [vmem:[#allocation3] ss:$24 sps:$4 sm:$0xff]   ;;  %v5444_v6 = vld [vmem:[#allocation3 + $0x3c] ss:$24 sps:$4 sm:$0xff]  }
  0x3a   :  { %5434 = vset.pattern.permute.xlu0 %v5765_v0  ;;  %5435 = vset.pattern.permute.xlu1 %v5765_v0  ;;  %v5441_v4 = vld [vmem:[#allocation3 + $0x8] ss:$24 sps:$4 sm:$0xff]   ;;  %v5442_v5 = vld [vmem:[#allocation3 + $0x34] ss:$24 sps:$4 sm:$0xff]   ;;  %v5447_v8 = vld [vmem:[#allocation3 + $0x38] ss:$24 sps:$4 sm:$0xff]  }
  0x3b   :  { %225 = vmatprep.subr.bf16.mxu0 %v5436_v1  ;;  %298 = vmatprep.subr.bf16.mxu1 %v5438_v2  ;;  %v5446_v7 = vld [vmem:[#allocation3 + $0x30] ss:$24 sps:$4 sm:$0xff]   ;;  %v5451_v11 = vld [vmem:[#allocation3 + $0x14] ss:$24 sps:$4 sm:$0xff]   ;;  %v494_v12 = vld [vmem:[%s7377_s4 + $0x8] sm:$0xff]  ;;  %vm212_vm0 = vcmask 261120  }
  0x3c   :  { %226 = vmatpush1.bf16.msra.mxu0 %v5440_v3  ;;  %299 = vmatpush1.bf16.msra.mxu1 %v5441_v4  ;;  %v5449_v10 = vld [vmem:[#allocation3 + $0x10] ss:$24 sps:$4 sm:$0xff]   ;;  %v503_v19 = vld [vmem:[%s7377_s4 + $0x50] sm:$0xff]  ;;  %v502_v22 = vld [vmem:[%s7377_s4 + $0x48] sm:$0xff]  ;;  %v7388_v44 = vmov 0.0|0.0   ;;  %v7386_v4 = vmov 0.0  }
  0x3d   :  { %227 = vmatprep.subr.bf16.mxu0 %v5442_v5  ;;  %300 = vmatprep.subr.bf16.mxu1 %v5444_v6  ;;  %v497_v13 = vld [vmem:[%s7377_s4 + $0x20] sm:$0xff]  ;;  %v496_v15 = vld [vmem:[%s7377_s4 + $0x18] sm:$0xff]  ;;  %v499_v20 = vld [vmem:[%s7377_s4 + $0x30] sm:$0xff]  ;;  %vm5768_vm5 = vmmov 0   ;;  %s5770_s13 = smov [#allocation9]  }
  0x3e   :  { %v493_v14 = vld [vmem:[%s7377_s4] sm:$0xff]  ;;  %v5903_v16 = vpack.c.bf16 %v497_v13, %v494_v12  ;;  %v500_v18 = vld [vmem:[%s7377_s4 + $0x38] sm:$0xff]  ;;  %v506_v23 = vld [vmem:[%s7377_s4 + $0x68] sm:$0xff]  ;;  %v5933_v25 = vpack.c.bf16 %v502_v22, %v499_v20  ;;  %s3511_s14 = sshll.u32 %s5770_s13, 4  ;;  %s3512_s14 = int_to_ptr.vmem [resolvable:$true] %s3511_s14 }
  0x3f   :  { %v5905_v17 = vpack.c.bf16 %v496_v15, %v493_v14  ;;  %v5916_v21 = vpack.c.bf16 %v503_v19, %v500_v18  ;;  %v509_v24 = vld [vmem:[%s7377_s4 + $0x80] sm:$0xff]  ;;  %v5939_v26 = vld [vmem:[%s7374_s1 + $0x8] sm:$0xff]   ;;  %v508_v28 = vld [vmem:[%s7377_s4 + $0x78] sm:$0xff] }
  0x40   :  { %228 = vmatpush1.bf16.msra.mxu0 %v5446_v7  ;;  %301 = vmatpush1.bf16.msra.mxu1 %v5447_v8  ;;  %v505_v27 = vld [vmem:[%s7377_s4 + $0x60] sm:$0xff]  ;;  %v5949_v29 = vpack.c.bf16 %v509_v24, %v506_v23  ;;  %v512_v30 = vld [vmem:[%s7377_s4 + $0x98] sm:$0xff]  ;;  %v515_v31 = vld [vmem:[%s7377_s4 + $0xb0] sm:$0xff] }
  0x41   :  { %371 = vmatprep.subr.bf16.mxu0 %v5451_v11  ;;  %4493 = vmatprep.subr.bf16.mxu1 %v5903_v16  ;;  %v5456_v32 = vld [vmem:[#allocation3 + $0x44] ss:$24 sps:$4 sm:$0xff]   ;;  %v5958_v33 = vpack.c.bf16 %v508_v28, %v505_v27  ;;  %v5454_v34 = vld [vmem:[#allocation3 + $0x40] ss:$24 sps:$4 sm:$0xff]   ;;  %v5961_v35 = vpack.c.bf16 %v515_v31, %v512_v30  ;;  %v521_v39 = vld [vmem:[%s7377_s4 + $0xe0] sm:$0xff] }
  0x42   :  { %v511_v36 = vld [vmem:[%s7377_s4 + $0x90] sm:$0xff]  ;;  %v514_v37 = vld [vmem:[%s7377_s4 + $0xa8] sm:$0xff]  ;;  %v517_v42 = vld [vmem:[%s7377_s4 + $0xc0] sm:$0xff] }
  0x43   :  { %3576 = vmatmul.mubr.msk.bf16.vlgmr.msra.gmra.mrb[0].mxu0 %vm212_vm0, %v5889_v9  ;;  %3580 = vmatmul.mubr.msk.bf16.vlgmr.msra.gmra.mrb[0].mxu1 %vm212_vm0, %v5889_v9  ;;  %v518_v38 = vld [vmem:[%s7377_s4 + $0xc8] sm:$0xff]  ;;  %v5982_v40 = vpack.c.bf16 %v514_v37, %v511_v36  ;;  %v520_v43 = vld [vmem:[%s7377_s4 + $0xd8] sm:$0xff]  ;;  %v5997_v45 = vld [vmem:[%s7374_s1 + $0x10] sm:$0xff]  }
  0x44   :  { %372 = vmatpush1.bf16.msra.mxu0 %v5449_v10  ;;  %4495 = vmatpush1.bf16.msra.mxu1 %v5905_v17  ;;  %v5985_v41 = vpack.c.bf16 %v521_v39, %v518_v38  ;;  %v524_v46 = vld [vmem:[%s7377_s4 + $0xf8] sm:$0xff]  ;;  %v527_v47 = vld [vmem:[%s7377_s4 + $0x110] sm:$0xff]  ;;  %v6006_v48 = vpack.c.bf16 %v520_v43, %v517_v42  ;;  %v526_v51 = vld [vmem:[%s7377_s4 + $0x108] sm:$0xff] }
  0x45   :  { %267 = vmatprep.mubr.bf16.mxu0 %v5765_v0  ;;  %4497 = vmatprep.subr.bf16.mxu1 %v5916_v21  ;;  %v6009_v49 = vpack.c.bf16 %v527_v47, %v524_v46  ;;  %v523_v50 = vld [vmem:[%s7377_s4 + $0xf0] sm:$0xff]  ;;  %v530_v52 = vld [vmem:[%s7377_s4 + $0x128] sm:$0xff]  ;;  %v533_v53 = vld [vmem:[%s7377_s4 + $0x140] sm:$0xff] }
  0x46   :  { %340 = vmatprep.mubr.bf16.mxu1 %v5765_v0  ;;  %373 = vmatprep.subr.bf16.mxu0 %v5456_v32  ;;  %7436 = vst [vmem:[#allocation17_spill] sm:$0xff] %v5985_v41  ;;  %7437 = vst [vmem:[#allocation18_spill] sm:$0xff] %v6006_v48  ;;  %v6030_v54 = vpack.c.bf16 %v526_v51, %v523_v50  ;;  %v6033_v55 = vpack.c.bf16 %v533_v53, %v530_v52  ;;  %v529_v56 = vld [vmem:[%s7377_s4 + $0x120] sm:$0xff]  ;;  %v532_v57 = vld [vmem:[%s7377_s4 + $0x138] sm:$0xff] }
  0x47   :  { %7438 = vst [vmem:[#allocation19_spill] sm:$0xff] %v6009_v49  ;;  %v6044_v58 = vld [vmem:[%s7374_s1 + $0x18] sm:$0xff]   ;;  %v539_v60 = vld [vmem:[%s7377_s4 + $0x170] sm:$0xff]  ;;  %v6053_v61 = vpack.c.bf16 %v532_v57, %v529_v56  ;;  %v538_v1 = vld [vmem:[%s7377_s4 + $0x168] sm:$0xff] }
  0x48   :  { %4499 = vmatpush1.bf16.msra.mxu1 %v5933_v25  ;;  %374 = vmatpush1.bf16.msra.mxu0 %v5454_v34  ;;  %7439 = vst [vmem:[#allocation20_spill] sm:$0xff] %v6030_v54  ;;  %7440 = vst [vmem:[#allocation21_spill] sm:$0xff] %v6033_v55  ;;  %v536_v59 = vld [vmem:[%s7377_s4 + $0x158] sm:$0xff]  ;;  %v535_v63 = vld [vmem:[%s7377_s4 + $0x150] sm:$0xff] }
  0x49   :  { %4501 = vmatprep.subr.bf16.mxu1 %v5949_v29  ;;  %4524 = vmatprep.subr.bf16.mxu0 %v7388_v44  ;;  %7441 = vst [vmem:[#allocation22_spill] sm:$0xff] %v6053_v61  ;;  %v6056_v62 = vpack.c.bf16 %v539_v60, %v536_v59  ;;  %v543_v2 = vld [vmem:[#allocation8 + $0x8] sm:$0xff]  ;;  %v546_v3 = vld [vmem:[#allocation8 + $0x20] sm:$0xff]  ;;  %v6071_v5 = vpack.c.bf16 %v538_v1, %v535_v63  ;;  %v498_v7 = vld [vmem:[%s7377_s4 + $0x28] sm:$0xff] }
  0x4a   :  { %v495_v6 = vld [vmem:[%s7377_s4 + $0x10] sm:$0xff]  ;;  %v6080_v8 = vpack.c.bf16 %v546_v3, %v543_v2  ;;  %v552_v13 = vld [vmem:[#allocation8 + $0x50] sm:$0xff]  ;;  %v504_v19 = vld [vmem:[%s7377_s4 + $0x58] sm:$0xff] }
  0x4b   :  { %3577 = vmatmul.mubr.msk.bf16.gmra.mrb[4].mxu0 %vm212_vm0, %v5939_v26  ;;  %3581 = vmatmul.mubr.msk.bf16.gmra.mrb[4].mxu1 %vm212_vm0, %v5939_v26  ;;  %7442 = vst [vmem:[#allocation23_spill] sm:$0xff] %v6056_v62  ;;  %7443 = vst [vmem:[#allocation24_spill] sm:$0xff] %v6071_v5  ;;  %v542_v10 = vld [vmem:[#allocation8] sm:$0xff]  ;;  %v545_v11 = vld [vmem:[#allocation8 + $0x18] sm:$0xff]  ;;  %v6082_v14 = vpack.c.bf16 %v498_v7, %v495_v6 }
  0x4c   :  { %277 = vmatprep.mubr.bf16.mxu0 %v5765_v0  ;;  %350 = vmatprep.mubr.bf16.mxu1 %v5765_v0  ;;  %7444 = vst [vmem:[#allocation25_spill] sm:$0xff] %v6080_v8  ;;  %v549_v12 = vld [vmem:[#allocation8 + $0x38] sm:$0xff]  ;;  %v6085_v15 = vpack.c.bf16 %v545_v11, %v542_v10  ;;  %v501_v18 = vld [vmem:[%s7377_s4 + $0x40] sm:$0xff]  ;;  %v558_v27 = vld [vmem:[#allocation8 + $0x80] sm:$0xff] }
  0x4d   :  { %4503 = vmatpush1.bf16.msra.mxu1 %v5958_v33  ;;  %v6094_v20 = vpack.c.bf16 %v552_v13, %v549_v12  ;;  %v548_v22 = vld [vmem:[#allocation8 + $0x30] sm:$0xff]  ;;  %v551_v23 = vld [vmem:[#allocation8 + $0x48] sm:$0xff]  ;;  %v6100_v28 = vpack.c.bf16 %v504_v19, %v501_v18  ;;  %v554_v36 = vld [vmem:[#allocation8 + $0x60] sm:$0xff] }
  0x4e   :  { %4505 = vmatprep.subr.bf16.mxu1 %v5961_v35  ;;  %v555_v24 = vld [vmem:[#allocation8 + $0x68] sm:$0xff]  ;;  %v6109_v31 = vpack.c.bf16 %v551_v23, %v548_v22  ;;  %v510_v32 = vld [vmem:[%s7377_s4 + $0x88] sm:$0xff]  ;;  %v570_v59 = vld [vmem:[#allocation8 + $0xe0] sm:$0xff] }
  0x4f   :  { %v6105_v30 = vld [vmem:[%s7373_s0] sm:$0xff]  ;;  %v6121_v34 = vpack.c.bf16 %v558_v27, %v555_v24  ;;  %v557_v37 = vld [vmem:[#allocation8 + $0x78] sm:$0xff]  ;;  %v516_v51 = vld [vmem:[%s7377_s4 + $0xb8] sm:$0xff] }
  0x50   :  { %vm775_vm1 = vcmp.gt.s32.totalorder %v6105_v30, 0  ;;  %vm967_vm2 = vcmp.gt.s32.totalorder %v6105_v30, 7  ;;  %v561_v39 = vld [vmem:[#allocation8 + $0x98] sm:$0xff]  ;;  %v564_v42 = vld [vmem:[#allocation8 + $0xb0] sm:$0xff]  ;;  %v6131_v47 = vpack.c.bf16 %v557_v37, %v554_v36  ;;  %vm1500_vm3 = vcmp.gt.s32.totalorder %v6105_v30, 2  ;;  %v563_v56 = vld [vmem:[#allocation8 + $0xa8] sm:$0xff] }
  0x51   :  { %4507 = vmatpush1.bf16.msra.mxu1 %v5982_v40  ;;  %v776_v38 = vsel %vm775_vm1, 1, %v5765_v0  ;;  %v968_v46 = vsel %vm967_vm2, 1, %v5765_v0  ;;  %v513_v50 = vld [vmem:[%s7377_s4 + $0xa0] sm:$0xff]  ;;  %v6141_v52 = vpack.c.bf16 %v564_v42, %v561_v39  ;;  %v1501_v63 = vsel %vm1500_vm3, 1, %v5765_v0  ;;  %v522_v2 = vld [vmem:[%s7377_s4 + $0xe8] sm:$0xff]  ;;  %v566_v6 = vld [vmem:[#allocation8 + $0xc0] sm:$0xff] }
  0x52   :  { %4509 = vmatprep.subr.bf16.mxu1 %v5985_v41  ;;  %778 = vperm.xlu0 %5434, %v776_v38   ;;  %v560_v53 = vld [vmem:[#allocation8 + $0x90] sm:$0xff]  ;;  %v567_v57 = vld [vmem:[#allocation8 + $0xc8] sm:$0xff]  ;;  %v6146_v60 = vpack.c.bf16 %v516_v51, %v513_v50  ;;  %vm1856_vm4 = vcmp.gt.s32.totalorder %v6105_v30, 3  ;;  %v569_v7 = vld [vmem:[#allocation8 + $0xd8] sm:$0xff]  ;;  %vm1144_vm6 = vcmp.gt.s32.totalorder %v6105_v30, 1  ;;  %vm1322_vm7 = vcmp.gt.s32.totalorder %v6105_v30, 6 }
  0x53   :  { %3578 = vmatmul.mubr.msk.bf16.gmra.mrb[8].mxu0 %vm212_vm0, %v5997_v45  ;;  %3582 = vmatmul.mubr.msk.bf16.gmra.mrb[8].mxu1 %vm212_vm0, %v5997_v45  ;;  %v6152_v1 = vpack.c.bf16 %v563_v56, %v560_v53  ;;  %v6162_v3 = vpack.c.bf16 %v570_v59, %v567_v57  ;;  %v573_v10 = vld [vmem:[#allocation8 + $0xf8] sm:$0xff]  ;;  %v576_v11 = vld [vmem:[#allocation8 + $0x110] sm:$0xff]  ;;  %v1857_v13 = vsel %vm1856_vm4, 1, %v5765_v0  ;;  %v6170_v18 = vpack.c.bf16 %v569_v7, %v566_v6  ;;  %v528_v22 = vld [vmem:[%s7377_s4 + $0x118] sm:$0xff] }
  0x54   :  { %287 = vmatprep.mubr.bf16.mxu0 %v5765_v0  ;;  %360 = vmatprep.mubr.bf16.mxu1 %v5765_v0  ;;  %v525_v19 = vld [vmem:[%s7377_s4 + $0x100] sm:$0xff]  ;;  %v6179_v23 = vpack.c.bf16 %v576_v11, %v573_v10  ;;  %v531_v38 = vld [vmem:[%s7377_s4 + $0x130] sm:$0xff]  ;;  %v540_v59 = vld [vmem:[%s7377_s4 + $0x178] sm:$0xff]  ;;  %vm1678_vm8 = vcmp.gt.s32.totalorder %v6105_v30, 5  ;;  %vm2034_vm9 = vcmp.gt.s32.totalorder %v6105_v30, 4 }
  0x55   :  { %4511 = vmatpush1.bf16.msra.mxu1 %v6006_v48  ;;  %v572_v24 = vld [vmem:[#allocation8 + $0xf0] sm:$0xff]  ;;  %v575_v27 = vld [vmem:[#allocation8 + $0x108] sm:$0xff]  ;;  %v6184_v36 = vpack.c.bf16 %v528_v22, %v525_v19  ;;  %v578_v42 = vld [vmem:[#allocation8 + $0x120] sm:$0xff] }
  0x56   :  { %4513 = vmatprep.subr.bf16.mxu1 %v6009_v49  ;;  %970 = vperm.xlu0 %5434, %v968_v46   ;;  %v6189_v37 = vpack.c.bf16 %v575_v27, %v572_v24  ;;  %v581_v46 = vld [vmem:[#allocation8 + $0x138] sm:$0xff]  ;;  %v588_v51 = vld [vmem:[#allocation8 + $0x170] sm:$0xff]  ;;  %v547_v11 = vld [vmem:[#allocation8 + $0x28] sm:$0xff] }
  0x57   :  { %7446 = vst [vmem:[#allocation27_spill] sm:$0xff] %v6184_v36  ;;  %v585_v50 = vld [vmem:[#allocation8 + $0x158] sm:$0xff]  ;;  %v6205_v56 = vpack.c.bf16 %v581_v46, %v578_v42  ;;  %v537_v57 = vld [vmem:[%s7377_s4 + $0x160] sm:$0xff] }
  0x58   :  { %v6219_v6 = vpack.c.bf16 %v540_v59, %v537_v57  ;;  %v544_v10 = vld [vmem:[#allocation8 + $0x10] sm:$0xff]  ;;  %v553_v19 = vld [vmem:[#allocation8 + $0x58] sm:$0xff]  ;;  %v559_v27 = vld [vmem:[#allocation8 + $0x88] sm:$0xff] }
  0x59   :  { %4515 = vmatpush1.bf16.msra.mxu1 %v6030_v54  ;;  %v556_v24 = vld [vmem:[#allocation8 + $0x70] sm:$0xff]  ;;  %v571_v46 = vld [vmem:[#allocation8 + $0xe8] sm:$0xff]  ;;  %v577_v57 = vld [vmem:[#allocation8 + $0x118] sm:$0xff] }
  0x5a   :  { %4517 = vmatprep.subr.bf16.mxu1 %v6033_v55  ;;  %1503 = vperm.xlu0 %5434, %v1501_v63   ;;  %v6214_v63 = vpack.c.bf16 %v588_v51, %v585_v50  ;;  %7448 = vst [vmem:[#allocation29_spill] sm:$0xff] %v6219_v6  ;;  %v568_v42 = vld [vmem:[#allocation8 + $0xd0] sm:$0xff]  ;;  %v574_v51 = vld [vmem:[#allocation8 + $0x100] sm:$0xff] }
  0x5b   :  { %3579 = vmatmul.mubr.msk.bf16.gmra.mrb[12].mxu0 %vm212_vm0, %v6044_v58  ;;  %3583 = vmatmul.mubr.msk.bf16.gmra.mrb[12].mxu1 %vm212_vm0, %v6044_v58  ;;  %v6258_v50 = vpack.c.bf16 %v571_v46, %v568_v42  ;;  %v6264_v59 = vpack.c.bf16 %v577_v57, %v574_v51  ;;  %v6318_v51 = vld [vmem:[%s7376_s3] sm:$0x3f] }
  0x5c   :  { %403 = vmatprep.mubr.bf16.mxu0 %v5765_v0  ;;  %677 = vmatprep.mubr.f32.mxu1 %v7386_v4 }
  0x5d   :  { %4519 = vmatpush1.bf16.msra.mxu1 %v6053_v61 }
  0x5e   :  { %4521 = vmatprep.subr.bf16.mxu1 %v6056_v62  ;;  %1859 = vperm.xlu0 %5434, %v1857_v13   ;;  %v550_v13 = vld [vmem:[#allocation8 + $0x40] sm:$0xff] }
  0x5f   :  { %v6237_v22 = vpack.c.bf16 %v553_v19, %v550_v13  ;;  %v589_v13 = vld [vmem:[#allocation8 + $0x178] sm:$0xff] }
  0x61   :  { %4523 = vmatpush1.bf16.msra.mxu1 %v6071_v5 }
  0x62   :  { %4549 = vmatprep.subr.bf16.mxu1 %v6080_v8 }
  0x63   :  { %3584 = vmatmul.mubr.msk.bf16.vlgmr.msra.gmra.mrb[16].mxu0 %vm212_vm0, %v5889_v9  ;;  %v507_v9 = vld [vmem:[%s7377_s4 + $0x70] sm:$0xff] }
  0x64   :  { %678 = vmatmul.mubr.f32.vlgmr.msra.gmra.mrb[16].mxu1 %v7386_v4  ;;  %4526 = vmatpush3.bf16.msra.mxu0 %v6082_v14  ;;  %v6126_v43 = vpack.c.bf16 %v510_v32, %v507_v9  ;;  %v579_v9 = vld [vmem:[#allocation8 + $0x128] sm:$0xff]  ;;  %v582_v32 = vld [vmem:[#allocation8 + $0x140] sm:$0xff] }
  0x65   :  { %4551 = vmatpush1.bf16.msra.mxu1 %v6085_v15  ;;  %4527 = vmatprep.subr.bf16.mxu0 %v7388_v44  ;;  %v6198_v39 = vpack.c.bf16 %v582_v32, %v579_v9  ;;  %v6246_v9 = vpack.c.bf16 %v559_v27, %v556_v24  ;;  %v562_v32 = vld [vmem:[#allocation8 + $0xa0] sm:$0xff]  ;;  %v102_v24 = vlaneseq  ;;  %v1145_v27 = vsel %vm1144_vm6, 1, %v5765_v0 }
  0x66   :  { %4553 = vmatprep.subr.bf16.mxu1 %v6094_v20  ;;  %413 = vmatprep.mubr.bf16.mxu0 %v5765_v0 }
  0x67   :  { %869 = vmatprep.mubr.f32.mxu1 %v7386_v4  ;;  %1147 = vperm.xlu1 %5435, %v1145_v27  }
  0x68   :  { %4529 = vmatpush3.bf16.msra.mxu0 %v6100_v28 }
  0x69   :  { %4555 = vmatpush1.bf16.msra.mxu1 %v6109_v31  ;;  %4530 = vmatprep.subr.bf16.mxu0 %v7388_v44 }
  0x6a   :  { %4557 = vmatprep.subr.bf16.mxu1 %v6121_v34 }
  0x6b   :  { %3585 = vmatmul.mubr.msk.bf16.gmra.mrb[20].mxu0 %vm212_vm0, %v5939_v26  ;;  %v519_v26 = vld [vmem:[%s7377_s4 + $0xd0] sm:$0xff] }
  0x6c   :  { %4532 = vmatpush3.bf16.msra.mxu0 %v6126_v43  ;;  %423 = vmatprep.mubr.bf16.mxu0 %v5765_v0  ;;  %v6165_v12 = vpack.c.bf16 %v522_v2, %v519_v26  ;;  %v584_v26 = vld [vmem:[#allocation8 + $0x150] sm:$0xff]  ;;  %v587_v2 = vld [vmem:[#allocation8 + $0x168] sm:$0xff] }
  0x6d   :  { %4559 = vmatpush1.bf16.msra.mxu1 %v6131_v47  ;;  %4533 = vmatprep.subr.bf16.mxu0 %v7388_v44  ;;  %v6225_v7 = vpack.c.bf16 %v587_v2, %v584_v26  ;;  %v580_v26 = vld [vmem:[#allocation8 + $0x130] sm:$0xff]  ;;  %v583_v2 = vld [vmem:[#allocation8 + $0x148] sm:$0xff] }
  0x6e   :  { %4561 = vmatprep.subr.bf16.mxu1 %v6141_v52  ;;  %7445 = vst [vmem:[#allocation26_spill] sm:$0xff] %v6165_v12 }
  0x70   :  { %4535 = vmatpush3.bf16.msra.mxu0 %v6146_v60 }
  0x71   :  { %4563 = vmatpush1.bf16.msra.mxu1 %v6152_v1  ;;  %4536 = vmatprep.subr.bf16.mxu0 %v7388_v44 }
  0x72   :  { %4565 = vmatprep.subr.bf16.mxu1 %v6162_v3 }
  0x73   :  { %3586 = vmatmul.mubr.msk.bf16.gmra.mrb[24].mxu0 %vm212_vm0, %v5997_v45  ;;  %v534_v45 = vld [vmem:[%s7377_s4 + $0x148] sm:$0xff] }
  0x74   :  { %4538 = vmatpush3.bf16.msra.mxu0 %v6165_v12  ;;  %433 = vmatprep.mubr.bf16.mxu0 %v5765_v0  ;;  %v6201_v53 = vpack.c.bf16 %v534_v45, %v531_v38  ;;  %v565_v38 = vld [vmem:[#allocation8 + $0xb8] sm:$0xff] }
  0x75   :  { %4567 = vmatpush1.bf16.msra.mxu1 %v6170_v18  ;;  %4539 = vmatprep.subr.bf16.mxu0 %v7388_v44  ;;  %v6252_v45 = vpack.c.bf16 %v565_v38, %v562_v32  ;;  %v6307_v32 = vshrl.u32 %v102_v24, 7  ;;  %v1323_v38 = vsel %vm1322_vm7, 1, %v5765_v0 }
  0x76   :  { %4569 = vmatprep.subr.bf16.mxu1 %v6179_v23  ;;  %7447 = vst [vmem:[#allocation28_spill] sm:$0xff] %v6201_v53  ;;  %1325 = vperm.xlu1 %5435, %v1323_v38  }
  0x77   :  { %v116_v42 = vsub.s32 3, %v6307_v32  ;;  %v6313_v46 = vsub.s32 2, %v6307_v32  ;;  %v6321_v57 = vsub.s32 0, %v6307_v32 }
  0x78   :  { %4541 = vmatpush3.bf16.msra.mxu0 %v6184_v36 }
  0x79   :  { %4571 = vmatpush1.bf16.msra.mxu1 %v6189_v37  ;;  %4542 = vmatprep.subr.bf16.mxu0 %v7388_v44  ;;  %v6341_v38 = vrot.slane %v6318_v51, %v6321_v57 }
  0x7a   :  { %4573 = vmatprep.subr.bf16.mxu1 %v6198_v39 }
  0x7b   :  { %3587 = vmatmul.mubr.msk.bf16.gmra.mrb[28].mxu0 %vm212_vm0, %v6044_v58  ;;  %v6229_v58 = vpack.c.bf16 %v547_v11, %v544_v10  ;;  %v6270_v10 = vpack.c.bf16 %v583_v2, %v580_v26  ;;  %v586_v11 = vld [vmem:[#allocation8 + $0x160] sm:$0xff]  ;;  %v1679_v26 = vsel %vm1678_vm8, 1, %v5765_v0  ;;  %v6325_v2 = vsub.s32 1, %v6307_v32 }
  0x7c   :  { %4544 = vmatpush3.bf16.msra.mxu0 %v6201_v53  ;;  %3964 = vmatprep.mubr.msk.f32.mxu0 %vm5768_vm5, %v7386_v4  ;;  %v6276_v19 = vpack.c.bf16 %v589_v13, %v586_v11  ;;  %v6328_v11 = vrot.slane %v6318_v51, %v116_v42  ;;  %v6333_v13 = vrot.slane %v6318_v51, %v6313_v46  ;;  %v2035_v42 = vsel %vm2034_vm9, 1, %v5765_v0 }
  0x7d   :  { %4575 = vmatpush1.bf16.msra.mxu1 %v6205_v56  ;;  %4545 = vmatprep.subr.bf16.mxu0 %v7388_v44  ;;  %v6348_v30 = vrot.slane %v6318_v51, %v6325_v2 }
  0x7e   :  { %4577 = vmatprep.subr.bf16.mxu1 %v6214_v63  ;;  %1681 = vperm.xlu1 %5435, %v1679_v26  }
  0x80   :  { %4547 = vmatpush3.bf16.msra.mxu0 %v6219_v6 }
  0x81   :  { %4579 = vmatpush1.bf16.msra.mxu1 %v6225_v7  ;;  %4580 = vmatprep.subr.bf16.mxu0 %v7388_v44 }
  0x82   :  { %4605 = vmatprep.subr.bf16.mxu1 %v5903_v16  ;;  %2037 = vperm.xlu1 %5435, %v2035_v42  }
  0x83   :  { %3965 = vmatmul.mubr.f32.vlgmr.msra.gmra.mrb[32].mxu0 %v7386_v4 }
  0x84   :  { %870 = vmatmul.mubr.f32.vlgmr.msra.gmra.mrb[18].mxu1 %v7386_v4  ;;  %4582 = vmatpush3.bf16.msra.mxu0 %v6229_v58 }
  0x85   :  { %4583 = vmatprep.subr.bf16.mxu0 %v7388_v44  ;;  %3999 = vmatprep.mubr.msk.f32.mxu0 %vm5768_vm5, %v7386_v4 }
  0x86   :  { %4607 = vmatpush1.bf16.msra.mxu1 %v5905_v17  ;;  %1046 = vmatprep.mubr.f32.mxu1 %v7386_v4 }
  0x87   :  { %4609 = vmatprep.subr.bf16.mxu1 %v5916_v21 }
  0x88   :  { %4585 = vmatpush3.bf16.msra.mxu0 %v6237_v22 }
  0x89   :  { %4586 = vmatprep.subr.bf16.mxu0 %v7388_v44 }
  0x8a   :  { %4611 = vmatpush1.bf16.msra.mxu1 %v5933_v25 }
  0x8b   :  { %4613 = vmatprep.subr.bf16.mxu1 %v5949_v29 }
  0x8c   :  { %4588 = vmatpush3.bf16.msra.mxu0 %v6246_v9 }
  0x8d   :  { %4589 = vmatprep.subr.bf16.mxu0 %v7388_v44 }
  0x8e   :  { %4615 = vmatpush1.bf16.msra.mxu1 %v5958_v33 }
  0x8f   :  { %4617 = vmatprep.subr.bf16.mxu1 %v5961_v35 }
  0x90   :  { %4591 = vmatpush3.bf16.msra.mxu0 %v6252_v45 }
  0x91   :  { %4592 = vmatprep.subr.bf16.mxu0 %v7388_v44 }
  0x92   :  { %4619 = vmatpush1.bf16.msra.mxu1 %v5982_v40 }
  0x93   :  { %4621 = vmatprep.subr.bf16.mxu1 %v5985_v41 }
  0x94   :  { %4594 = vmatpush3.bf16.msra.mxu0 %v6258_v50 }
  0x95   :  { %4595 = vmatprep.subr.bf16.mxu0 %v7388_v44 }
  0x96   :  { %4623 = vmatpush1.bf16.msra.mxu1 %v6006_v48 }
  0x97   :  { %4625 = vmatprep.subr.bf16.mxu1 %v6009_v49 }
  0x98   :  { %4597 = vmatpush3.bf16.msra.mxu0 %v6264_v59 }
  0x99   :  { %4598 = vmatprep.subr.bf16.mxu0 %v7388_v44 }
  0x9a   :  { %4627 = vmatpush1.bf16.msra.mxu1 %v6030_v54 }
  0x9b   :  { %4629 = vmatprep.subr.bf16.mxu1 %v6033_v55 }
  0x9c   :  { %4600 = vmatpush3.bf16.msra.mxu0 %v6270_v10 }
  0x9d   :  { %4601 = vmatprep.subr.bf16.mxu0 %v7388_v44 }
  0x9e   :  { %4631 = vmatpush1.bf16.msra.mxu1 %v6053_v61 }
  0x9f   :  { %4633 = vmatprep.subr.bf16.mxu1 %v6056_v62 }
  0xa0   :  { %4603 = vmatpush3.bf16.msra.mxu0 %v6276_v19 }
  0xa1   :  { %4636 = vmatprep.subr.bf16.mxu0 %v7388_v44 }
  0xa2   :  { %4635 = vmatpush1.bf16.msra.mxu1 %v6071_v5 }
  0xa3   :  { %4000 = vmatmul.mubr.f32.vlgmr.msra.gmra.mrb[34].mxu0 %v7386_v4  ;;  %4661 = vmatprep.subr.bf16.mxu1 %v6080_v8 }
  0xa4   :  { %4638 = vmatpush3.bf16.msra.mxu0 %v6082_v14  ;;  %4034 = vmatprep.mubr.msk.f32.mxu0 %vm5768_vm5, %v7386_v4 }
  0xa5   :  { %4639 = vmatprep.subr.bf16.mxu0 %v7388_v44 }
  0xa8   :  { %4641 = vmatpush3.bf16.msra.mxu0 %v6100_v28 }
  0xa9   :  { %4642 = vmatprep.subr.bf16.mxu0 %v7388_v44 }
  0xac   :  { %4644 = vmatpush3.bf16.msra.mxu0 %v6126_v43 }
  0xad   :  { %4645 = vmatprep.subr.bf16.mxu0 %v7388_v44 }
  0xb0   :  { %4647 = vmatpush3.bf16.msra.mxu0 %v6146_v60 }
  0xb1   :  { %4648 = vmatprep.subr.bf16.mxu0 %v7388_v44 }
  0xb4   :  { %4650 = vmatpush3.bf16.msra.mxu0 %v6165_v12 }
  0xb5   :  { %4651 = vmatprep.subr.bf16.mxu0 %v7388_v44 }
  0xb8   :  { %4653 = vmatpush3.bf16.msra.mxu0 %v6184_v36 }
  0xb9   :  { %4654 = vmatprep.subr.bf16.mxu0 %v7388_v44 }
  0xbc   :  { %4656 = vmatpush3.bf16.msra.mxu0 %v6201_v53 }
  0xbd   :  { %4657 = vmatprep.subr.bf16.mxu0 %v7388_v44 }
  0xc0   :  { %4659 = vmatpush3.bf16.msra.mxu0 %v6219_v6 }
  0xc1   :  { %4692 = vmatprep.subr.bf16.mxu0 %v7388_v44 }
 0x116   :  { %v6335_v24 = vpop.f32.mrb[0].mxu0  ;;  %v6337_v27 = vpop.f32.mrb[0].mxu1 }
 0x117   :  { %v6343_v4 = vpop.f32.mrb[1].mxu0  ;;  %v334_v44 = vpop.f32.mrb[1].mxu1 }
 0x118   :  { %v263_v8 = vpop.f32.mrb[2].mxu0  ;;  %v6351_v6 = vadd.f32 %v334_v44, %v6328_v11  ;;  %v336_v5 = vpop.f32.mrb[2].mxu1 }
 0x119   :  { %v6354_v26 = vadd.f32 %v263_v8, %v6341_v38  ;;  %v265_v62 = vpop.f32.mrb[3].mxu0  ;;  %v6357_v53 = vadd.f32 %v336_v5, %v6333_v13  ;;  %v338_v61 = vpop.f32.mrb[3].mxu1 }
 0x11a   :  { %7449 = vst [vmem:[#allocation30_spill] sm:$0xff] %v6351_v6  ;;  %v6360_v55 = vadd.f32 %v265_v62, %v6348_v30  ;;  %v6363_v0 = vadd.f32 %v338_v61, %v6328_v11 }
 0x11b   :  { %7450 = vst [vmem:[#allocation31_spill] sm:$0xff] %v6354_v26  ;;  %7451 = vst [vmem:[#allocation32_spill] sm:$0xff] %v6357_v53 }
 0x11c   :  { %7452 = vst [vmem:[#allocation33_spill] sm:$0xff] %v6360_v55  ;;  %7453 = vst [vmem:[#allocation34_spill] sm:$0xff] %v6363_v0  ;;  %v541_v55 = vld [vmem:[#allocation6] sm:$0x7] }
 0x11e   :  { %v269_v36 = vpop.f32.mrb[4].mxu0  ;;  %v342_v54 = vpop.f32.mrb[4].mxu1 }
 0x11f   :  { %v6366_v44 = vadd.f32 %v269_v36, %v6341_v38  ;;  %v271_v6 = vpop.f32.mrb[5].mxu0  ;;  %v6369_v8 = vadd.f32 %v342_v54, %v6333_v13  ;;  %v344_v26 = vpop.f32.mrb[5].mxu1 }
 0x120   :  { %v6372_v5 = vadd.f32 %v271_v6, %v6348_v30  ;;  %v273_v53 = vpop.f32.mrb[6].mxu0  ;;  %v6375_v62 = vadd.f32 %v344_v26, %v6328_v11  ;;  %v346_v61 = vpop.f32.mrb[6].mxu1 }
 0x121   :  { %7454 = vst [vmem:[#allocation35_spill] sm:$0xff] %v6366_v44  ;;  %7455 = vst [vmem:[#allocation36_spill] sm:$0xff] %v6369_v8  ;;  %v6378_v42 = vadd.f32 %v273_v53, %v6341_v38  ;;  %v275_v0 = vpop.f32.mrb[7].mxu0  ;;  %v6381_v36 = vadd.f32 %v346_v61, %v6333_v13  ;;  %v348_v44 = vpop.f32.mrb[7].mxu1 }
 0x122   :  { %7456 = vst [vmem:[#allocation37_spill] sm:$0xff] %v6372_v5  ;;  %7457 = vst [vmem:[#allocation38_spill] sm:$0xff] %v6375_v62  ;;  %v6384_v54 = vadd.f32 %v275_v0, %v6348_v30  ;;  %v6387_v8 = vadd.f32 %v348_v44, %v6328_v11 }
 0x123   :  { %7458 = vst [vmem:[#allocation39_spill] sm:$0xff] %v6378_v42  ;;  %7459 = vst [vmem:[#allocation40_spill] sm:$0xff] %v6381_v36 }
 0x124   :  { %7460 = vst [vmem:[#allocation41_spill] sm:$0xff] %v6384_v54  ;;  %7461 = vst [vmem:[#allocation42_spill] sm:$0xff] %v6387_v8 }
 0x126   :  { %v279_v6 = vpop.f32.mrb[8].mxu0  ;;  %v352_v5 = vpop.f32.mrb[8].mxu1 }
 0x127   :  { %v6390_v26 = vadd.f32 %v279_v6, %v6341_v38  ;;  %v281_v62 = vpop.f32.mrb[9].mxu0  ;;  %v6393_v53 = vadd.f32 %v352_v5, %v6333_v13  ;;  %v354_v42 = vpop.f32.mrb[9].mxu1 }
 0x128   :  { %v6396_v61 = vadd.f32 %v281_v62, %v6348_v30  ;;  %v283_v36 = vpop.f32.mrb[10].mxu0  ;;  %v6399_v0 = vadd.f32 %v354_v42, %v6328_v11  ;;  %v356_v54 = vpop.f32.mrb[10].mxu1 }
 0x129   :  { %7462 = vst [vmem:[#allocation43_spill] sm:$0xff] %v6390_v26  ;;  %7463 = vst [vmem:[#allocation44_spill] sm:$0xff] %v6393_v53  ;;  %v6402_v44 = vadd.f32 %v283_v36, %v6341_v38  ;;  %v285_v8 = vpop.f32.mrb[11].mxu0  ;;  %v6405_v6 = vadd.f32 %v356_v54, %v6333_v13  ;;  %v358_v26 = vpop.f32.mrb[11].mxu1  ;;  %v120_v54 = vsub.s32 4, %v6307_v32 }
 0x12a   :  { %7464 = vst [vmem:[#allocation45_spill] sm:$0xff] %v6396_v61  ;;  %7465 = vst [vmem:[#allocation46_spill] sm:$0xff] %v6399_v0  ;;  %v6408_v5 = vadd.f32 %v285_v8, %v6348_v30  ;;  %v6411_v53 = vadd.f32 %v358_v26, %v6328_v11 }
 0x12b   :  { %7466 = vst [vmem:[#allocation47_spill] sm:$0xff] %v6402_v44  ;;  %7467 = vst [vmem:[#allocation48_spill] sm:$0xff] %v6405_v6 }
 0x12c   :  { %7468 = vst [vmem:[#allocation49_spill] sm:$0xff] %v6408_v5  ;;  %7469 = vst [vmem:[#allocation50_spill] sm:$0xff] %v6411_v53  ;;  %v124_v53 = vsub.s32 5, %v6307_v32 }
 0x12e   :  { %v289_v62 = vpop.f32.mrb[12].mxu0  ;;  %v362_v61 = vpop.f32.mrb[12].mxu1  ;;  %v6445_v32 = vrot.slane %v6318_v51, %v124_v53  ;;  %v262_v53 = vadd.f32 %v6343_v4, %v6348_v30 }
 0x12f   :  { %v6414_v42 = vadd.f32 %v289_v62, %v6341_v38  ;;  %v291_v0 = vpop.f32.mrb[13].mxu0  ;;  %v6417_v36 = vadd.f32 %v362_v61, %v6333_v13  ;;  %v364_v44 = vpop.f32.mrb[13].mxu1 }
 0x130   :  { %v6421_v6 = vadd.f32 %v291_v0, %v6348_v30  ;;  %v293_v8 = vpop.f32.mrb[14].mxu0  ;;  %v6424_v5 = vadd.f32 %v364_v44, %v6328_v11  ;;  %v366_v26 = vpop.f32.mrb[14].mxu1  ;;  %v6442_v44 = vrot.slane %v541_v55, %v6321_v57 }
 0x131   :  { %7470 = vst [vmem:[#allocation51_spill] sm:$0xff] %v6414_v42  ;;  %7471 = vst [vmem:[#allocation52_spill] sm:$0xff] %v6417_v36  ;;  %v6428_v62 = vadd.f32 %v293_v8, %v6341_v38  ;;  %v295_v42 = vpop.f32.mrb[15].mxu0  ;;  %v6431_v61 = vadd.f32 %v366_v26, %v6333_v13  ;;  %v6433_v36 = vpop.f32.mrb[15].mxu1  ;;  %v6448_v8 = vrot.slane %v541_v55, %v6325_v2 }
 0x132   :  { %7472 = vst [vmem:[#allocation53_spill] sm:$0xff] %v6421_v6  ;;  %7473 = vst [vmem:[#allocation54_spill] sm:$0xff] %v6424_v5  ;;  %v6436_v0 = vadd.f32 %v295_v42, %v6348_v30  ;;  %v6439_v6 = vrot.slane %v6318_v51, %v120_v54  ;;  %v260_v42 = vadd.f32 %v6335_v24, %v6341_v38 }
 0x133   :  { %7474 = vst [vmem:[#allocation55_spill] sm:$0xff] %v6428_v62  ;;  %7475 = vst [vmem:[#allocation56_spill] sm:$0xff] %v6431_v61 }
 0x134   :  { %7476 = vst [vmem:[#allocation57_spill] sm:$0xff] %v6436_v0  ;;  %7477 = vst [vmem:[#allocation58_spill] sm:$0xff] %v6442_v44 }
 0x135   :  { %7478 = vst [vmem:[#allocation59_spill] sm:$0xff] %v6448_v8 }
 0x136   :  { %v405_v26 = vpop.f32.mrb[16].mxu0 }
 0x137   :  { %v6451_v61 = vadd.f32 %v405_v26, %v6439_v6  ;;  %v679_v62 = vpop.f32.mrb[16].mxu1  ;;  %v407_v5 = vpop.f32.mrb[17].mxu0 }
 0x138   :  { %v680_v54 = vadd.f32 %v679_v62, %v6442_v44  ;;  %v6457_v0 = vadd.f32 %v407_v5, %v6445_v32  ;;  %v681_v49 = vpop.f32.mrb[17].mxu1  ;;  %v409_v51 = vpop.f32.mrb[18].mxu0 }
 0x139   :  { %7479 = vst [vmem:[#allocation60_spill] sm:$0xff] %v6451_v61  ;;  %v682_v12 = vadd.f32 %v681_v49, %v6448_v8  ;;  %v6463_v26 = vadd.f32 %v409_v51, %v6439_v6  ;;  %v411_v61 = vpop.f32.mrb[19].mxu0 }
 0x13a   :  { %7480 = vst [vmem:[#allocation61_spill] sm:$0xff] %v6457_v0  ;;  %v754_v48 = vadd.f32 %v680_v54, %v260_v42  ;;  %v6466_v41 = vadd.f32 %v411_v61, %v6445_v32 }
 0x13b   :  { %7481 = vst [vmem:[#allocation62_spill] sm:$0xff] %v6463_v26  ;;  %v761_v24 = vadd.f32 %v682_v12, %v262_v53 }
 0x13c   :  { %7482 = vst [vmem:[#allocation63_spill] sm:$0xff] %v6466_v41  ;;  %v3588_v38 = vmul.f32 -1.442695, %v754_v48 }
 0x13d   :  { %v3589_v61 = vmul.f32 -1.442695, %v761_v24 }
 0x13e   :  { %5458 = vpow2.f32 %v3588_v38  ;;  %v415_v5 = vpop.f32.mrb[20].mxu0 }
 0x13f   :  { %v6469_v62 = vadd.f32 %v415_v5, %v6439_v6  ;;  %v417_v0 = vpop.f32.mrb[21].mxu0  ;;  %5460 = vpow2.f32 %v3589_v61 }
 0x140   :  { %v6472_v4 = vadd.f32 %v417_v0, %v6445_v32  ;;  %v419_v49 = vpop.f32.mrb[22].mxu0 }
 0x141   :  { %7483 = vst [vmem:[#allocation64_spill] sm:$0xff] %v6469_v62  ;;  %v6475_v30 = vadd.f32 %v419_v49, %v6439_v6  ;;  %v421_v51 = vpop.f32.mrb[23].mxu0 }
 0x142   :  { %7484 = vst [vmem:[#allocation65_spill] sm:$0xff] %v6472_v4  ;;  %v6478_v42 = vadd.f32 %v421_v51, %v6445_v32 }
 0x143   :  { %7485 = vst [vmem:[#allocation66_spill] sm:$0xff] %v6475_v30 }
 0x144   :  { %7486 = vst [vmem:[#allocation67_spill] sm:$0xff] %v6478_v42 }
 0x146   :  { %v425_v12 = vpop.f32.mrb[24].mxu0 }
 0x147   :  { %v6481_v48 = vadd.f32 %v425_v12, %v6439_v6  ;;  %v427_v54 = vpop.f32.mrb[25].mxu0 }
 0x148   :  { %v5459_v53 = vpop.eup %5458  ;;  %v6484_v38 = vadd.f32 %v427_v54, %v6445_v32  ;;  %v429_v0 = vpop.f32.mrb[26].mxu0 }
 0x149   :  { %7487 = vst [vmem:[#allocation68_spill] sm:$0xff] %v6481_v48  ;;  %v6487_v5 = vadd.f32 %v429_v0, %v6439_v6  ;;  %v431_v49 = vpop.f32.mrb[27].mxu0  ;;  %v758_v41 = vadd.f32 1.0, %v5459_v53  ;;  %v590_v0 = vld [vmem:[%s7380_s7] sm:$0x7]  ;;  %v5461_v53 = vpop.eup %5460 }
 0x14a   :  { %7488 = vst [vmem:[#allocation69_spill] sm:$0xff] %v6484_v38  ;;  %v6490_v51 = vadd.f32 %v431_v49, %v6445_v32  ;;  %v6504_v49 = vrot.slane %v541_v55, %v6313_v46  ;;  %v6510_v62 = vrot.slane %v590_v0, %v6325_v2  ;;  %v369_v55 = vadd.f32 %v6433_v36, %v6328_v11  ;;  %v6520_v36 = vpop.permute.xlu0 %778 }
 0x14b   :  { %7489 = vst [vmem:[#allocation70_spill] sm:$0xff] %v6487_v5  ;;  %5462 = vrcp.f32 %v758_v41  ;;  %v6507_v41 = vrot.slane %v590_v0, %v6321_v57  ;;  %7494 = vst [vmem:[#allocation75_spill] sm:$0xff] %v6520_v36  ;;  %vm780_vm10 = vcmp.eq.s32.totalorder %v6520_v36, 1 }
 0x14c   :  { %7490 = vst [vmem:[#allocation71_spill] sm:$0xff] %v6490_v51  ;;  %7493 = vst [vmem:[#allocation74_spill] sm:$0xff] %v6504_v49  ;;  %v333_v51 = vadd.f32 %v6337_v27, %v6333_v13 }
 0x14e   :  { %v435_v24 = vpop.f32.mrb[28].mxu0 }
 0x14f   :  { %v6493_v12 = vadd.f32 %v435_v24, %v6439_v6  ;;  %v437_v26 = vpop.f32.mrb[29].mxu0  ;;  %v765_v24 = vadd.f32 1.0, %v5461_v53 }
 0x150   :  { %v6496_v61 = vadd.f32 %v437_v26, %v6445_v32  ;;  %v439_v54 = vpop.f32.mrb[30].mxu0 }
 0x151   :  { %7491 = vst [vmem:[#allocation72_spill] sm:$0xff] %v6493_v12  ;;  %v6498_v4 = vpop.f32.mrb[31].mxu0  ;;  %5464 = vrcp.f32 %v765_v24  ;;  %v440_v53 = vadd.f32 %v439_v54, %v6439_v6 }
 0x152   :  { %7492 = vst [vmem:[#allocation73_spill] sm:$0xff] %v6496_v61 }
 0x155   :  { %v5463_v48 = vpop.eup %5462 }
 0x156   :  { %v750_v26 = vpop.f32.mrb[32].mxu0 }
 0x157   :  { %v751_v42 = vadd.f32 %v750_v26, %v6504_v49  ;;  %v871_v30 = vpop.f32.mrb[18].mxu1  ;;  %v3966_v38 = vpop.f32.mrb[33].mxu0 }
 0x158   :  { %v872_v5 = vadd.f32 %v871_v30, %v6507_v41  ;;  %v873_v57 = vpop.f32.mrb[19].mxu1 }
 0x159   :  { %v768_v2 = vmul.f32 %v5463_v48, %v751_v42  ;;  %v874_v61 = vadd.f32 %v873_v57, %v6510_v62  ;;  %v442_v57 = vadd.f32 %v6498_v4, %v6445_v32 }
 0x15a   :  { %v946_v12 = vadd.f32 %v872_v5, %v369_v55 }
 0x15b   :  { %v769_v26 = vadd.f32 %v768_v2, %v333_v51  ;;  %v953_v49 = vadd.f32 %v874_v61, %v440_v53  ;;  %v5465_v8 = vpop.eup %5464  ;;  %v6544_v51 = vrot.slane %v590_v0, %v6313_v46 }
 0x15c   :  { %v3590_v38 = vmul.f32 -1.442695, %v946_v12  ;;  %v771_v27 = vsub.f32 1.0, %v5465_v8  ;;  %v773_v24 = vmul.f32 0.0, %v5465_v8  ;;  %v7496_v8 = vmov 0.0  }
 0x15d   :  { %5466 = vtanh.f32 %v769_v26  ;;  %v3591_v13 = vmul.f32 -1.442695, %v953_v49 }
 0x15e   :  { %5468 = vpow2.f32 %v3590_v38  ;;  %v6571_v38 = vpop.permute.xlu0 %970 }
 0x15f   :  { %5470 = vpow2.f32 %v3591_v13  ;;  %7497 = vst [vmem:[#allocation76_spill] sm:$0xff] %v6571_v38  ;;  %vm972_vm11 = vcmp.eq.s32.totalorder %v6571_v38, 1  ;;  %v7513_v38 = vld [vmem:[#allocation31_spill] sm:$0xff] }
 0x167   :  { %v5467_v44 = vpop.eup %5466 }
 0x168   :  { %v5469_v11 = vpop.eup %5468  ;;  %v772_v30 = vmul.f32 %v5467_v44, %v771_v27  ;;  %v7495_v44 = vmov 0.0|0.0  }
 0x169   :  { %v950_v6 = vadd.f32 1.0, %v5469_v11  ;;  %v5471_v5 = vpop.eup %5470  ;;  %v7498_v11 = vld [vmem:[#allocation17_spill] sm:$0xff] }
 0x16a   :  { %v774_v42 = vadd.f32 %v773_v24, %v772_v30  ;;  %v957_v12 = vadd.f32 1.0, %v5471_v5  ;;  %v7499_v30 = vld [vmem:[#allocation18_spill] sm:$0xff]  ;;  %v7503_v5 = vld [vmem:[#allocation27_spill] sm:$0xff] }
 0x16b   :  { %5472 = vrcp.f32 %v950_v6  ;;  %v7500_v24 = vld [vmem:[#allocation26_spill] sm:$0xff]  ;;  %v7501_v6 = vld [vmem:[#allocation19_spill] sm:$0xff] }
 0x16c   :  { %v6525_v48 = vsel %vm780_vm10, %v774_v42, 0.0  ;;  %3592 = vmatmul.mubr.msk.f32.vlgmr.msra.gmra.mrb[20].mxu1 %vm780_vm10, %v774_v42  ;;  %4035 = vmatmul.mubr.msk.f32.vlgmr.msra.gmra.mrb[36].mxu0 %vm780_vm10, %v774_v42  ;;  %5474 = vrcp.f32 %v957_v12  ;;  %v7502_v42 = vld [vmem:[#allocation20_spill] sm:$0xff]  ;;  %v7504_v12 = vld [vmem:[#allocation21_spill] sm:$0xff] }
 0x16d   :  { %782 = vst [vmem:[#allocation9] sm:$0xff] %v6525_v48  ;;  %4663 = vmatpush1.bf16.msra.mxu1 %v6085_v15  ;;  %4694 = vmatpush3.bf16.msra.mxu0 %v6229_v58 }
 0x16e   :  { %4665 = vmatprep.subr.bf16.mxu1 %v6094_v20  ;;  %4695 = vmatprep.subr.bf16.mxu0 %v7495_v44 }
 0x16f   :  { %1224 = vmatprep.mubr.f32.mxu1 %v7496_v8  ;;  %4069 = vmatprep.mubr.msk.f32.mxu0 %vm5768_vm5, %v7496_v8 }
 0x171   :  { %4667 = vmatpush1.bf16.msra.mxu1 %v6109_v31  ;;  %4697 = vmatpush3.bf16.msra.mxu0 %v6237_v22 }
 0x172   :  { %4669 = vmatprep.subr.bf16.mxu1 %v6121_v34  ;;  %4698 = vmatprep.subr.bf16.mxu0 %v7495_v44 }
 0x175   :  { %4671 = vmatpush1.bf16.msra.mxu1 %v6131_v47  ;;  %4700 = vmatpush3.bf16.msra.mxu0 %v6246_v9  ;;  %v5473_v55 = vpop.eup %5472 }
 0x176   :  { %v942_v61 = vpop.f32.mrb[34].mxu0  ;;  %4673 = vmatprep.subr.bf16.mxu1 %v6141_v52  ;;  %4701 = vmatprep.subr.bf16.mxu0 %v7495_v44  ;;  %v5475_v32 = vpop.eup %5474 }
 0x177   :  { %v943_v54 = vadd.f32 %v942_v61, %v6544_v51  ;;  %v4001_v49 = vpop.f32.mrb[35].mxu0  ;;  %v963_v4 = vsub.f32 1.0, %v5475_v32  ;;  %v965_v26 = vmul.f32 0.0, %v5475_v32  ;;  %v7505_v61 = vld [vmem:[#allocation22_spill] sm:$0xff] }
 0x178   :  { %v7507_v49 = vld [vmem:[#allocation23_spill] sm:$0xff] }
 0x179   :  { %v960_v46 = vmul.f32 %v5473_v55, %v943_v54  ;;  %4675 = vmatpush1.bf16.msra.mxu1 %v6152_v1  ;;  %4703 = vmatpush3.bf16.msra.mxu0 %v6252_v45  ;;  %v7506_v54 = vld [vmem:[#allocation28_spill] sm:$0xff] }
 0x17a   :  { %4677 = vmatprep.subr.bf16.mxu1 %v6162_v3  ;;  %4704 = vmatprep.subr.bf16.mxu0 %v7495_v44  ;;  %v7508_v55 = vld [vmem:[#allocation24_spill] sm:$0xff] }
 0x17b   :  { %v961_v0 = vadd.f32 %v960_v46, %v442_v57  ;;  %v7509_v57 = vld [vmem:[#allocation29_spill] sm:$0xff] }
 0x17c   :  { %v7510_v46 = vld [vmem:[#allocation25_spill] sm:$0xff] }
 0x17d   :  { %5476 = vtanh.f32 %v961_v0  ;;  %4679 = vmatpush1.bf16.msra.mxu1 %v6170_v18  ;;  %4706 = vmatpush3.bf16.msra.mxu0 %v6258_v50 }
 0x17e   :  { %4681 = vmatprep.subr.bf16.mxu1 %v6179_v23  ;;  %4707 = vmatprep.subr.bf16.mxu0 %v7495_v44 }
 0x181   :  { %4683 = vmatpush1.bf16.msra.mxu1 %v6189_v37  ;;  %4709 = vmatpush3.bf16.msra.mxu0 %v6264_v59 }
 0x182   :  { %4685 = vmatprep.subr.bf16.mxu1 %v6198_v39  ;;  %4710 = vmatprep.subr.bf16.mxu0 %v7495_v44 }
 0x185   :  { %4687 = vmatpush1.bf16.msra.mxu1 %v6205_v56  ;;  %4712 = vmatpush3.bf16.msra.mxu0 %v6270_v10 }
 0x186   :  { %4689 = vmatprep.subr.bf16.mxu1 %v6214_v63  ;;  %4713 = vmatprep.subr.bf16.mxu0 %v7495_v44 }
 0x187   :  { %v5477_v53 = vpop.eup %5476 }
 0x188   :  { %v964_v2 = vmul.f32 %v5477_v53, %v963_v4  ;;  %v7511_v4 = vld [vmem:[#allocation58_spill] sm:$0xff] }
 0x189   :  { %4691 = vmatpush1.bf16.msra.mxu1 %v6225_v7  ;;  %4715 = vmatpush3.bf16.msra.mxu0 %v6276_v19 }
 0x18a   :  { %v966_v13 = vadd.f32 %v965_v26, %v964_v2  ;;  %4717 = vmatprep.subr.bf16.mxu1 %v5903_v16  ;;  %4748 = vmatprep.subr.bf16.mxu0 %v7495_v44 }
 0x18c   :  { %3596 = vmatmul.mubr.msk.f32.vlgmr.msra.gmra.mrb[22].mxu1 %vm972_vm11, %v966_v13  ;;  %4070 = vmatmul.mubr.msk.f32.vlgmr.msra.gmra.mrb[38].mxu0 %vm972_vm11, %v966_v13  ;;  %v6582_v27 = vsel %vm972_vm11, %v966_v13, 0.0  ;;  %v7512_v13 = vld [vmem:[#allocation59_spill] sm:$0xff] }
 0x18d   :  { %4719 = vmatpush1.bf16.msra.mxu1 %v5905_v17  ;;  %4750 = vmatpush3.bf16.msra.mxu0 %v6082_v14  ;;  %975 = vst [vmem:[#allocation10 + $0x38] sm:$0xff] %v6582_v27 }
 0x18e   :  { %4721 = vmatprep.subr.bf16.mxu1 %v5916_v21  ;;  %4751 = vmatprep.subr.bf16.mxu0 %v7495_v44 }
 0x18f   :  { %1402 = vmatprep.mubr.f32.mxu1 %v7496_v8  ;;  %4104 = vmatprep.mubr.msk.f32.mxu0 %vm5768_vm5, %v7496_v8 }
 0x191   :  { %4723 = vmatpush1.bf16.msra.mxu1 %v5933_v25  ;;  %4753 = vmatpush3.bf16.msra.mxu0 %v6100_v28 }
 0x192   :  { %4725 = vmatprep.subr.bf16.mxu1 %v5949_v29  ;;  %4754 = vmatprep.subr.bf16.mxu0 %v7495_v44 }
 0x195   :  { %4727 = vmatpush1.bf16.msra.mxu1 %v5958_v33  ;;  %4756 = vmatpush3.bf16.msra.mxu0 %v6126_v43 }
 0x196   :  { %4729 = vmatprep.subr.bf16.mxu1 %v5961_v35  ;;  %4757 = vmatprep.subr.bf16.mxu0 %v7495_v44 }
 0x199   :  { %4731 = vmatpush1.bf16.msra.mxu1 %v5982_v40  ;;  %4759 = vmatpush3.bf16.msra.mxu0 %v6146_v60 }
 0x19a   :  { %4733 = vmatprep.subr.bf16.mxu1 %v7498_v11  ;;  %4760 = vmatprep.subr.bf16.mxu0 %v7495_v44 }
 0x19d   :  { %4735 = vmatpush1.bf16.msra.mxu1 %v7499_v30  ;;  %4762 = vmatpush3.bf16.msra.mxu0 %v7500_v24 }
 0x19e   :  { %4737 = vmatprep.subr.bf16.mxu1 %v7501_v6  ;;  %4763 = vmatprep.subr.bf16.mxu0 %v7495_v44  ;;  %v7515_v6 = vld [vmem:[#allocation74_spill] sm:$0xff] }
 0x1a1   :  { %4739 = vmatpush1.bf16.msra.mxu1 %v7502_v42  ;;  %4765 = vmatpush3.bf16.msra.mxu0 %v7503_v5 }
 0x1a2   :  { %4741 = vmatprep.subr.bf16.mxu1 %v7504_v12  ;;  %4766 = vmatprep.subr.bf16.mxu0 %v7495_v44 }
 0x1a5   :  { %4743 = vmatpush1.bf16.msra.mxu1 %v7505_v61  ;;  %4768 = vmatpush3.bf16.msra.mxu0 %v7506_v54  ;;  %v7514_v54 = vld [vmem:[#allocation33_spill] sm:$0xff] }
 0x1a6   :  { %4745 = vmatprep.subr.bf16.mxu1 %v7507_v49  ;;  %4769 = vmatprep.subr.bf16.mxu0 %v7495_v44 }
 0x1a9   :  { %4747 = vmatpush1.bf16.msra.mxu1 %v7508_v55  ;;  %4771 = vmatpush3.bf16.msra.mxu0 %v7509_v57 }
 0x1aa   :  { %4773 = vmatprep.subr.bf16.mxu1 %v7510_v46  ;;  %4804 = vmatprep.subr.bf16.mxu0 %v7495_v44 }
 0x23f   :  { %v1048_v0 = vpop.f32.mrb[20].mxu1  ;;  %v1119_v32 = vpop.f32.mrb[36].mxu0 }
 0x240   :  { %v1049_v53 = vadd.f32 %v1048_v0, %v7511_v4  ;;  %v1050_v2 = vpop.f32.mrb[21].mxu1  ;;  %v4036_v26 = vpop.f32.mrb[37].mxu0  ;;  %v1120_v24 = vadd.f32 %v1119_v32, %v7515_v6 }
 0x241   :  { %v1051_v36 = vadd.f32 %v1050_v2, %v7512_v13  ;;  %v7516_v13 = vld [vmem:[#allocation32_spill] sm:$0xff] }
 0x242   :  { %v1123_v49 = vadd.f32 %v1049_v53, %v7513_v38 }
 0x243   :  { %v1130_v61 = vadd.f32 %v1051_v36, %v7514_v54 }
 0x244   :  { %v3594_v12 = vmul.f32 -1.442695, %v1123_v49  ;;  %v7517_v49 = vld [vmem:[#allocation54_spill] sm:$0xff] }
 0x245   :  { %v3595_v55 = vmul.f32 -1.442695, %v1130_v61 }
 0x246   :  { %5478 = vpow2.f32 %v3594_v12 }
 0x247   :  { %5480 = vpow2.f32 %v3595_v55 }
 0x250   :  { %v5479_v57 = vpop.eup %5478 }
 0x251   :  { %v1127_v46 = vadd.f32 1.0, %v5479_v57  ;;  %v5481_v5 = vpop.eup %5480  ;;  %v7518_v57 = vld [vmem:[#allocation72_spill] sm:$0xff] }
 0x252   :  { %v1134_v42 = vadd.f32 1.0, %v5481_v5 }
 0x253   :  { %5482 = vrcp.f32 %v1127_v46 }
 0x254   :  { %5484 = vrcp.f32 %v1134_v42 }
 0x25d   :  { %v5483_v0 = vpop.eup %5482 }
 0x25e   :  { %v1137_v4 = vmul.f32 %v5483_v0, %v1120_v24  ;;  %v5485_v32 = vpop.eup %5484  ;;  %v6630_v0 = vpop.permute.xlu1 %1147 }
 0x25f   :  { %v1226_v26 = vpop.f32.mrb[22].mxu1  ;;  %v1297_v2 = vpop.f32.mrb[38].mxu0  ;;  %v1140_v42 = vsub.f32 1.0, %v5485_v32  ;;  %7519 = vst [vmem:[#allocation31_spill] sm:$0xff] %v6630_v0  ;;  %vm1149_vm12 = vcmp.eq.s32.totalorder %v6630_v0, 1  ;;  %v7534_v0 = vld [vmem:[#allocation59_spill] sm:$0xff] }
 0x260   :  { %v1138_v38 = vadd.f32 %v1137_v4, %v7516_v13  ;;  %v1227_v36 = vadd.f32 %v1226_v26, %v6507_v41  ;;  %v1228_v54 = vpop.f32.mrb[23].mxu1  ;;  %v4071_v12 = vpop.f32.mrb[39].mxu0  ;;  %v1142_v13 = vmul.f32 %v5485_v32, %v6525_v48 }
 0x261   :  { %v1229_v61 = vadd.f32 %v1228_v54, %v6510_v62 }
 0x262   :  { %5486 = vtanh.f32 %v1138_v38  ;;  %v1301_v55 = vadd.f32 %v1227_v36, %v7517_v49  ;;  %v1298_v49 = vadd.f32 %v1297_v2, %v6544_v51 }
 0x263   :  { %v1308_v5 = vadd.f32 %v1229_v61, %v7518_v57 }
 0x264   :  { %v3598_v46 = vmul.f32 -1.442695, %v1301_v55 }
 0x265   :  { %v3599_v24 = vmul.f32 -1.442695, %v1308_v5  ;;  %v7520_v5 = vld [vmem:[#allocation73_spill] sm:$0xff] }
 0x266   :  { %5488 = vpow2.f32 %v3598_v46 }
 0x267   :  { %5490 = vpow2.f32 %v3599_v24 }
 0x26c   :  { %v5487_v53 = vpop.eup %5486 }
 0x26d   :  { %v1141_v4 = vmul.f32 %v5487_v53, %v1140_v42 }
 0x26f   :  { %v1143_v26 = vadd.f32 %v1142_v13, %v1141_v4  ;;  %v6677_v4 = vpop.permute.xlu1 %1325 }
 0x270   :  { %v5489_v38 = vpop.eup %5488  ;;  %7521 = vst [vmem:[#allocation33_spill] sm:$0xff] %v6677_v4  ;;  %vm1327_vm13 = vcmp.eq.s32.totalorder %v6677_v4, 1 }
 0x271   :  { %v1305_v54 = vadd.f32 1.0, %v5489_v38  ;;  %v1151_v36 = vsel %vm1149_vm12, %v1143_v26, 0.0  ;;  %v6639_v12 = vsel %vm1149_vm12, %v1143_v26, %v6525_v48  ;;  %v5491_v48 = vpop.eup %5490 }
 0x272   :  { %1153 = vst [vmem:[#allocation9 + $0x8] sm:$0xff] %v1151_v36  ;;  %1403 = vmatmul.mubr.f32.vlgmr.msra.gmra.mrb[24].mxu1 %v6639_v12  ;;  %4105 = vmatmul.mubr.f32.vlgmr.msra.gmra.mrb[40].mxu0 %v6639_v12  ;;  %v1312_v61 = vadd.f32 1.0, %v5491_v48  ;;  %v7524_v36 = vld [vmem:[#allocation20_spill] sm:$0xff]  ;;  %v7525_v48 = vld [vmem:[#allocation27_spill] sm:$0xff] }
 0x273   :  { %5492 = vrcp.f32 %v1305_v54  ;;  %4775 = vmatpush1.bf16.msra.mxu1 %v6085_v15  ;;  %4806 = vmatpush3.bf16.msra.mxu0 %v6229_v58  ;;  %v7523_v54 = vld [vmem:[#allocation19_spill] sm:$0xff] }
 0x274   :  { %4777 = vmatprep.subr.bf16.mxu1 %v6094_v20  ;;  %4807 = vmatprep.subr.bf16.mxu0 %v7495_v44  ;;  %5494 = vrcp.f32 %v1312_v61  ;;  %v7526_v61 = vld [vmem:[#allocation21_spill] sm:$0xff] }
 0x275   :  { %1580 = vmatprep.mubr.f32.mxu1 %v7496_v8  ;;  %4139 = vmatprep.mubr.msk.f32.mxu0 %vm5768_vm5, %v7496_v8 }
 0x277   :  { %4779 = vmatpush1.bf16.msra.mxu1 %v6109_v31  ;;  %4809 = vmatpush3.bf16.msra.mxu0 %v6237_v22 }
 0x278   :  { %4781 = vmatprep.subr.bf16.mxu1 %v6121_v34  ;;  %4810 = vmatprep.subr.bf16.mxu0 %v7495_v44 }
 0x27b   :  { %4783 = vmatpush1.bf16.msra.mxu1 %v6131_v47  ;;  %4812 = vmatpush3.bf16.msra.mxu0 %v6246_v9 }
 0x27c   :  { %4785 = vmatprep.subr.bf16.mxu1 %v6141_v52  ;;  %4813 = vmatprep.subr.bf16.mxu0 %v7495_v44 }
 0x27d   :  { %v5493_v55 = vpop.eup %5492 }
 0x27e   :  { %v1315_v57 = vmul.f32 %v5493_v55, %v1298_v49  ;;  %v5495_v2 = vpop.eup %5494  ;;  %v7527_v49 = vld [vmem:[#allocation22_spill] sm:$0xff]  ;;  %v7528_v55 = vld [vmem:[#allocation28_spill] sm:$0xff] }
 0x27f   :  { %4787 = vmatpush1.bf16.msra.mxu1 %v6152_v1  ;;  %4815 = vmatpush3.bf16.msra.mxu0 %v6252_v45  ;;  %v1318_v32 = vsub.f32 1.0, %v5495_v2  ;;  %v1320_v53 = vmul.f32 %v5495_v2, %v6582_v27  ;;  %v7532_v2 = vld [vmem:[#allocation25_spill] sm:$0xff] }
 0x280   :  { %v1316_v46 = vadd.f32 %v1315_v57, %v7520_v5  ;;  %4789 = vmatprep.subr.bf16.mxu1 %v6162_v3  ;;  %4816 = vmatprep.subr.bf16.mxu0 %v7495_v44  ;;  %v7529_v57 = vld [vmem:[#allocation23_spill] sm:$0xff]  ;;  %v7530_v5 = vld [vmem:[#allocation24_spill] sm:$0xff] }
 0x282   :  { %5496 = vtanh.f32 %v1316_v46  ;;  %v7531_v46 = vld [vmem:[#allocation29_spill] sm:$0xff] }
 0x283   :  { %4791 = vmatpush1.bf16.msra.mxu1 %v6170_v18  ;;  %4818 = vmatpush3.bf16.msra.mxu0 %v6258_v50 }
 0x284   :  { %4793 = vmatprep.subr.bf16.mxu1 %v6179_v23  ;;  %4819 = vmatprep.subr.bf16.mxu0 %v7495_v44 }
 0x287   :  { %4795 = vmatpush1.bf16.msra.mxu1 %v6189_v37  ;;  %4821 = vmatpush3.bf16.msra.mxu0 %v6264_v59 }
 0x288   :  { %4797 = vmatprep.subr.bf16.mxu1 %v6198_v39  ;;  %4822 = vmatprep.subr.bf16.mxu0 %v7495_v44 }
 0x28b   :  { %4799 = vmatpush1.bf16.msra.mxu1 %v6205_v56  ;;  %4824 = vmatpush3.bf16.msra.mxu0 %v6270_v10 }
 0x28c   :  { %v5497_v24 = vpop.eup %5496  ;;  %4801 = vmatprep.subr.bf16.mxu1 %v6214_v63  ;;  %4825 = vmatprep.subr.bf16.mxu0 %v7495_v44 }
 0x28d   :  { %v1319_v42 = vmul.f32 %v5497_v24, %v1318_v32 }
 0x28f   :  { %v1321_v13 = vadd.f32 %v1320_v53, %v1319_v42  ;;  %4803 = vmatpush1.bf16.msra.mxu1 %v6225_v7  ;;  %4827 = vmatpush3.bf16.msra.mxu0 %v6276_v19  ;;  %v7533_v42 = vld [vmem:[#allocation58_spill] sm:$0xff] }
 0x290   :  { %4829 = vmatprep.subr.bf16.mxu1 %v5903_v16  ;;  %4860 = vmatprep.subr.bf16.mxu0 %v7495_v44 }
 0x291   :  { %v1329_v26 = vsel %vm1327_vm13, %v1321_v13, 0.0  ;;  %v6689_v38 = vsel %vm1327_vm13, %v1321_v13, %v6582_v27  ;;  %v7522_v27 = vld [vmem:[#allocation26_spill] sm:$0xff] }
 0x292   :  { %1331 = vst [vmem:[#allocation10 + $0x30] sm:$0xff] %v1329_v26  ;;  %1581 = vmatmul.mubr.f32.vlgmr.msra.gmra.mrb[26].mxu1 %v6689_v38  ;;  %4140 = vmatmul.mubr.f32.vlgmr.msra.gmra.mrb[42].mxu0 %v6689_v38 }
 0x293   :  { %4831 = vmatpush1.bf16.msra.mxu1 %v5905_v17  ;;  %4862 = vmatpush3.bf16.msra.mxu0 %v6082_v14 }
 0x294   :  { %4833 = vmatprep.subr.bf16.mxu1 %v5916_v21  ;;  %4863 = vmatprep.subr.bf16.mxu0 %v7495_v44 }
 0x295   :  { %1758 = vmatprep.mubr.f32.mxu1 %v7496_v8  ;;  %4174 = vmatprep.mubr.msk.f32.mxu0 %vm5768_vm5, %v7496_v8 }
 0x297   :  { %4835 = vmatpush1.bf16.msra.mxu1 %v5933_v25  ;;  %4865 = vmatpush3.bf16.msra.mxu0 %v6100_v28 }
 0x298   :  { %4837 = vmatprep.subr.bf16.mxu1 %v5949_v29  ;;  %4866 = vmatprep.subr.bf16.mxu0 %v7495_v44 }
 0x29b   :  { %4839 = vmatpush1.bf16.msra.mxu1 %v5958_v33  ;;  %4868 = vmatpush3.bf16.msra.mxu0 %v6126_v43 }
 0x29c   :  { %4841 = vmatprep.subr.bf16.mxu1 %v5961_v35  ;;  %4869 = vmatprep.subr.bf16.mxu0 %v7495_v44 }
 0x29f   :  { %4843 = vmatpush1.bf16.msra.mxu1 %v5982_v40  ;;  %4871 = vmatpush3.bf16.msra.mxu0 %v6146_v60 }
 0x2a0   :  { %4845 = vmatprep.subr.bf16.mxu1 %v7498_v11  ;;  %4872 = vmatprep.subr.bf16.mxu0 %v7495_v44 }
 0x2a3   :  { %4847 = vmatpush1.bf16.msra.mxu1 %v7499_v30  ;;  %4874 = vmatpush3.bf16.msra.mxu0 %v7522_v27 }
 0x2a4   :  { %4849 = vmatprep.subr.bf16.mxu1 %v7523_v54  ;;  %4875 = vmatprep.subr.bf16.mxu0 %v7495_v44 }
 0x2a7   :  { %4851 = vmatpush1.bf16.msra.mxu1 %v7524_v36  ;;  %4877 = vmatpush3.bf16.msra.mxu0 %v7525_v48 }
 0x2a8   :  { %4853 = vmatprep.subr.bf16.mxu1 %v7526_v61  ;;  %4878 = vmatprep.subr.bf16.mxu0 %v7495_v44 }
 0x2ab   :  { %4855 = vmatpush1.bf16.msra.mxu1 %v7527_v49  ;;  %4880 = vmatpush3.bf16.msra.mxu0 %v7528_v55  ;;  %v7535_v55 = vld [vmem:[#allocation35_spill] sm:$0xff]  ;;  %v7536_v49 = vld [vmem:[#allocation37_spill] sm:$0xff] }
 0x2ac   :  { %4857 = vmatprep.subr.bf16.mxu1 %v7529_v57  ;;  %4881 = vmatprep.subr.bf16.mxu0 %v7495_v44 }
 0x2af   :  { %4859 = vmatpush1.bf16.msra.mxu1 %v7530_v5  ;;  %4883 = vmatpush3.bf16.msra.mxu0 %v7531_v46 }
 0x2b0   :  { %4885 = vmatprep.subr.bf16.mxu1 %v7532_v2  ;;  %4916 = vmatprep.subr.bf16.mxu0 %v7495_v44 }
 0x345   :  { %v1404_v32 = vpop.f32.mrb[24].mxu1  ;;  %v1475_v24 = vpop.f32.mrb[40].mxu0 }
 0x346   :  { %v1405_v53 = vadd.f32 %v1404_v32, %v7533_v42  ;;  %v1406_v13 = vpop.f32.mrb[25].mxu1  ;;  %v4106_v26 = vpop.f32.mrb[41].mxu0  ;;  %v1476_v27 = vadd.f32 %v1475_v24, %v7515_v6 }
 0x347   :  { %v1407_v4 = vadd.f32 %v1406_v13, %v7534_v0  ;;  %v7537_v0 = vld [vmem:[#allocation36_spill] sm:$0xff] }
 0x348   :  { %v1479_v57 = vadd.f32 %v1405_v53, %v7535_v55 }
 0x349   :  { %v1486_v61 = vadd.f32 %v1407_v4, %v7536_v49 }
 0x34a   :  { %v3600_v48 = vmul.f32 -1.442695, %v1479_v57  ;;  %v7538_v57 = vld [vmem:[#allocation50_spill] sm:$0xff] }
 0x34b   :  { %v3601_v5 = vmul.f32 -1.442695, %v1486_v61 }
 0x34c   :  { %5498 = vpow2.f32 %v3600_v48 }
 0x34d   :  { %5500 = vpow2.f32 %v3601_v5 }
 0x356   :  { %v5499_v46 = vpop.eup %5498 }
 0x357   :  { %v1483_v2 = vadd.f32 1.0, %v5499_v46  ;;  %v5501_v36 = vpop.eup %5500  ;;  %v7539_v46 = vld [vmem:[#allocation70_spill] sm:$0xff] }
 0x358   :  { %v1490_v54 = vadd.f32 1.0, %v5501_v36 }
 0x359   :  { %5502 = vrcp.f32 %v1483_v2 }
 0x35a   :  { %5504 = vrcp.f32 %v1490_v54 }
 0x363   :  { %v5503_v32 = vpop.eup %5502 }
 0x364   :  { %v1493_v42 = vmul.f32 %v5503_v32, %v1476_v27  ;;  %v5505_v24 = vpop.eup %5504 }
 0x365   :  { %v1582_v26 = vpop.f32.mrb[26].mxu1  ;;  %v1653_v13 = vpop.f32.mrb[42].mxu0  ;;  %v1496_v54 = vsub.f32 1.0, %v5505_v24 }
 0x366   :  { %v1494_v55 = vadd.f32 %v1493_v42, %v7537_v0  ;;  %v1583_v4 = vadd.f32 %v1582_v26, %v6507_v41  ;;  %v1584_v49 = vpop.f32.mrb[27].mxu1  ;;  %v4141_v48 = vpop.f32.mrb[43].mxu0  ;;  %v1498_v0 = vmul.f32 %v5505_v24, %v6639_v12 }
 0x367   :  { %v1585_v61 = vadd.f32 %v1584_v49, %v6510_v62  ;;  %v6739_v42 = vpop.permute.xlu0 %1503 }
 0x368   :  { %5506 = vtanh.f32 %v1494_v55  ;;  %v1657_v5 = vadd.f32 %v1583_v4, %v7538_v57  ;;  %7540 = vst [vmem:[#allocation74_spill] sm:$0xff] %v6739_v42  ;;  %vm1505_vm14 = vcmp.eq.s32.totalorder %v6739_v42, 1  ;;  %v1654_v57 = vadd.f32 %v1653_v13, %v6544_v51  ;;  %v7555_v42 = vld [vmem:[#allocation59_spill] sm:$0xff] }
 0x369   :  { %v1664_v36 = vadd.f32 %v1585_v61, %v7539_v46 }
 0x36a   :  { %v3602_v2 = vmul.f32 -1.442695, %v1657_v5 }
 0x36b   :  { %v3603_v27 = vmul.f32 -1.442695, %v1664_v36  ;;  %v7541_v36 = vld [vmem:[#allocation71_spill] sm:$0xff] }
 0x36c   :  { %5508 = vpow2.f32 %v3602_v2 }
 0x36d   :  { %5510 = vpow2.f32 %v3603_v27 }
 0x372   :  { %v5507_v53 = vpop.eup %5506 }
 0x373   :  { %v1497_v32 = vmul.f32 %v5507_v53, %v1496_v54 }
 0x375   :  { %v1499_v26 = vadd.f32 %v1498_v0, %v1497_v32  ;;  %v6785_v32 = vpop.permute.xlu1 %1681 }
 0x376   :  { %v5509_v48 = vpop.eup %5508  ;;  %7542 = vst [vmem:[#allocation32_spill] sm:$0xff] %v6785_v32  ;;  %vm1683_vm15 = vcmp.eq.s32.totalorder %v6785_v32, 1 }
 0x377   :  { %v1661_v55 = vadd.f32 1.0, %v5509_v48  ;;  %v6745_v4 = vsel %vm1505_vm14, %v1499_v26, %v6639_v12  ;;  %v1507_v49 = vsel %vm1505_vm14, %v1499_v26, 0.0  ;;  %v5511_v12 = vpop.eup %5510 }
 0x378   :  { %1509 = vst [vmem:[#allocation9 + $0x10] sm:$0xff] %v1507_v49  ;;  %1759 = vmatmul.mubr.f32.vlgmr.msra.gmra.mrb[28].mxu1 %v6745_v4  ;;  %4175 = vmatmul.mubr.f32.vlgmr.msra.gmra.mrb[44].mxu0 %v6745_v4  ;;  %v1668_v61 = vadd.f32 1.0, %v5511_v12  ;;  %v7545_v49 = vld [vmem:[#allocation20_spill] sm:$0xff]  ;;  %v7546_v12 = vld [vmem:[#allocation27_spill] sm:$0xff] }
 0x379   :  { %5512 = vrcp.f32 %v1661_v55  ;;  %4887 = vmatpush1.bf16.msra.mxu1 %v6085_v15  ;;  %4918 = vmatpush3.bf16.msra.mxu0 %v6229_v58  ;;  %v7544_v55 = vld [vmem:[#allocation19_spill] sm:$0xff] }
 0x37a   :  { %4889 = vmatprep.subr.bf16.mxu1 %v6094_v20  ;;  %4919 = vmatprep.subr.bf16.mxu0 %v7495_v44  ;;  %5514 = vrcp.f32 %v1668_v61  ;;  %v7547_v61 = vld [vmem:[#allocation21_spill] sm:$0xff] }
 0x37b   :  { %1936 = vmatprep.mubr.f32.mxu1 %v7496_v8  ;;  %4209 = vmatprep.mubr.msk.f32.mxu0 %vm5768_vm5, %v7496_v8 }
 0x37d   :  { %4891 = vmatpush1.bf16.msra.mxu1 %v6109_v31  ;;  %4921 = vmatpush3.bf16.msra.mxu0 %v6237_v22 }
 0x37e   :  { %4893 = vmatprep.subr.bf16.mxu1 %v6121_v34  ;;  %4922 = vmatprep.subr.bf16.mxu0 %v7495_v44 }
 0x381   :  { %4895 = vmatpush1.bf16.msra.mxu1 %v6131_v47  ;;  %4924 = vmatpush3.bf16.msra.mxu0 %v6246_v9 }
 0x382   :  { %4897 = vmatprep.subr.bf16.mxu1 %v6141_v52  ;;  %4925 = vmatprep.subr.bf16.mxu0 %v7495_v44 }
 0x383   :  { %v5513_v5 = vpop.eup %5512 }
 0x384   :  { %v1671_v46 = vmul.f32 %v5513_v5, %v1654_v57  ;;  %v5515_v13 = vpop.eup %5514  ;;  %v7548_v57 = vld [vmem:[#allocation22_spill] sm:$0xff]  ;;  %v7549_v5 = vld [vmem:[#allocation28_spill] sm:$0xff] }
 0x385   :  { %4899 = vmatpush1.bf16.msra.mxu1 %v6152_v1  ;;  %4927 = vmatpush3.bf16.msra.mxu0 %v6252_v45  ;;  %v1674_v24 = vsub.f32 1.0, %v5515_v13  ;;  %v1676_v53 = vmul.f32 %v5515_v13, %v6689_v38  ;;  %v7553_v13 = vld [vmem:[#allocation25_spill] sm:$0xff] }
 0x386   :  { %v1672_v2 = vadd.f32 %v1671_v46, %v7541_v36  ;;  %4901 = vmatprep.subr.bf16.mxu1 %v6162_v3  ;;  %4928 = vmatprep.subr.bf16.mxu0 %v7495_v44  ;;  %v7550_v46 = vld [vmem:[#allocation23_spill] sm:$0xff]  ;;  %v7551_v36 = vld [vmem:[#allocation24_spill] sm:$0xff] }
 0x388   :  { %5516 = vtanh.f32 %v1672_v2  ;;  %v7552_v2 = vld [vmem:[#allocation29_spill] sm:$0xff] }
 0x389   :  { %4903 = vmatpush1.bf16.msra.mxu1 %v6170_v18  ;;  %4930 = vmatpush3.bf16.msra.mxu0 %v6258_v50 }
 0x38a   :  { %4905 = vmatprep.subr.bf16.mxu1 %v6179_v23  ;;  %4931 = vmatprep.subr.bf16.mxu0 %v7495_v44 }
 0x38d   :  { %4907 = vmatpush1.bf16.msra.mxu1 %v6189_v37  ;;  %4933 = vmatpush3.bf16.msra.mxu0 %v6264_v59 }
 0x38e   :  { %4909 = vmatprep.subr.bf16.mxu1 %v6198_v39  ;;  %4934 = vmatprep.subr.bf16.mxu0 %v7495_v44 }
 0x391   :  { %4911 = vmatpush1.bf16.msra.mxu1 %v6205_v56  ;;  %4936 = vmatpush3.bf16.msra.mxu0 %v6270_v10 }
 0x392   :  { %v5517_v27 = vpop.eup %5516  ;;  %4913 = vmatprep.subr.bf16.mxu1 %v6214_v63  ;;  %4937 = vmatprep.subr.bf16.mxu0 %v7495_v44 }
 0x393   :  { %v1675_v54 = vmul.f32 %v5517_v27, %v1674_v24 }
 0x395   :  { %4915 = vmatpush1.bf16.msra.mxu1 %v6225_v7  ;;  %4939 = vmatpush3.bf16.msra.mxu0 %v6276_v19  ;;  %v1677_v0 = vadd.f32 %v1676_v53, %v1675_v54  ;;  %v7554_v54 = vld [vmem:[#allocation58_spill] sm:$0xff] }
 0x396   :  { %4941 = vmatprep.subr.bf16.mxu1 %v5903_v16  ;;  %4972 = vmatprep.subr.bf16.mxu0 %v7495_v44 }
 0x397   :  { %v6795_v26 = vsel %vm1683_vm15, %v1677_v0, %v6689_v38  ;;  %v1685_v48 = vsel %vm1683_vm15, %v1677_v0, 0.0  ;;  %v7543_v38 = vld [vmem:[#allocation26_spill] sm:$0xff] }
 0x398   :  { %1687 = vst [vmem:[#allocation10 + $0x28] sm:$0xff] %v1685_v48  ;;  %1937 = vmatmul.mubr.f32.vlgmr.msra.gmra.mrb[30].mxu1 %v6795_v26  ;;  %4210 = vmatmul.mubr.f32.vlgmr.msra.gmra.mrb[46].mxu0 %v6795_v26 }
 0x399   :  { %4943 = vmatpush1.bf16.msra.mxu1 %v5905_v17  ;;  %4974 = vmatpush3.bf16.msra.mxu0 %v6082_v14 }
 0x39a   :  { %4945 = vmatprep.subr.bf16.mxu1 %v5916_v21  ;;  %4975 = vmatprep.subr.bf16.mxu0 %v7495_v44 }
 0x39b   :  { %2111 = vmatprep.mubr.f32.mxu1 %v7496_v8  ;;  %4244 = vmatprep.mubr.msk.f32.mxu0 %vm5768_vm5, %v7496_v8 }
 0x39d   :  { %4947 = vmatpush1.bf16.msra.mxu1 %v5933_v25  ;;  %4977 = vmatpush3.bf16.msra.mxu0 %v6100_v28 }
 0x39e   :  { %4949 = vmatprep.subr.bf16.mxu1 %v5949_v29  ;;  %4978 = vmatprep.subr.bf16.mxu0 %v7495_v44 }
 0x3a1   :  { %4951 = vmatpush1.bf16.msra.mxu1 %v5958_v33  ;;  %4980 = vmatpush3.bf16.msra.mxu0 %v6126_v43 }
 0x3a2   :  { %4953 = vmatprep.subr.bf16.mxu1 %v5961_v35  ;;  %4981 = vmatprep.subr.bf16.mxu0 %v7495_v44 }
 0x3a5   :  { %4955 = vmatpush1.bf16.msra.mxu1 %v5982_v40  ;;  %4983 = vmatpush3.bf16.msra.mxu0 %v6146_v60 }
 0x3a6   :  { %4957 = vmatprep.subr.bf16.mxu1 %v7498_v11  ;;  %4984 = vmatprep.subr.bf16.mxu0 %v7495_v44 }
 0x3a9   :  { %4959 = vmatpush1.bf16.msra.mxu1 %v7499_v30  ;;  %4986 = vmatpush3.bf16.msra.mxu0 %v7543_v38 }
 0x3aa   :  { %4961 = vmatprep.subr.bf16.mxu1 %v7544_v55  ;;  %4987 = vmatprep.subr.bf16.mxu0 %v7495_v44 }
 0x3ad   :  { %4963 = vmatpush1.bf16.msra.mxu1 %v7545_v49  ;;  %4989 = vmatpush3.bf16.msra.mxu0 %v7546_v12 }
 0x3ae   :  { %4965 = vmatprep.subr.bf16.mxu1 %v7547_v61  ;;  %4990 = vmatprep.subr.bf16.mxu0 %v7495_v44 }
 0x3b1   :  { %4967 = vmatpush1.bf16.msra.mxu1 %v7548_v57  ;;  %4992 = vmatpush3.bf16.msra.mxu0 %v7549_v5  ;;  %v7556_v5 = vld [vmem:[#allocation39_spill] sm:$0xff]  ;;  %v7557_v57 = vld [vmem:[#allocation41_spill] sm:$0xff] }
 0x3b2   :  { %4969 = vmatprep.subr.bf16.mxu1 %v7550_v46  ;;  %4993 = vmatprep.subr.bf16.mxu0 %v7495_v44 }
 0x3b5   :  { %4971 = vmatpush1.bf16.msra.mxu1 %v7551_v36  ;;  %4995 = vmatpush3.bf16.msra.mxu0 %v7552_v2 }
 0x3b6   :  { %4997 = vmatprep.subr.bf16.mxu1 %v7553_v13  ;;  %5028 = vmatprep.subr.bf16.mxu0 %v7495_v44 }
 0x44b   :  { %v1760_v24 = vpop.f32.mrb[28].mxu1  ;;  %v1831_v27 = vpop.f32.mrb[44].mxu0 }
 0x44c   :  { %v1761_v53 = vadd.f32 %v1760_v24, %v7554_v54  ;;  %v1762_v0 = vpop.f32.mrb[29].mxu1  ;;  %v4176_v48 = vpop.f32.mrb[45].mxu0  ;;  %v1832_v38 = vadd.f32 %v1831_v27, %v7515_v6 }
 0x44d   :  { %v1763_v32 = vadd.f32 %v1762_v0, %v7555_v42  ;;  %v7558_v42 = vld [vmem:[#allocation40_spill] sm:$0xff] }
 0x44e   :  { %v1835_v46 = vadd.f32 %v1761_v53, %v7556_v5 }
 0x44f   :  { %v1842_v61 = vadd.f32 %v1763_v32, %v7557_v57 }
 0x450   :  { %v3604_v12 = vmul.f32 -1.442695, %v1835_v46  ;;  %v7559_v46 = vld [vmem:[#allocation46_spill] sm:$0xff] }
 0x451   :  { %v3605_v36 = vmul.f32 -1.442695, %v1842_v61 }
 0x452   :  { %5518 = vpow2.f32 %v3604_v12 }
 0x453   :  { %5520 = vpow2.f32 %v3605_v36 }
 0x45c   :  { %v5519_v2 = vpop.eup %5518 }
 0x45d   :  { %v1839_v13 = vadd.f32 1.0, %v5519_v2  ;;  %v5521_v49 = vpop.eup %5520  ;;  %v7560_v2 = vld [vmem:[#allocation68_spill] sm:$0xff] }
 0x45e   :  { %v1846_v55 = vadd.f32 1.0, %v5521_v49 }
 0x45f   :  { %5522 = vrcp.f32 %v1839_v13 }
 0x460   :  { %5524 = vrcp.f32 %v1846_v55 }
 0x469   :  { %v5523_v24 = vpop.eup %5522 }
 0x46a   :  { %v1849_v54 = vmul.f32 %v5523_v24, %v1832_v38  ;;  %v5525_v27 = vpop.eup %5524  ;;  %v6846_v24 = vpop.permute.xlu0 %1859 }
 0x46b   :  { %v1938_v48 = vpop.f32.mrb[30].mxu1  ;;  %v2009_v0 = vpop.f32.mrb[46].mxu0  ;;  %v1852_v55 = vsub.f32 1.0, %v5525_v27  ;;  %vm1861_vm1 = vcmp.eq.s32.totalorder %v6846_v24, 1  ;;  %v7581_v24 = vld [vmem:[#allocation17_spill] sm:$0xff] }
 0x46c   :  { %v1850_v5 = vadd.f32 %v1849_v54, %v7558_v42  ;;  %v1939_v32 = vadd.f32 %v1938_v48, %v6507_v41  ;;  %v1940_v57 = vpop.f32.mrb[31].mxu1  ;;  %v4211_v12 = vpop.f32.mrb[47].mxu0  ;;  %v1854_v54 = vmul.f32 %v5525_v27, %v6745_v4 }
 0x46d   :  { %v1941_v61 = vadd.f32 %v1940_v57, %v6510_v62 }
 0x46e   :  { %5526 = vtanh.f32 %v1850_v5  ;;  %v2013_v36 = vadd.f32 %v1939_v32, %v7559_v46  ;;  %v2010_v46 = vadd.f32 %v2009_v0, %v6544_v51 }
 0x46f   :  { %v2020_v49 = vadd.f32 %v1941_v61, %v7560_v2 }
 0x470   :  { %v3606_v13 = vmul.f32 -1.442695, %v2013_v36 }
 0x471   :  { %v3607_v38 = vmul.f32 -1.442695, %v2020_v49  ;;  %v7561_v49 = vld [vmem:[#allocation69_spill] sm:$0xff] }
 0x472   :  { %5528 = vpow2.f32 %v3606_v13 }
 0x473   :  { %5530 = vpow2.f32 %v3607_v38 }
 0x478   :  { %v5527_v53 = vpop.eup %5526 }
 0x479   :  { %v1853_v42 = vmul.f32 %v5527_v53, %v1852_v55  ;;  %v6892_v55 = vpop.permute.xlu1 %2037 }
 0x47a   :  { %vm2039_vm2 = vcmp.eq.s32.totalorder %v6892_v55, 1 }
 0x47b   :  { %v1855_v48 = vadd.f32 %v1854_v54, %v1853_v42 }
 0x47c   :  { %v5529_v12 = vpop.eup %5528 }
 0x47d   :  { %v2017_v5 = vadd.f32 1.0, %v5529_v12  ;;  %v6853_v32 = vsel %vm1861_vm1, %v1855_v48, %v6745_v4  ;;  %v1863_v57 = vsel %vm1861_vm1, %v1855_v48, 0.0  ;;  %v5531_v4 = vpop.eup %5530 }
 0x47e   :  { %1865 = vst [vmem:[#allocation9 + $0x18] sm:$0xff] %v1863_v57  ;;  %2112 = vmatmul.mubr.f32.vlgmr.msra.gmra.mrb[32].mxu1 %v6853_v32  ;;  %4245 = vmatmul.mubr.f32.vlgmr.msra.gmra.mrb[48].mxu0 %v6853_v32  ;;  %v2024_v61 = vadd.f32 1.0, %v5531_v4  ;;  %v7564_v57 = vld [vmem:[#allocation20_spill] sm:$0xff]  ;;  %v7565_v4 = vld [vmem:[#allocation27_spill] sm:$0xff] }
 0x47f   :  { %5532 = vrcp.f32 %v2017_v5  ;;  %4999 = vmatpush1.bf16.msra.mxu1 %v6085_v15  ;;  %5030 = vmatpush3.bf16.msra.mxu0 %v6229_v58  ;;  %v7563_v5 = vld [vmem:[#allocation19_spill] sm:$0xff] }
 0x480   :  { %5001 = vmatprep.subr.bf16.mxu1 %v6094_v20  ;;  %5031 = vmatprep.subr.bf16.mxu0 %v7495_v44  ;;  %5534 = vrcp.f32 %v2024_v61  ;;  %v7566_v61 = vld [vmem:[#allocation21_spill] sm:$0xff] }
 0x481   :  { %2280 = vmatprep.mubr.f32.mxu1 %v7496_v8  ;;  %4279 = vmatprep.mubr.msk.f32.mxu0 %vm5768_vm5, %v7496_v8 }
 0x483   :  { %5003 = vmatpush1.bf16.msra.mxu1 %v6109_v31  ;;  %5033 = vmatpush3.bf16.msra.mxu0 %v6237_v22 }
 0x484   :  { %5005 = vmatprep.subr.bf16.mxu1 %v6121_v34  ;;  %5034 = vmatprep.subr.bf16.mxu0 %v7495_v44 }
 0x487   :  { %5007 = vmatpush1.bf16.msra.mxu1 %v6131_v47  ;;  %5036 = vmatpush3.bf16.msra.mxu0 %v6246_v9 }
 0x488   :  { %5009 = vmatprep.subr.bf16.mxu1 %v6141_v52  ;;  %5037 = vmatprep.subr.bf16.mxu0 %v7495_v44 }
 0x489   :  { %v5533_v36 = vpop.eup %5532 }
 0x48a   :  { %v2027_v2 = vmul.f32 %v5533_v36, %v2010_v46  ;;  %v5535_v0 = vpop.eup %5534  ;;  %v7567_v46 = vld [vmem:[#allocation22_spill] sm:$0xff]  ;;  %v7568_v36 = vld [vmem:[#allocation28_spill] sm:$0xff] }
 0x48b   :  { %5011 = vmatpush1.bf16.msra.mxu1 %v6152_v1  ;;  %5039 = vmatpush3.bf16.msra.mxu0 %v6252_v45  ;;  %v2030_v27 = vsub.f32 1.0, %v5535_v0  ;;  %v2032_v42 = vmul.f32 %v5535_v0, %v6795_v26  ;;  %v7572_v0 = vld [vmem:[#allocation25_spill] sm:$0xff] }
 0x48c   :  { %v2028_v13 = vadd.f32 %v2027_v2, %v7561_v49  ;;  %5013 = vmatprep.subr.bf16.mxu1 %v6162_v3  ;;  %5040 = vmatprep.subr.bf16.mxu0 %v7495_v44  ;;  %v7569_v2 = vld [vmem:[#allocation23_spill] sm:$0xff]  ;;  %v7570_v49 = vld [vmem:[#allocation24_spill] sm:$0xff] }
 0x48e   :  { %5536 = vtanh.f32 %v2028_v13  ;;  %v7571_v13 = vld [vmem:[#allocation29_spill] sm:$0xff] }
 0x48f   :  { %5015 = vmatpush1.bf16.msra.mxu1 %v6170_v18  ;;  %5042 = vmatpush3.bf16.msra.mxu0 %v6258_v50 }
 0x490   :  { %5017 = vmatprep.subr.bf16.mxu1 %v6179_v23  ;;  %5043 = vmatprep.subr.bf16.mxu0 %v7495_v44 }
 0x493   :  { %5019 = vmatpush1.bf16.msra.mxu1 %v6189_v37  ;;  %5045 = vmatpush3.bf16.msra.mxu0 %v6264_v59 }
 0x494   :  { %5021 = vmatprep.subr.bf16.mxu1 %v6198_v39  ;;  %5046 = vmatprep.subr.bf16.mxu0 %v7495_v44 }
 0x497   :  { %5023 = vmatpush1.bf16.msra.mxu1 %v6205_v56  ;;  %5048 = vmatpush3.bf16.msra.mxu0 %v6270_v10 }
 0x498   :  { %v5537_v38 = vpop.eup %5536  ;;  %5025 = vmatprep.subr.bf16.mxu1 %v6214_v63  ;;  %5049 = vmatprep.subr.bf16.mxu0 %v7495_v44 }
 0x499   :  { %v2031_v53 = vmul.f32 %v5537_v38, %v2030_v27 }
 0x49b   :  { %5027 = vmatpush1.bf16.msra.mxu1 %v6225_v7  ;;  %5051 = vmatpush3.bf16.msra.mxu0 %v6276_v19  ;;  %v2033_v54 = vadd.f32 %v2032_v42, %v2031_v53  ;;  %v7573_v53 = vld [vmem:[#allocation58_spill] sm:$0xff] }
 0x49c   :  { %5053 = vmatprep.subr.bf16.mxu1 %v5903_v16  ;;  %5084 = vmatprep.subr.bf16.mxu0 %v7495_v44 }
 0x49d   :  { %v6903_v48 = vsel %vm2039_vm2, %v2033_v54, %v6795_v26  ;;  %v2041_v12 = vsel %vm2039_vm2, %v2033_v54, 0.0  ;;  %v7562_v26 = vld [vmem:[#allocation26_spill] sm:$0xff] }
 0x49e   :  { %2043 = vst [vmem:[#allocation10 + $0x20] sm:$0xff] %v2041_v12  ;;  %2281 = vmatmul.mubr.f32.vlgmr.msra.gmra.mrb[34].mxu1 %v6903_v48  ;;  %4280 = vmatmul.mubr.f32.vlgmr.msra.gmra.mrb[50].mxu0 %v6903_v48 }
 0x49f   :  { %5055 = vmatpush1.bf16.msra.mxu1 %v5905_v17  ;;  %5086 = vmatpush3.bf16.msra.mxu0 %v6082_v14 }
 0x4a0   :  { %5057 = vmatprep.subr.bf16.mxu1 %v5916_v21  ;;  %5087 = vmatprep.subr.bf16.mxu0 %v7495_v44 }
 0x4a1   :  { %2449 = vmatprep.mubr.f32.mxu1 %v7496_v8  ;;  %4314 = vmatprep.mubr.msk.f32.mxu0 %vm5768_vm5, %v7496_v8 }
 0x4a3   :  { %5059 = vmatpush1.bf16.msra.mxu1 %v5933_v25  ;;  %5089 = vmatpush3.bf16.msra.mxu0 %v6100_v28 }
 0x4a4   :  { %5061 = vmatprep.subr.bf16.mxu1 %v5949_v29  ;;  %5090 = vmatprep.subr.bf16.mxu0 %v7495_v44 }
 0x4a7   :  { %5063 = vmatpush1.bf16.msra.mxu1 %v5958_v33  ;;  %5092 = vmatpush3.bf16.msra.mxu0 %v6126_v43 }
 0x4a8   :  { %5065 = vmatprep.subr.bf16.mxu1 %v5961_v35  ;;  %5093 = vmatprep.subr.bf16.mxu0 %v7495_v44 }
 0x4ab   :  { %5067 = vmatpush1.bf16.msra.mxu1 %v5982_v40  ;;  %5095 = vmatpush3.bf16.msra.mxu0 %v6146_v60 }
 0x4ac   :  { %5069 = vmatprep.subr.bf16.mxu1 %v7498_v11  ;;  %5096 = vmatprep.subr.bf16.mxu0 %v7495_v44 }
 0x4af   :  { %5071 = vmatpush1.bf16.msra.mxu1 %v7499_v30  ;;  %5098 = vmatpush3.bf16.msra.mxu0 %v7562_v26 }
 0x4b0   :  { %5073 = vmatprep.subr.bf16.mxu1 %v7563_v5  ;;  %5099 = vmatprep.subr.bf16.mxu0 %v7495_v44 }
 0x4b3   :  { %5075 = vmatpush1.bf16.msra.mxu1 %v7564_v57  ;;  %5101 = vmatpush3.bf16.msra.mxu0 %v7565_v4  ;;  %v7576_v4 = vld [vmem:[#allocation45_spill] sm:$0xff] }
 0x4b4   :  { %5077 = vmatprep.subr.bf16.mxu1 %v7566_v61  ;;  %5102 = vmatprep.subr.bf16.mxu0 %v7495_v44  ;;  %v7575_v61 = vld [vmem:[#allocation43_spill] sm:$0xff] }
 0x4b7   :  { %5079 = vmatpush1.bf16.msra.mxu1 %v7567_v46  ;;  %5104 = vmatpush3.bf16.msra.mxu0 %v7568_v36  ;;  %v7574_v46 = vld [vmem:[#allocation59_spill] sm:$0xff] }
 0x4b8   :  { %5081 = vmatprep.subr.bf16.mxu1 %v7569_v2  ;;  %5105 = vmatprep.subr.bf16.mxu0 %v7495_v44 }
 0x4bb   :  { %5083 = vmatpush1.bf16.msra.mxu1 %v7570_v49  ;;  %5107 = vmatpush3.bf16.msra.mxu0 %v7571_v13 }
 0x4bc   :  { %5109 = vmatprep.subr.bf16.mxu1 %v7572_v0  ;;  %5140 = vmatprep.subr.bf16.mxu0 %v7495_v44 }
 0x551   :  { %v2113_v27 = vpop.f32.mrb[32].mxu1  ;;  %v2184_v38 = vpop.f32.mrb[48].mxu0 }
 0x552   :  { %v2114_v42 = vadd.f32 %v2113_v27, %v7573_v53  ;;  %v2115_v54 = vpop.f32.mrb[33].mxu1  ;;  %v4246_v12 = vpop.f32.mrb[49].mxu0  ;;  %v2185_v11 = vadd.f32 %v2184_v38, %v7515_v6 }
 0x553   :  { %v2116_v36 = vadd.f32 %v2115_v54, %v7574_v46  ;;  %v7577_v46 = vld [vmem:[#allocation44_spill] sm:$0xff] }
 0x554   :  { %v2188_v2 = vadd.f32 %v2114_v42, %v7575_v61 }
 0x555   :  { %v2195_v57 = vadd.f32 %v2116_v36, %v7576_v4 }
 0x556   :  { %v3608_v5 = vmul.f32 -1.442695, %v2188_v2  ;;  %v7578_v2 = vld [vmem:[#allocation42_spill] sm:$0xff] }
 0x557   :  { %v3609_v49 = vmul.f32 -1.442695, %v2195_v57 }
 0x558   :  { %5538 = vpow2.f32 %v3608_v5 }
 0x559   :  { %5540 = vpow2.f32 %v3609_v49 }
 0x562   :  { %v5539_v13 = vpop.eup %5538 }
 0x563   :  { %v2192_v0 = vadd.f32 1.0, %v5539_v13  ;;  %v5541_v26 = vpop.eup %5540  ;;  %v7579_v13 = vld [vmem:[#allocation66_spill] sm:$0xff] }
 0x564   :  { %v2199_v30 = vadd.f32 1.0, %v5541_v26 }
 0x565   :  { %5542 = vrcp.f32 %v2192_v0 }
 0x566   :  { %5544 = vrcp.f32 %v2199_v30 }
 0x56f   :  { %v5543_v27 = vpop.eup %5542 }
 0x570   :  { %v2202_v53 = vmul.f32 %v5543_v27, %v2185_v11  ;;  %v5545_v38 = vpop.eup %5544 }
 0x571   :  { %v2282_v12 = vpop.f32.mrb[34].mxu1  ;;  %v2353_v54 = vpop.f32.mrb[50].mxu0  ;;  %v2205_v30 = vsub.f32 1.0, %v5545_v38 }
 0x572   :  { %v2203_v61 = vadd.f32 %v2202_v53, %v7577_v46  ;;  %v2283_v4 = vadd.f32 %v2282_v12, %v6507_v41  ;;  %v2284_v36 = vpop.f32.mrb[35].mxu1  ;;  %v4281_v5 = vpop.f32.mrb[51].mxu0  ;;  %v2207_v46 = vmul.f32 %v5545_v38, %v6853_v32 }
 0x573   :  { %v2285_v57 = vadd.f32 %v2284_v36, %v6510_v62  ;;  %v2354_v36 = vadd.f32 %v2353_v54, %v6544_v51 }
 0x574   :  { %5546 = vtanh.f32 %v2203_v61  ;;  %v2357_v49 = vadd.f32 %v2283_v4, %v7578_v2 }
 0x575   :  { %v2364_v26 = vadd.f32 %v2285_v57, %v7579_v13 }
 0x576   :  { %v3610_v0 = vmul.f32 -1.442695, %v2357_v49  ;;  %v7580_v49 = vld [vmem:[#allocation67_spill] sm:$0xff] }
 0x577   :  { %v3611_v11 = vmul.f32 -1.442695, %v2364_v26 }
 0x578   :  { %5548 = vpow2.f32 %v3610_v0 }
 0x579   :  { %5550 = vpow2.f32 %v3611_v11 }
 0x57e   :  { %v5547_v42 = vpop.eup %5546 }
 0x57f   :  { %v2206_v27 = vmul.f32 %v5547_v42, %v2205_v30 }
 0x581   :  { %v2208_v53 = vadd.f32 %v2207_v46, %v2206_v27  ;;  %v7583_v46 = vld [vmem:[#allocation26_spill] sm:$0xff] }
 0x582   :  { %v5549_v12 = vpop.eup %5548 }
 0x583   :  { %v2361_v5 = vadd.f32 1.0, %v5549_v12  ;;  %v6958_v61 = vsel %vm2039_vm2, %v2208_v53, %v6853_v32  ;;  %v2210_v4 = vsel %vm2039_vm2, %v2208_v53, 0.0  ;;  %v5551_v32 = vpop.eup %5550  ;;  %v7584_v53 = vld [vmem:[#allocation19_spill] sm:$0xff]  ;;  %v7585_v12 = vld [vmem:[#allocation20_spill] sm:$0xff] }
 0x584   :  { %2212 = vst [vmem:[#allocation9 + $0x20] sm:$0xff] %v2210_v4  ;;  %2450 = vmatmul.mubr.f32.vlgmr.msra.gmra.mrb[36].mxu1 %v6958_v61  ;;  %4315 = vmatmul.mubr.f32.vlgmr.msra.gmra.mrb[52].mxu0 %v6958_v61  ;;  %v2368_v55 = vadd.f32 1.0, %v5551_v32  ;;  %v7587_v4 = vld [vmem:[#allocation21_spill] sm:$0xff]  ;;  %v7588_v32 = vld [vmem:[#allocation22_spill] sm:$0xff] }
 0x585   :  { %5552 = vrcp.f32 %v2361_v5  ;;  %5111 = vmatpush1.bf16.msra.mxu1 %v6085_v15  ;;  %5142 = vmatpush3.bf16.msra.mxu0 %v6229_v58  ;;  %v7586_v5 = vld [vmem:[#allocation27_spill] sm:$0xff] }
 0x586   :  { %5113 = vmatprep.subr.bf16.mxu1 %v6094_v20  ;;  %5143 = vmatprep.subr.bf16.mxu0 %v7495_v44  ;;  %5554 = vrcp.f32 %v2368_v55  ;;  %v7589_v55 = vld [vmem:[#allocation28_spill] sm:$0xff] }
 0x587   :  { %2618 = vmatprep.mubr.f32.mxu1 %v7496_v8  ;;  %4349 = vmatprep.mubr.msk.f32.mxu0 %vm5768_vm5, %v7496_v8 }
 0x589   :  { %5115 = vmatpush1.bf16.msra.mxu1 %v6109_v31  ;;  %5145 = vmatpush3.bf16.msra.mxu0 %v6237_v22 }
 0x58a   :  { %5117 = vmatprep.subr.bf16.mxu1 %v6121_v34  ;;  %5146 = vmatprep.subr.bf16.mxu0 %v7495_v44 }
 0x58d   :  { %5119 = vmatpush1.bf16.msra.mxu1 %v6131_v47  ;;  %5148 = vmatpush3.bf16.msra.mxu0 %v6246_v9 }
 0x58e   :  { %5121 = vmatprep.subr.bf16.mxu1 %v6141_v52  ;;  %5149 = vmatprep.subr.bf16.mxu0 %v7495_v44 }
 0x58f   :  { %v5553_v57 = vpop.eup %5552 }
 0x590   :  { %v2371_v2 = vmul.f32 %v5553_v57, %v2354_v36  ;;  %v5555_v54 = vpop.eup %5554  ;;  %v7590_v36 = vld [vmem:[#allocation23_spill] sm:$0xff]  ;;  %v7591_v57 = vld [vmem:[#allocation24_spill] sm:$0xff] }
 0x591   :  { %5123 = vmatpush1.bf16.msra.mxu1 %v6152_v1  ;;  %5151 = vmatpush3.bf16.msra.mxu0 %v6252_v45  ;;  %v2374_v26 = vsub.f32 1.0, %v5555_v54  ;;  %v2376_v11 = vmul.f32 %v5555_v54, %v6903_v48 }
 0x592   :  { %v2372_v13 = vadd.f32 %v2371_v2, %v7580_v49  ;;  %5125 = vmatprep.subr.bf16.mxu1 %v6162_v3  ;;  %5152 = vmatprep.subr.bf16.mxu0 %v7495_v44  ;;  %v7592_v2 = vld [vmem:[#allocation29_spill] sm:$0xff] }
 0x593   :  { %v7593_v49 = vld [vmem:[#allocation25_spill] sm:$0xff] }
 0x594   :  { %5556 = vtanh.f32 %v2372_v13 }
 0x595   :  { %5127 = vmatpush1.bf16.msra.mxu1 %v6170_v18  ;;  %5154 = vmatpush3.bf16.msra.mxu0 %v6258_v50 }
 0x596   :  { %5129 = vmatprep.subr.bf16.mxu1 %v6179_v23  ;;  %5155 = vmatprep.subr.bf16.mxu0 %v7495_v44 }
 0x599   :  { %5131 = vmatpush1.bf16.msra.mxu1 %v6189_v37  ;;  %5157 = vmatpush3.bf16.msra.mxu0 %v6264_v59 }
 0x59a   :  { %5133 = vmatprep.subr.bf16.mxu1 %v6198_v39  ;;  %5158 = vmatprep.subr.bf16.mxu0 %v7495_v44 }
 0x59d   :  { %5135 = vmatpush1.bf16.msra.mxu1 %v6205_v56  ;;  %5160 = vmatpush3.bf16.msra.mxu0 %v6270_v10 }
 0x59e   :  { %v5557_v0 = vpop.eup %5556  ;;  %5137 = vmatprep.subr.bf16.mxu1 %v6214_v63  ;;  %5161 = vmatprep.subr.bf16.mxu0 %v7495_v44 }
 0x59f   :  { %v2375_v38 = vmul.f32 %v5557_v0, %v2374_v26  ;;  %v7594_v26 = vld [vmem:[#allocation58_spill] sm:$0xff] }
 0x5a1   :  { %5139 = vmatpush1.bf16.msra.mxu1 %v6225_v7  ;;  %5163 = vmatpush3.bf16.msra.mxu0 %v6276_v19  ;;  %v2377_v30 = vadd.f32 %v2376_v11, %v2375_v38 }
 0x5a2   :  { %5165 = vmatprep.subr.bf16.mxu1 %v5903_v16  ;;  %5196 = vmatprep.subr.bf16.mxu0 %v7495_v44 }
 0x5a3   :  { %v7005_v42 = vsel %vm1861_vm1, %v2377_v30, %v6903_v48  ;;  %v2379_v27 = vsel %vm1861_vm1, %v2377_v30, 0.0  ;;  %v7582_v48 = vld [vmem:[#allocation18_spill] sm:$0xff]  ;;  %v7595_v30 = vld [vmem:[#allocation59_spill] sm:$0xff] }
 0x5a4   :  { %2381 = vst [vmem:[#allocation10 + $0x18] sm:$0xff] %v2379_v27  ;;  %2619 = vmatmul.mubr.f32.vlgmr.msra.gmra.mrb[38].mxu1 %v7005_v42  ;;  %4350 = vmatmul.mubr.f32.vlgmr.msra.gmra.mrb[54].mxu0 %v7005_v42 }
 0x5a5   :  { %5167 = vmatpush1.bf16.msra.mxu1 %v5905_v17  ;;  %5198 = vmatpush3.bf16.msra.mxu0 %v6082_v14 }
 0x5a6   :  { %5169 = vmatprep.subr.bf16.mxu1 %v5916_v21  ;;  %5199 = vmatprep.subr.bf16.mxu0 %v7495_v44 }
 0x5a7   :  { %2787 = vmatprep.mubr.f32.mxu1 %v7496_v8  ;;  %4384 = vmatprep.mubr.msk.f32.mxu0 %vm5768_vm5, %v7496_v8 }
 0x5a9   :  { %5171 = vmatpush1.bf16.msra.mxu1 %v5933_v25  ;;  %5201 = vmatpush3.bf16.msra.mxu0 %v6100_v28 }
 0x5aa   :  { %5173 = vmatprep.subr.bf16.mxu1 %v5949_v29  ;;  %5202 = vmatprep.subr.bf16.mxu0 %v7495_v44 }
 0x5ad   :  { %5175 = vmatpush1.bf16.msra.mxu1 %v5958_v33  ;;  %5204 = vmatpush3.bf16.msra.mxu0 %v6126_v43 }
 0x5ae   :  { %5177 = vmatprep.subr.bf16.mxu1 %v5961_v35  ;;  %5205 = vmatprep.subr.bf16.mxu0 %v7495_v44 }
 0x5b1   :  { %5179 = vmatpush1.bf16.msra.mxu1 %v5982_v40  ;;  %5207 = vmatpush3.bf16.msra.mxu0 %v6146_v60 }
 0x5b2   :  { %5181 = vmatprep.subr.bf16.mxu1 %v7581_v24  ;;  %5208 = vmatprep.subr.bf16.mxu0 %v7495_v44 }
 0x5b5   :  { %5183 = vmatpush1.bf16.msra.mxu1 %v7582_v48  ;;  %5210 = vmatpush3.bf16.msra.mxu0 %v7583_v46 }
 0x5b6   :  { %5185 = vmatprep.subr.bf16.mxu1 %v7584_v53  ;;  %5211 = vmatprep.subr.bf16.mxu0 %v7495_v44 }
 0x5b9   :  { %5187 = vmatpush1.bf16.msra.mxu1 %v7585_v12  ;;  %5213 = vmatpush3.bf16.msra.mxu0 %v7586_v5 }
 0x5ba   :  { %5189 = vmatprep.subr.bf16.mxu1 %v7587_v4  ;;  %5214 = vmatprep.subr.bf16.mxu0 %v7495_v44 }
 0x5bd   :  { %5191 = vmatpush1.bf16.msra.mxu1 %v7588_v32  ;;  %5216 = vmatpush3.bf16.msra.mxu0 %v7589_v55  ;;  %v7596_v55 = vld [vmem:[#allocation47_spill] sm:$0xff]  ;;  %v7597_v32 = vld [vmem:[#allocation49_spill] sm:$0xff] }
 0x5be   :  { %5193 = vmatprep.subr.bf16.mxu1 %v7590_v36  ;;  %5217 = vmatprep.subr.bf16.mxu0 %v7495_v44 }
 0x5c1   :  { %5195 = vmatpush1.bf16.msra.mxu1 %v7591_v57  ;;  %5219 = vmatpush3.bf16.msra.mxu0 %v7592_v2 }
 0x5c2   :  { %5221 = vmatprep.subr.bf16.mxu1 %v7593_v49  ;;  %5252 = vmatprep.subr.bf16.mxu0 %v7495_v44 }
 0x657   :  { %v2451_v13 = vpop.f32.mrb[36].mxu1  ;;  %v2522_v54 = vpop.f32.mrb[52].mxu0 }
 0x658   :  { %v2452_v0 = vadd.f32 %v2451_v13, %v7594_v26  ;;  %v2453_v38 = vpop.f32.mrb[37].mxu1  ;;  %v4316_v11 = vpop.f32.mrb[53].mxu0  ;;  %v2523_v46 = vadd.f32 %v2522_v54, %v7515_v6 }
 0x659   :  { %v2454_v27 = vadd.f32 %v2453_v38, %v7595_v30  ;;  %v7598_v30 = vld [vmem:[#allocation48_spill] sm:$0xff] }
 0x65a   :  { %v2526_v36 = vadd.f32 %v2452_v0, %v7596_v55 }
 0x65b   :  { %v2533_v4 = vadd.f32 %v2454_v27, %v7597_v32 }
 0x65c   :  { %v3612_v5 = vmul.f32 -1.442695, %v2526_v36 }
 0x65d   :  { %v3613_v57 = vmul.f32 -1.442695, %v2533_v4 }
 0x65e   :  { %5558 = vpow2.f32 %v3612_v5 }
 0x65f   :  { %5560 = vpow2.f32 %v3613_v57  ;;  %v7599_v57 = vld [vmem:[#allocation38_spill] sm:$0xff] }
 0x668   :  { %v5559_v2 = vpop.eup %5558 }
 0x669   :  { %v2530_v49 = vadd.f32 1.0, %v5559_v2  ;;  %v5561_v12 = vpop.eup %5560 }
 0x66a   :  { %v2537_v53 = vadd.f32 1.0, %v5561_v12 }
 0x66b   :  { %5562 = vrcp.f32 %v2530_v49  ;;  %v7600_v49 = vld [vmem:[#allocation64_spill] sm:$0xff] }
 0x66c   :  { %5564 = vrcp.f32 %v2537_v53 }
 0x675   :  { %v5563_v13 = vpop.eup %5562 }
 0x676   :  { %v2540_v26 = vmul.f32 %v5563_v13, %v2523_v46  ;;  %v5565_v54 = vpop.eup %5564 }
 0x677   :  { %v2620_v11 = vpop.f32.mrb[38].mxu1  ;;  %v2691_v38 = vpop.f32.mrb[54].mxu0  ;;  %v2543_v53 = vsub.f32 1.0, %v5565_v54 }
 0x678   :  { %v2541_v55 = vadd.f32 %v2540_v26, %v7598_v30  ;;  %v2621_v32 = vadd.f32 %v2620_v11, %v6507_v41  ;;  %v2622_v36 = vpop.f32.mrb[39].mxu1  ;;  %v4351_v5 = vpop.f32.mrb[55].mxu0  ;;  %v2545_v26 = vmul.f32 %v5565_v54, %v6958_v61 }
 0x679   :  { %v2623_v4 = vadd.f32 %v2622_v36, %v6510_v62 }
 0x67a   :  { %5566 = vtanh.f32 %v2541_v55  ;;  %v2695_v2 = vadd.f32 %v2621_v32, %v7599_v57  ;;  %v2692_v57 = vadd.f32 %v2691_v38, %v6544_v51 }
 0x67b   :  { %v2702_v12 = vadd.f32 %v2623_v4, %v7600_v49 }
 0x67c   :  { %v3614_v0 = vmul.f32 -1.442695, %v2695_v2 }
 0x67d   :  { %v3615_v46 = vmul.f32 -1.442695, %v2702_v12  ;;  %v7602_v12 = vld [vmem:[#allocation65_spill] sm:$0xff] }
 0x67e   :  { %5568 = vpow2.f32 %v3614_v0 }
 0x67f   :  { %5570 = vpow2.f32 %v3615_v46 }
 0x684   :  { %v5567_v27 = vpop.eup %5566 }
 0x685   :  { %v2544_v13 = vmul.f32 %v5567_v27, %v2543_v53 }
 0x687   :  { %v2546_v30 = vadd.f32 %v2545_v26, %v2544_v13 }
 0x688   :  { %v5569_v11 = vpop.eup %5568 }
 0x689   :  { %v2699_v5 = vadd.f32 1.0, %v5569_v11  ;;  %v7060_v55 = vsel %vm1683_vm15, %v2546_v30, %v6958_v61  ;;  %v2548_v32 = vsel %vm1683_vm15, %v2546_v30, 0.0  ;;  %v5571_v61 = vpop.eup %5570 }
 0x68a   :  { %2550 = vst [vmem:[#allocation9 + $0x28] sm:$0xff] %v2548_v32  ;;  %2788 = vmatmul.mubr.f32.vlgmr.msra.gmra.mrb[40].mxu1 %v7060_v55  ;;  %4385 = vmatmul.mubr.f32.vlgmr.msra.gmra.mrb[56].mxu0 %v7060_v55  ;;  %v2706_v4 = vadd.f32 1.0, %v5571_v61  ;;  %v7616_v32 = vld [vmem:[#allocation59_spill] sm:$0xff] }
 0x68b   :  { %5572 = vrcp.f32 %v2699_v5  ;;  %5223 = vmatpush1.bf16.msra.mxu1 %v6085_v15  ;;  %5254 = vmatpush3.bf16.msra.mxu0 %v6229_v58 }
 0x68c   :  { %5225 = vmatprep.subr.bf16.mxu1 %v6094_v20  ;;  %5255 = vmatprep.subr.bf16.mxu0 %v7495_v44  ;;  %5574 = vrcp.f32 %v2706_v4  ;;  %v7617_v4 = vld [vmem:[#allocation51_spill] sm:$0xff] }
 0x68d   :  { %2956 = vmatprep.mubr.f32.mxu1 %v7496_v8  ;;  %4419 = vmatprep.mubr.msk.f32.mxu0 %vm5768_vm5, %v7496_v8 }
 0x68f   :  { %5227 = vmatpush1.bf16.msra.mxu1 %v6109_v31  ;;  %5257 = vmatpush3.bf16.msra.mxu0 %v6237_v22 }
 0x690   :  { %5229 = vmatprep.subr.bf16.mxu1 %v6121_v34  ;;  %5258 = vmatprep.subr.bf16.mxu0 %v7495_v44 }
 0x693   :  { %5231 = vmatpush1.bf16.msra.mxu1 %v6131_v47  ;;  %5260 = vmatpush3.bf16.msra.mxu0 %v6246_v9 }
 0x694   :  { %5233 = vmatprep.subr.bf16.mxu1 %v6141_v52  ;;  %5261 = vmatprep.subr.bf16.mxu0 %v7495_v44 }
 0x695   :  { %v5573_v2 = vpop.eup %5572 }
 0x696   :  { %v2709_v49 = vmul.f32 %v5573_v2, %v2692_v57  ;;  %v5575_v38 = vpop.eup %5574  ;;  %v7618_v2 = vld [vmem:[#allocation53_spill] sm:$0xff] }
 0x697   :  { %5235 = vmatpush1.bf16.msra.mxu1 %v6152_v1  ;;  %5263 = vmatpush3.bf16.msra.mxu0 %v6252_v45  ;;  %v2712_v54 = vsub.f32 1.0, %v5575_v38  ;;  %v2714_v27 = vmul.f32 %v5575_v38, %v7005_v42 }
 0x698   :  { %v2710_v0 = vadd.f32 %v2709_v49, %v7602_v12  ;;  %5237 = vmatprep.subr.bf16.mxu1 %v6162_v3  ;;  %5264 = vmatprep.subr.bf16.mxu0 %v7495_v44 }
 0x69a   :  { %5576 = vtanh.f32 %v2710_v0 }
 0x69b   :  { %5239 = vmatpush1.bf16.msra.mxu1 %v6170_v18  ;;  %5266 = vmatpush3.bf16.msra.mxu0 %v6258_v50 }
 0x69c   :  { %5241 = vmatprep.subr.bf16.mxu1 %v6179_v23  ;;  %5267 = vmatprep.subr.bf16.mxu0 %v7495_v44 }
 0x69f   :  { %5243 = vmatpush1.bf16.msra.mxu1 %v6189_v37  ;;  %5269 = vmatpush3.bf16.msra.mxu0 %v6264_v59 }
 0x6a0   :  { %5245 = vmatprep.subr.bf16.mxu1 %v6198_v39  ;;  %5270 = vmatprep.subr.bf16.mxu0 %v7495_v44 }
 0x6a3   :  { %5247 = vmatpush1.bf16.msra.mxu1 %v6205_v56  ;;  %5272 = vmatpush3.bf16.msra.mxu0 %v6270_v10 }
 0x6a4   :  { %v5577_v46 = vpop.eup %5576  ;;  %5249 = vmatprep.subr.bf16.mxu1 %v6214_v63  ;;  %5273 = vmatprep.subr.bf16.mxu0 %v7495_v44 }
 0x6a5   :  { %v2713_v53 = vmul.f32 %v5577_v46, %v2712_v54 }
 0x6a7   :  { %5251 = vmatpush1.bf16.msra.mxu1 %v6225_v7  ;;  %5275 = vmatpush3.bf16.msra.mxu0 %v6276_v19  ;;  %v2715_v13 = vadd.f32 %v2714_v27, %v2713_v53 }
 0x6a8   :  { %5277 = vmatprep.subr.bf16.mxu1 %v5903_v16  ;;  %5308 = vmatprep.subr.bf16.mxu0 %v7495_v44  ;;  %v7604_v16 = vld [vmem:[#allocation26_spill] sm:$0xff] }
 0x6a9   :  { %v7107_v30 = vsel %vm1505_vm14, %v2715_v13, %v7005_v42  ;;  %v2717_v11 = vsel %vm1505_vm14, %v2715_v13, 0.0 }
 0x6aa   :  { %2719 = vst [vmem:[#allocation10 + $0x10] sm:$0xff] %v2717_v11  ;;  %2957 = vmatmul.mubr.f32.vlgmr.msra.gmra.mrb[42].mxu1 %v7107_v30  ;;  %4420 = vmatmul.mubr.f32.vlgmr.msra.gmra.mrb[58].mxu0 %v7107_v30 }
 0x6ab   :  { %5279 = vmatpush1.bf16.msra.mxu1 %v5905_v17  ;;  %5310 = vmatpush3.bf16.msra.mxu0 %v6082_v14  ;;  %v7605_v17 = vld [vmem:[#allocation19_spill] sm:$0xff]  ;;  %v7612_v14 = vld [vmem:[#allocation24_spill] sm:$0xff] }
 0x6ac   :  { %5281 = vmatprep.subr.bf16.mxu1 %v5916_v21  ;;  %5311 = vmatprep.subr.bf16.mxu0 %v7495_v44  ;;  %v7606_v21 = vld [vmem:[#allocation20_spill] sm:$0xff] }
 0x6ad   :  { %3125 = vmatprep.mubr.f32.mxu1 %v7496_v8  ;;  %4454 = vmatprep.mubr.msk.f32.mxu0 %vm5768_vm5, %v7496_v8 }
 0x6af   :  { %5283 = vmatpush1.bf16.msra.mxu1 %v5933_v25  ;;  %5313 = vmatpush3.bf16.msra.mxu0 %v6100_v28  ;;  %v7607_v25 = vld [vmem:[#allocation27_spill] sm:$0xff]  ;;  %v7613_v28 = vld [vmem:[#allocation29_spill] sm:$0xff] }
 0x6b0   :  { %5285 = vmatprep.subr.bf16.mxu1 %v5949_v29  ;;  %5314 = vmatprep.subr.bf16.mxu0 %v7495_v44  ;;  %v7608_v29 = vld [vmem:[#allocation21_spill] sm:$0xff] }
 0x6b3   :  { %5287 = vmatpush1.bf16.msra.mxu1 %v5958_v33  ;;  %5316 = vmatpush3.bf16.msra.mxu0 %v6126_v43  ;;  %v7609_v33 = vld [vmem:[#allocation22_spill] sm:$0xff]  ;;  %v7614_v43 = vld [vmem:[#allocation25_spill] sm:$0xff] }
 0x6b4   :  { %5289 = vmatprep.subr.bf16.mxu1 %v5961_v35  ;;  %5317 = vmatprep.subr.bf16.mxu0 %v7495_v44  ;;  %v7610_v35 = vld [vmem:[#allocation28_spill] sm:$0xff] }
 0x6b7   :  { %5291 = vmatpush1.bf16.msra.mxu1 %v5982_v40  ;;  %5319 = vmatpush3.bf16.msra.mxu0 %v6146_v60  ;;  %v7611_v40 = vld [vmem:[#allocation23_spill] sm:$0xff] }
 0x6b8   :  { %5293 = vmatprep.subr.bf16.mxu1 %v7581_v24  ;;  %5320 = vmatprep.subr.bf16.mxu0 %v7495_v44  ;;  %v7615_v24 = vld [vmem:[#allocation58_spill] sm:$0xff] }
 0x6bb   :  { %5295 = vmatpush1.bf16.msra.mxu1 %v7582_v48  ;;  %5322 = vmatpush3.bf16.msra.mxu0 %v7604_v16 }
 0x6bc   :  { %5297 = vmatprep.subr.bf16.mxu1 %v7605_v17  ;;  %5323 = vmatprep.subr.bf16.mxu0 %v7495_v44  ;;  %v7619_v17 = vld [vmem:[#allocation52_spill] sm:$0xff] }
 0x6bf   :  { %5299 = vmatpush1.bf16.msra.mxu1 %v7606_v21  ;;  %5325 = vmatpush3.bf16.msra.mxu0 %v7607_v25 }
 0x6c0   :  { %5301 = vmatprep.subr.bf16.mxu1 %v7608_v29  ;;  %5326 = vmatprep.subr.bf16.mxu0 %v7495_v44 }
 0x6c3   :  { %5303 = vmatpush1.bf16.msra.mxu1 %v7609_v33  ;;  %5328 = vmatpush3.bf16.msra.mxu0 %v7610_v35 }
 0x6c4   :  { %5305 = vmatprep.subr.bf16.mxu1 %v7611_v40  ;;  %5329 = vmatprep.subr.bf16.mxu0 %v7495_v44  ;;  %v7620_v40 = vld [vmem:[#allocation34_spill] sm:$0xff] }
 0x6c7   :  { %5307 = vmatpush1.bf16.msra.mxu1 %v7612_v14  ;;  %5331 = vmatpush3.bf16.msra.mxu0 %v7613_v28  ;;  %v7621_v28 = vld [vmem:[#allocation62_spill] sm:$0xff] }
 0x6c8   :  { %5333 = vmatprep.subr.bf16.mxu1 %v7614_v43  ;;  %5364 = vmatprep.subr.bf16.mxu0 %v7495_v44 }
 0x75d   :  { %v2789_v60 = vpop.f32.mrb[40].mxu1  ;;  %v2860_v42 = vpop.f32.mrb[56].mxu0 }
 0x75e   :  { %v2790_v48 = vadd.f32 %v2789_v60, %v7615_v24  ;;  %v2791_v5 = vpop.f32.mrb[41].mxu1  ;;  %v4386_v36 = vpop.f32.mrb[57].mxu0  ;;  %v2861_v27 = vadd.f32 %v2860_v42, %v7515_v6 }
 0x75f   :  { %v2792_v61 = vadd.f32 %v2791_v5, %v7616_v32 }
 0x760   :  { %v2864_v57 = vadd.f32 %v2790_v48, %v7617_v4 }
 0x761   :  { %v2871_v49 = vadd.f32 %v2792_v61, %v7618_v2 }
 0x762   :  { %v3616_v12 = vmul.f32 -1.442695, %v2864_v57 }
 0x763   :  { %v3617_v0 = vmul.f32 -1.442695, %v2871_v49 }
 0x764   :  { %5578 = vpow2.f32 %v3616_v12  ;;  %v3407_v12 = vld [vmem:[%s7381_s8 + $0x60] sm:$0xff] }
 0x765   :  { %5580 = vpow2.f32 %v3617_v0 }
 0x76e   :  { %v5579_v38 = vpop.eup %5578 }
 0x76f   :  { %v2868_v54 = vadd.f32 1.0, %v5579_v38  ;;  %v5581_v46 = vpop.eup %5580 }
 0x770   :  { %v2875_v53 = vadd.f32 1.0, %v5581_v46  ;;  %v3415_v46 = vld [vmem:[%s7381_s8 + $0xa0] sm:$0xff] }
 0x771   :  { %5582 = vrcp.f32 %v2868_v54 }
 0x772   :  { %5584 = vrcp.f32 %v2875_v53  ;;  %v3416_v53 = vld [vmem:[%s7381_s8 + $0xa8] sm:$0xff] }
 0x77b   :  { %v5583_v13 = vpop.eup %5582 }
 0x77c   :  { %v2878_v26 = vmul.f32 %v5583_v13, %v2861_v27  ;;  %v5585_v42 = vpop.eup %5584  ;;  %v5396_v27 = vpack.c.bf16 %v3416_v53, %v3415_v46  ;;  %v3399_v13 = vld [vmem:[%s7381_s8 + $0x20] sm:$0xff] }
 0x77d   :  { %v2958_v11 = vpop.f32.mrb[42].mxu1  ;;  %v3029_v16 = vpop.f32.mrb[58].mxu0  ;;  %v2881_v5 = vsub.f32 1.0, %v5585_v42  ;;  %v2883_v4 = vmul.f32 %v5585_v42, %v7060_v55  ;;  %v3421_v42 = vld [vmem:[%s7381_s8 + $0xd0] sm:$0xff] }
 0x77e   :  { %v2879_v21 = vadd.f32 %v2878_v26, %v7619_v17  ;;  %v2959_v25 = vadd.f32 %v2958_v11, %v6507_v41  ;;  %v2960_v29 = vpop.f32.mrb[43].mxu1  ;;  %v4421_v33 = vpop.f32.mrb[59].mxu0  ;;  %v3400_v26 = vld [vmem:[%s7381_s8 + $0x28] sm:$0xff]  ;;  %v3418_v17 = vld [vmem:[%s7381_s8 + $0xb8] sm:$0xff] }
 0x77f   :  { %v2961_v35 = vadd.f32 %v2960_v29, %v6510_v62  ;;  %v5398_v11 = vpack.c.bf16 %v3400_v26, %v3399_v13  ;;  %v3402_v29 = vld [vmem:[%s7381_s8 + $0x38] sm:$0xff] }
 0x780   :  { %5586 = vtanh.f32 %v2879_v21  ;;  %v3033_v14 = vadd.f32 %v2959_v25, %v7620_v40  ;;  %v3401_v25 = vld [vmem:[%s7381_s8 + $0x30] sm:$0xff]  ;;  %v3420_v40 = vld [vmem:[%s7381_s8 + $0xc8] sm:$0xff] }
 0x781   :  { %v3040_v43 = vadd.f32 %v2961_v35, %v7621_v28  ;;  %v5402_v33 = vpack.c.bf16 %v3402_v29, %v3401_v25  ;;  %v3419_v35 = vld [vmem:[%s7381_s8 + $0xc0] sm:$0xff] }
 0x782   :  { %v3618_v60 = vmul.f32 -1.442695, %v3033_v14  ;;  %v5404_v14 = vpack.c.bf16 %v3420_v40, %v3419_v35  ;;  %v3403_v28 = vld [vmem:[%s7381_s8 + $0x40] sm:$0xff] }
 0x783   :  { %v3619_v48 = vmul.f32 -1.442695, %v3040_v43  ;;  %v3404_v43 = vld [vmem:[%s7381_s8 + $0x48] sm:$0xff] }
 0x784   :  { %5588 = vpow2.f32 %v3618_v60  ;;  %v5406_v60 = vpack.c.bf16 %v3404_v43, %v3403_v28 }
 0x785   :  { %5590 = vpow2.f32 %v3619_v48  ;;  %v3422_v48 = vld [vmem:[%s7381_s8 + $0xd8] sm:$0xff] }
 0x78a   :  { %v5587_v36 = vpop.eup %5586 }
 0x78b   :  { %v2882_v61 = vmul.f32 %v5587_v36, %v2881_v5  ;;  %v3405_v5 = vld [vmem:[%s7381_s8 + $0x50] sm:$0xff]  ;;  %v5408_v36 = vpack.c.bf16 %v3422_v48, %v3421_v42 }
 0x78d   :  { %v2884_v57 = vadd.f32 %v2883_v4, %v2882_v61  ;;  %v3406_v61 = vld [vmem:[%s7381_s8 + $0x58] sm:$0xff]  ;;  %v3423_v4 = vld [vmem:[%s7381_s8 + $0xe0] sm:$0xff] }
 0x78e   :  { %v5589_v2 = vpop.eup %5588 }
 0x78f   :  { %v3037_v49 = vadd.f32 1.0, %v5589_v2  ;;  %v7162_v0 = vsel %vm1327_vm13, %v2884_v57, %v7060_v55  ;;  %v2886_v38 = vsel %vm1327_vm13, %v2884_v57, 0.0  ;;  %v5591_v55 = vpop.eup %5590  ;;  %v3424_v57 = vld [vmem:[%s7381_s8 + $0xe8] sm:$0xff]  ;;  %v5410_v2 = vpack.c.bf16 %v3406_v61, %v3405_v5 }
 0x790   :  { %2888 = vst [vmem:[#allocation9 + $0x30] sm:$0xff] %v2886_v38  ;;  %3126 = vmatmul.mubr.f32.vlgmr.msra.gmra.mrb[44].mxu1 %v7162_v0  ;;  %4455 = vmatmul.mubr.f32.vlgmr.msra.gmra.mrb[60].mxu0 %v7162_v0  ;;  %v3408_v38 = vld [vmem:[%s7381_s8 + $0x68] sm:$0xff] }
 0x791   :  { %5592 = vrcp.f32 %v3037_v49  ;;  %5335 = vmatpush1.bf16.msra.mxu1 %v6085_v15  ;;  %5366 = vmatpush3.bf16.msra.mxu0 %v6229_v58  ;;  %v3044_v15 = vadd.f32 1.0, %v5591_v55  ;;  %v5412_v49 = vpack.c.bf16 %v3424_v57, %v3423_v4  ;;  %v3425_v55 = vld [vmem:[%s7381_s8 + $0xf0] sm:$0xff]  ;;  %v7631_v4 = vld [vmem:[#allocation61_spill] sm:$0xff] }
 0x792   :  { %5337 = vmatprep.subr.bf16.mxu1 %v6094_v20  ;;  %5367 = vmatprep.subr.bf16.mxu0 %v7495_v44  ;;  %v3030_v20 = vadd.f32 %v3029_v16, %v6544_v51  ;;  %v3417_v16 = vld [vmem:[%s7381_s8 + $0xb0] sm:$0xff] }
 0x793   :  { %3294 = vmatprep.mubr.f32.mxu1 %v7496_v8  ;;  %4489 = vmatprep.mubr.msk.f32.mxu0 %vm5768_vm5, %v7496_v8  ;;  %5594 = vrcp.f32 %v3044_v15  ;;  %v5400_v21 = vpack.c.bf16 %v3418_v17, %v3417_v16  ;;  %v3426_v15 = vld [vmem:[%s7381_s8 + $0xf8] sm:$0xff] }
 0x794   :  { %v7629_v17 = vld [vmem:[#allocation60_spill] sm:$0xff] }
 0x795   :  { %5339 = vmatpush1.bf16.msra.mxu1 %v6109_v31  ;;  %5369 = vmatpush3.bf16.msra.mxu0 %v6237_v22  ;;  %v7623_v31 = vld [vmem:[#allocation63_spill] sm:$0xff] }
 0x796   :  { %5341 = vmatprep.subr.bf16.mxu1 %v6121_v34  ;;  %5370 = vmatprep.subr.bf16.mxu0 %v7495_v44 }
 0x799   :  { %5343 = vmatpush1.bf16.msra.mxu1 %v6131_v47  ;;  %5372 = vmatpush3.bf16.msra.mxu0 %v6246_v9  ;;  %v3395_v9 = vld [vmem:[%s7381_s8] sm:$0xff] }
 0x79a   :  { %5345 = vmatprep.subr.bf16.mxu1 %v6141_v52  ;;  %5373 = vmatprep.subr.bf16.mxu0 %v7495_v44 }
 0x79b   :  { %v5593_v58 = vpop.eup %5592 }
 0x79c   :  { %v3047_v8 = vmul.f32 %v5593_v58, %v3030_v20  ;;  %v5414_v20 = vpack.c.bf16 %v3408_v38, %v3407_v12  ;;  %v5416_v58 = vpack.c.bf16 %v3426_v15, %v3425_v55 }
 0x79d   :  { %5347 = vmatpush1.bf16.msra.mxu1 %v6152_v1  ;;  %5375 = vmatpush3.bf16.msra.mxu0 %v6252_v45  ;;  %v5595_v47 = vpop.eup %5594  ;;  %v3396_v45 = vld [vmem:[%s7381_s8 + $0x8] sm:$0xff] }
 0x79e   :  { %v3048_v34 = vadd.f32 %v3047_v8, %v7623_v31  ;;  %5349 = vmatprep.subr.bf16.mxu1 %v6162_v3  ;;  %5376 = vmatprep.subr.bf16.mxu0 %v7495_v44  ;;  %v3050_v52 = vsub.f32 1.0, %v5595_v47  ;;  %v3409_v8 = vld [vmem:[%s7381_s8 + $0x70] sm:$0xff]  ;;  %v3410_v31 = vld [vmem:[%s7381_s8 + $0x78] sm:$0xff] }
 0x7a0   :  { %5596 = vtanh.f32 %v3048_v34  ;;  %v5418_v34 = vpack.c.bf16 %v3410_v31, %v3409_v8 }
 0x7a1   :  { %5351 = vmatpush1.bf16.msra.mxu1 %v6170_v18  ;;  %5378 = vmatpush3.bf16.msra.mxu0 %v6258_v50  ;;  %v3052_v18 = vmul.f32 %v5595_v47, %v7107_v30  ;;  %v5390_v50 = vpack.c.bf16 %v3396_v45, %v3395_v9 }
 0x7a2   :  { %5353 = vmatprep.subr.bf16.mxu1 %v6179_v23  ;;  %5379 = vmatprep.subr.bf16.mxu0 %v7495_v44 }
 0x7a5   :  { %5355 = vmatpush1.bf16.msra.mxu1 %v6189_v37  ;;  %5381 = vmatpush3.bf16.msra.mxu0 %v6264_v59  ;;  %v3413_v59 = vld [vmem:[%s7381_s8 + $0x90] sm:$0xff] }
 0x7a6   :  { %5357 = vmatprep.subr.bf16.mxu1 %v6198_v39  ;;  %5382 = vmatprep.subr.bf16.mxu0 %v7495_v44  ;;  %v7625_v37 = vld [vmem:[#allocation55_spill] sm:$0xff] }
 0x7a9   :  { %5359 = vmatpush1.bf16.msra.mxu1 %v6205_v56  ;;  %5384 = vmatpush3.bf16.msra.mxu0 %v6270_v10  ;;  %v3414_v10 = vld [vmem:[%s7381_s8 + $0x98] sm:$0xff] }
 0x7aa   :  { %v5597_v1 = vpop.eup %5596  ;;  %5361 = vmatprep.subr.bf16.mxu1 %v6214_v63  ;;  %5385 = vmatprep.subr.bf16.mxu0 %v7495_v44  ;;  %v3411_v63 = vld [vmem:[%s7381_s8 + $0x80] sm:$0xff]  ;;  %v3397_v44 = vld [vmem:[%s7381_s8 + $0x10] sm:$0xff] }
 0x7ab   :  { %v3051_v3 = vmul.f32 %v5597_v1, %v3050_v52 }
 0x7ad   :  { %5363 = vmatpush1.bf16.msra.mxu1 %v6225_v7  ;;  %5387 = vmatpush3.bf16.msra.mxu0 %v6276_v19  ;;  %v3053_v23 = vadd.f32 %v3052_v18, %v3051_v3  ;;  %v3412_v7 = vld [vmem:[%s7381_s8 + $0x88] sm:$0xff]  ;;  %v5392_v19 = vpack.c.bf16 %v3414_v10, %v3413_v59 }
 0x7ae   :  { %v5388_v22 = vpack.c.bf16 %v3412_v7, %v3411_v63  ;;  %v7626_v63 = vld [vmem:[#allocation57_spill] sm:$0xff] }
 0x7af   :  { %v7207_v39 = vsel %vm1149_vm12, %v3053_v23, %v7107_v30  ;;  %v3055_v56 = vsel %vm1149_vm12, %v3053_v23, 0.0  ;;  %v3398_v30 = vld [vmem:[%s7381_s8 + $0x18] sm:$0xff]  ;;  %s5769_s8 = smov [#allocation10]  }
 0x7b0   :  { %3057 = vst [vmem:[#allocation10 + $0x8] sm:$0xff] %v3055_v56  ;;  %3295 = vmatmul.mubr.f32.vlgmr.msra.gmra.mrb[46].mxu1 %v7207_v39  ;;  %4490 = vmatmul.mubr.f32.vlgmr.msra.gmra.mrb[62].mxu0 %v7207_v39  ;;  %v5394_v54 = vpack.c.bf16 %v3398_v30, %v3397_v44  ;;  %s3523_s30 = sshll.u32 %s5769_s8, 4  ;;  %s3524_s30 = int_to_ptr.vmem [resolvable:$true] %s3523_s30 }
 0x7b1   :  { %5389 = vmatprep.subr.bf16.mxu1 %v5388_v22  ;;  %s5686_s15 = scalar_lea.vmem %s3524_s30, 1024  ;;  %p5691_p11 = scmp.lt.s32.totalorder %s3524_s30, %s3524_s30 }
 0x7b2   :  { %5391 = vmatpush3.bf16.msra.mxu1 %v5390_v50  ;;  %p5687_p10 = scmp.ne.s32.totalorder %s3524_s30, %s5686_s15  ;;  %p5692_p12 = scmp.lt.s32.totalorder %s5686_s15, %s5686_s15 }
 0x7b3   :  { %5393 = vmatprep.subr.bf16.mxu1 %v5392_v19 }
 0x7b4   :  { %p5693_p13 = por %p5692_p12, %p5691_p11 }
 0x7b6   :  { %5395 = vmatpush3.bf16.msra.mxu1 %v5394_v54  ;;  %v7627_v54 = vld [vmem:[#allocation56_spill] sm:$0xff]  ;;  %p5694_p0 = pnand %p5693_p13, %p5687_p10 }
 0x7b7   :  { %5397 = vmatprep.subr.bf16.mxu1 %v5396_v27 }
 0x7ba   :  { %5399 = vmatpush3.bf16.msra.mxu1 %v5398_v11  ;;  %v7628_v11 = vld [vmem:[#allocation30_spill] sm:$0xff] }
 0x7bb   :  { %5401 = vmatprep.subr.bf16.mxu1 %v5400_v21 }
 0x7be   :  { %5403 = vmatpush3.bf16.msra.mxu1 %v5402_v33 }
 0x7bf   :  { %5405 = vmatprep.subr.bf16.mxu1 %v5404_v14 }
 0x7c2   :  { %5407 = vmatpush3.bf16.msra.mxu1 %v5406_v60 }
 0x7c3   :  { %5409 = vmatprep.subr.bf16.mxu1 %v5408_v36 }
 0x7c6   :  { %5411 = vmatpush3.bf16.msra.mxu1 %v5410_v2 }
 0x7c7   :  { %5413 = vmatprep.subr.bf16.mxu1 %v5412_v49 }
 0x7ca   :  { %5415 = vmatpush3.bf16.msra.mxu1 %v5414_v20 }
 0x7cb   :  { %5417 = vmatprep.subr.bf16.mxu1 %v5416_v58 }
 0x7ce   :  { %5419 = vmatpush3.bf16.msra.mxu1 %v5418_v34 }
 0x863   :  { %v3127_v47 = vpop.f32.mrb[44].mxu1  ;;  %v3198_v52 = vpop.f32.mrb[60].mxu0 }
 0x864   :  { %v3128_v1 = vadd.f32 %v3127_v47, %v7615_v24  ;;  %v3129_v3 = vpop.f32.mrb[45].mxu1  ;;  %v4456_v18 = vpop.f32.mrb[61].mxu0  ;;  %v3199_v19 = vadd.f32 %v3198_v52, %v7515_v6 }
 0x865   :  { %v3130_v23 = vadd.f32 %v3129_v3, %v7616_v32 }
 0x866   :  { %v3202_v56 = vadd.f32 %v3128_v1, %v7625_v37 }
 0x867   :  { %v3209_v7 = vadd.f32 %v3130_v23, %v7626_v63 }
 0x868   :  { %v3620_v22 = vmul.f32 -1.442695, %v3202_v56 }
 0x869   :  { %v3621_v9 = vmul.f32 -1.442695, %v3209_v7 }
 0x86a   :  { %5598 = vpow2.f32 %v3620_v22 }
 0x86b   :  { %5600 = vpow2.f32 %v3621_v9 }
 0x874   :  { %v5599_v45 = vpop.eup %5598 }
 0x875   :  { %v3206_v50 = vadd.f32 1.0, %v5599_v45  ;;  %v5601_v59 = vpop.eup %5600 }
 0x876   :  { %v3213_v10 = vadd.f32 1.0, %v5601_v59 }
 0x877   :  { %5602 = vrcp.f32 %v3206_v50 }
 0x878   :  { %5604 = vrcp.f32 %v3213_v10 }
 0x881   :  { %v5603_v24 = vpop.eup %5602 }
 0x882   :  { %v3216_v44 = vmul.f32 %v5603_v24, %v3199_v19  ;;  %v5605_v6 = vpop.eup %5604 }
 0x883   :  { %v3296_v30 = vpop.f32.mrb[46].mxu1  ;;  %v3367_v32 = vpop.f32.mrb[62].mxu0  ;;  %v3219_v33 = vsub.f32 1.0, %v5605_v6  ;;  %v3221_v14 = vmul.f32 %v5605_v6, %v7162_v0 }
 0x884   :  { %v3217_v46 = vadd.f32 %v3216_v44, %v7627_v54  ;;  %v3297_v53 = vadd.f32 %v3296_v30, %v6507_v41  ;;  %v3298_v27 = vpop.f32.mrb[47].mxu1  ;;  %v4491_v13 = vpop.f32.mrb[63].mxu0  ;;  %v3368_v5 = vadd.f32 %v3367_v32, %v6544_v51 }
 0x885   :  { %v3299_v26 = vadd.f32 %v3298_v27, %v6510_v62 }
 0x886   :  { %5606 = vtanh.f32 %v3217_v46  ;;  %v3371_v16 = vadd.f32 %v3297_v53, %v7628_v11 }
 0x887   :  { %v3378_v21 = vadd.f32 %v3299_v26, %v7629_v17 }
 0x888   :  { %v3622_v25 = vmul.f32 -1.442695, %v3371_v16 }
 0x889   :  { %v3623_v29 = vmul.f32 -1.442695, %v3378_v21 }
 0x88a   :  { %5608 = vpow2.f32 %v3622_v25 }
 0x88b   :  { %5610 = vpow2.f32 %v3623_v29 }
 0x890   :  { %v5607_v35 = vpop.eup %5606 }
 0x891   :  { %v3220_v40 = vmul.f32 %v5607_v35, %v3219_v33 }
 0x893   :  { %v3222_v41 = vadd.f32 %v3221_v14, %v3220_v40 }
 0x894   :  { %v5609_v28 = vpop.eup %5608 }
 0x895   :  { %v3375_v43 = vadd.f32 1.0, %v5609_v28  ;;  %v3224_v62 = vsel %vm972_vm11, %v3222_v41, 0.0  ;;  %v5611_v42 = vpop.eup %5610  ;;  %v3223_v8 = vsel %vm972_vm11, %v3222_v41, %v7162_v0 }
 0x896   :  { %3226 = vst [vmem:[#allocation9 + $0x38] sm:$0xff] %v3224_v62  ;;  %v3382_v48 = vadd.f32 1.0, %v5611_v42 }
 0x897   :  { %5612 = vrcp.f32 %v3375_v43 }
 0x898   :  { %5614 = vrcp.f32 %v3382_v48 }
 0x8a1   :  { %v5613_v36 = vpop.eup %5612 }
 0x8a2   :  { %v3385_v61 = vmul.f32 %v5613_v36, %v3368_v5  ;;  %v5615_v2 = vpop.eup %5614 }
 0x8a3   :  { %v3388_v49 = vsub.f32 1.0, %v5615_v2  ;;  %v3390_v55 = vmul.f32 %v5615_v2, %v7207_v39 }
 0x8a4   :  { %v3386_v57 = vadd.f32 %v3385_v61, %v7631_v4 }
 0x8a6   :  { %5616 = vtanh.f32 %v3386_v57 }
 0x8b0   :  { %v5617_v12 = vpop.eup %5616 }
 0x8b1   :  { %v3389_v38 = vmul.f32 %v5617_v12, %v3388_v49 }
 0x8b3   :  { %v3391_v15 = vadd.f32 %v3390_v55, %v3389_v38 }
 0x8b5   :  { %v3392_v58 = vsel %vm780_vm10, %v3391_v15, %v7207_v39  ;;  %v3393_v51 = vsel %vm780_vm10, %v3391_v15, 0.0 }
 0x8b6   :  { %3394 = vst [vmem:[#allocation10] sm:$0xff] %v3393_v51  ;;  %3498 = vmatprep.mubr.f32.mxu1 %v3392_v58 }
 0x8b7   :  { %3499 = vmatmul.mubr.f32.vlgmr.msra.gmra.mrb[48].mxu1 %v3223_v8 }
 0x8b8   :  { %5697 = shalt.err (!%p5694_p0)
}
 0x8b9   :  { %s5698_s18 = scalar_lea.hbm %s7384_s11, 1024 }
 0x8ba   :  { %p5699_p1 = scmp.ne.s32.totalorder %s7384_s11, %s5698_s18  ;;  %p5702_p2 = scmp.lt.u32.totalorder %s5698_s18, %s7384_s11 }
 0x8bc   :  { %p5704_p3 = pnand %p5702_p2, %p5699_p1 }
 0x8be   :  { %5707 = shalt.err (!%p5704_p3)
}
 0x8bf   :  { %s5771_s2 = smov 128   ;;  %s5772_s3 = smov 8  }
 0x8c0   :  { %3529 = dma.vmem_to_hbm [thread:$0]  %s3524_s30, 1024, %s7384_s11, [#allocation11], %s5771_s2, %s5771_s2, %s5772_s3  }
 0x8c1   :  { %s5708_s6 = scalar_lea.vmem %s3512_s14, 1024  ;;  %p5713_p5 = scmp.lt.s32.totalorder %s3512_s14, %s3512_s14 }
 0x8c2   :  { %p5709_p4 = scmp.ne.s32.totalorder %s3512_s14, %s5708_s6  ;;  %p5714_p6 = scmp.lt.s32.totalorder %s5708_s6, %s5708_s6 }
 0x8c4   :  { %p5715_p7 = por %p5714_p6, %p5713_p5 }
 0x8c6   :  { %p5716_p8 = pnand %p5715_p7, %p5709_p4 }
 0x8c8   :  { %5719 = shalt.err (!%p5716_p8)
}
 0x8c9   :  { %s5720_s25 = scalar_lea.hbm %s7383_s10, 1024 }
 0x8ca   :  { %p5721_p9 = scmp.ne.s32.totalorder %s7383_s10, %s5720_s25  ;;  %p5724_p10 = scmp.lt.u32.totalorder %s5720_s25, %s7383_s10 }
 0x8cc   :  { %p5726_p11 = pnand %p5724_p10, %p5721_p9 }
 0x8ce   :  { %5729 = shalt.err (!%p5726_p11)
}
 0x8cf   :  { %3517 = dma.vmem_to_hbm [thread:$0]  %s3512_s14, 1024, %s7383_s10, [#allocation5], %s5771_s2, %s5771_s2, %s5772_s3  }
 0x8d0   :  { %v3624_v39 = vld [vmem:[%s7382_s9] ss:$0 sm:$0xff]  ;;  %s5773_s8 = smov [#allocation12]  }
 0x8d1   :  { %s3536_s30 = sshll.u32 %s5773_s8, 4  ;;  %s3537_s30 = int_to_ptr.vmem [resolvable:$true] %s3536_s30 }
 0x8d2   :  { %s5730_s13 = scalar_lea.vmem %s3537_s30, 128  ;;  %p5735_p13 = scmp.lt.s32.totalorder %s3537_s30, %s3537_s30 }
 0x8d3   :  { %p5731_p12 = scmp.ne.s32.totalorder %s3537_s30, %s5730_s13  ;;  %p5736_p0 = scmp.lt.s32.totalorder %s5730_s13, %s5730_s13 }
 0x8d5   :  { %p5737_p1 = por %p5736_p0, %p5735_p13 }
 0x8d7   :  { %p5738_p2 = pnand %p5737_p1, %p5731_p12 }
 0x98a   :  { %v3929_v0 = vpop.f32.mrb[48].mxu1 }
 0x98b   :  { %v3930_v31 = vpop.f32.mrb[49].mxu1 }
 0x98c   :  { %v3931_v34 = vadd.f32 %v3930_v31, %v3929_v0 }
 0x98e   :  { %v3501_v47 = vadd.f32 %v3931_v34, %v3624_v39 }
 0x990   :  { %5618 = vtanh.f32 %v3501_v47 }
 0x99a   :  { %v5619_v52 = vpop.eup %5618 }
 0x99b   :  { %3505 = vst.msk [vmem:[#allocation12] sm:$0xff] %vm212_vm0, %v5619_v52 }
 0x99c   :  { %5741 = shalt.err (!%p5738_p2)
}
 0x99d   :  { %s5742_s9 = scalar_lea.hbm %s7385_s12, 128 }
 0x99e   :  { %p5743_p3 = scmp.ne.s32.totalorder %s7385_s12, %s5742_s9  ;;  %p5746_p4 = scmp.lt.u32.totalorder %s5742_s9, %s7385_s12 }
 0x9a0   :  { %p5748_p5 = pnand %p5746_p4, %p5743_p3 }
 0x9a2   :  { %5751 = shalt.err (!%p5748_p5)
}
 0x9a3   :  { %3539 = dma.vmem_to_hbm [thread:$0]  %s3537_s30, 128, %s7385_s12, [#allocation11]  }
 0x9a4   :  { %5756 = dma.done.wait [#allocation5], 1024  }
 0x9a5   :  { %5757 = vsyncadd [#allocation5], 4294966272 }
 0x9a6   :  { %5758 = dma.done.wait [#allocation11], 1152  }
 0x9a7   :  { %5759 = vsyncadd [#allocation11], 4294966144 }
 0x9a8   :  { %3549 = vsyncpa [#allocation4], 1 }
 0x9a9   :  { %3550 = vsyncpa [#allocation7], 1 }
 0x9aa   :  { %3551 = vsyncpa [#allocation5], 1 }
 0x9ab   :  { %3552 = vsyncpa [#allocation11], 1 }

</bundles_post_ra>
